<compile_context>
chip_gen: v7x
topology: tpu7x:2x2x1
jax: 0.10.0
libtpu: 0.0.40
codegen_flags: <defaults>
</compile_context>

<pallas_src>
import functools

import jax
import jax.numpy as jnp
from jax import lax
from jax.experimental import pallas as pl
from jax.experimental.pallas import tpu as pltpu


_NEG_SLOPE = 0.1
# Conservative scoped-VMEM budget that is valid on every generation
# (v5e default scoped 16 MiB, v7x physical 64 MiB).  v6e could go 64-96 MiB.
_VMEM_LIMIT_BYTES = 32 * 1024 * 1024


# --------------------------------------------------------------------------
# Tile pickers (avoid padding M in HBM: tiles are exact divisors)
# --------------------------------------------------------------------------
def _pick_m_tile(m, target=512):
    """Largest multiple-of-8 divisor of m that is <= target (falls back to m)."""
    for t in range(min(m, target), 7, -1):
        if m % t == 0 and t % 8 == 0:
            return t
    return m  # full dim is always a legal block


def _pick_row_tile(h, w_p, c_out, target_rows=64,
                   acc_budget_bytes=6 * 1024 * 1024):
    """Largest divisor of h (<= target_rows) whose f32 accumulator fits budget."""
    best = 1
    for r in range(1, min(h, target_rows) + 1):
        if h % r == 0 and r * w_p * max(c_out, 128) * 4 <= acc_budget_bytes:
            best = r
    return best


# --------------------------------------------------------------------------
# Kernel 1: 1x1 conv + folded BN + LeakyReLU   (single-K-tile fused matmul)
# --------------------------------------------------------------------------
def _conv1x1_kernel(x_ref, w_ref, shift_ref, o_ref, *, negative_slope):
    x = x_ref[...].astype(jnp.bfloat16)                      # cast in VMEM
    y = jnp.dot(x, w_ref[...], preferred_element_type=jnp.float32)
    y = y + shift_ref[...]                                    # folded BN shift
    y = jnp.where(y > 0, y, negative_slope * y)               # LeakyReLU(0.1)
    o_ref[...] = y.astype(o_ref.dtype)


def _conv1x1_bn_lrelu(x_nhwc, weight, bias, gamma, beta, mean, var, *,
                      eps=1e-5, negative_slope=_NEG_SLOPE, out_dtype=None,
                      tm_target=512):
    N, H, W, C_in = x_nhwc.shape
    C_out = weight.shape[0]
    M = N * H * W
    out_dtype = x_nhwc.dtype if out_dtype is None else out_dtype

    # Fold eval-mode BN: scale = g/sqrt(v+eps); W' = W*scale; shift = (b-m)*scale+beta
    scale = gamma * lax.rsqrt(var + eps)
    shift = ((bias - mean) * scale + beta).reshape(1, C_out).astype(jnp.float32)
    w_mat = (weight.reshape(C_out, C_in).T * scale[None, :]).astype(jnp.bfloat16)

    x_flat = x_nhwc.reshape(M, C_in)            # free reshape; no pad, no cast
    tm = _pick_m_tile(M, tm_target)
    grid = (M // tm,)

    out = pl.pallas_call(
        functools.partial(_conv1x1_kernel, negative_slope=negative_slope),
        out_shape=jax.ShapeDtypeStruct((M, C_out), out_dtype),
        grid_spec=pltpu.PrefetchScalarGridSpec(
            num_scalar_prefetch=0,
            grid=grid,
            in_specs=[
                pl.BlockSpec((tm, C_in), lambda i: (i, 0)),
                pl.BlockSpec((C_in, C_out), lambda i: (0, 0)),
                pl.BlockSpec((1, C_out), lambda i: (0, 0)),
            ],
            out_specs=pl.BlockSpec((tm, C_out), lambda i: (i, 0)),
        ),
        compiler_params=pltpu.CompilerParams(
            dimension_semantics=("parallel",),
            vmem_limit_bytes=_VMEM_LIMIT_BYTES,
        ),
        cost_estimate=pl.CostEstimate(
            flops=2 * M * C_in * C_out,
            transcendentals=0,
            bytes_accessed=(M * C_in * x_nhwc.dtype.itemsize
                            + C_in * C_out * 2
                            + M * C_out * jnp.dtype(out_dtype).itemsize)),
    )(x_flat, w_mat, shift)
    return out.reshape(N, H, W, C_out)


# --------------------------------------------------------------------------
# Kernel 2: 3x3/s1/p1 conv + folded BN + LeakyReLU (+ fused residual add)
#           tap-fused: 9 matmuls over shifted windows, NO im2col matrix.
# --------------------------------------------------------------------------
def _conv3x3_kernel(*refs, rows, width, width_p, row_blocks, negative_slope,
                    has_residual):
    if has_residual:
        ypad_ref, w_ref, shift_ref, xres_ref, o_ref, acc_ref = refs
    else:
        ypad_ref, w_ref, shift_ref, o_ref, acc_ref = refs
        xres_ref = None

    npx = rows * width_p
    if row_blocks == 1:
        base = 0                                  # static offsets (common case)
    else:
        base = pl.program_id(1) * npx

    # 9 tap matmuls over contiguous shifted windows of the flattened, padded
    # conv1 output.  Wrap contamination only hits the discarded pad columns.
    acc_ref[...] = jnp.dot(ypad_ref[0, pl.ds(base, npx), :], w_ref[0],
                           preferred_element_type=jnp.float32)
    for t in range(1, 9):
        dh, dw = divmod(t, 3)
        off = base + dh * width_p + dw
        acc_ref[...] += jnp.dot(ypad_ref[0, pl.ds(off, npx), :], w_ref[t],
                                preferred_element_type=jnp.float32)

    shift = shift_ref[...]                        # (1, C_out) f32

    def row_body(r, carry):
        # Valid columns of output row r live at flat offsets [r*Wp, r*Wp + W).
        v = acc_ref[pl.ds(r * width_p, width), :] + shift
        v = jnp.where(v > 0, v, negative_slope * v)             # LeakyReLU
        if xres_ref is not None:
            v = v + xres_ref[0, r].astype(jnp.float32)          # fused skip add
        o_ref[0, r] = v.astype(o_ref.dtype)
        return carry

    lax.fori_loop(0, rows, row_body, 0)


def _conv3x3_bn_lrelu(y_nhwc, weight, bias, gamma, beta, mean, var, *,
                      residual=None, eps=1e-5, negative_slope=_NEG_SLOPE,
                      out_dtype=None):
    N, H, W, C_mid = y_nhwc.shape
    C_out = weight.shape[0]
    if residual is not None:
        assert residual.shape == (N, H, W, C_out)
        out_dtype = residual.dtype if out_dtype is None else out_dtype
    else:
        out_dtype = y_nhwc.dtype if out_dtype is None else out_dtype

    Wp = W + 2
    # Rows padded (1, 2): the extra bottom row keeps the flattened tap windows
    # in-bounds (those elements land only in discarded columns).  Cols (1, 1).
    y_pad = jnp.pad(y_nhwc, ((0, 0), (1, 2), (1, 1), (0, 0)))
    Lp = (H + 3) * Wp
    y_flat = y_pad.reshape(N, Lp, C_mid)
    # TODO(synk): conv1 could write directly into this padded layout to remove
    # the (cheap, bf16, C/2-channel) pad pass entirely.

    scale = gamma * lax.rsqrt(var + eps)
    shift = ((bias - mean) * scale + beta).reshape(1, C_out).astype(jnp.float32)
    # (C_out, C_mid, 3, 3) -> (9, C_mid, C_out), BN scale folded into each tap.
    w_taps = (jnp.transpose(weight, (2, 3, 1, 0)).reshape(9, C_mid, C_out)
              * scale[None, None, :]).astype(jnp.bfloat16)

    R = _pick_row_tile(H, Wp, C_out)
    row_blocks = H // R
    grid = (N, row_blocks)

    in_specs = [
        pl.BlockSpec((1, Lp, C_mid), lambda n, g: (n, 0, 0)),      # full image
        pl.BlockSpec((9, C_mid, C_out), lambda n, g: (0, 0, 0)),   # all taps
        pl.BlockSpec((1, C_out), lambda n, g: (0, 0)),
    ]
    args = [y_flat, w_taps, shift]
    if residual is not None:
        in_specs.append(pl.BlockSpec((1, R, W, C_out), lambda n, g: (n, g, 0, 0)))
        args.append(residual)

    kernel = functools.partial(
        _conv3x3_kernel, rows=R, width=W, width_p=Wp, row_blocks=row_blocks,
        negative_slope=negative_slope, has_residual=residual is not None)

    out = pl.pallas_call(
        kernel,
        out_shape=jax.ShapeDtypeStruct((N, H, W, C_out), out_dtype),
        grid_spec=pltpu.PrefetchScalarGridSpec(
            num_scalar_prefetch=0,
            grid=grid,
            in_specs=in_specs,
            out_specs=pl.BlockSpec((1, R, W, C_out), lambda n, g: (n, g, 0, 0)),
            scratch_shapes=[pltpu.VMEM((R * Wp, C_out), jnp.float32)],
        ),
        compiler_params=pltpu.CompilerParams(
            dimension_semantics=("parallel", "parallel"),
            vmem_limit_bytes=_VMEM_LIMIT_BYTES,
        ),
        cost_estimate=pl.CostEstimate(
            flops=2 * 9 * N * H * Wp * C_mid * C_out,
            transcendentals=0,
            bytes_accessed=(N * Lp * C_mid * 2 + 9 * C_mid * C_out * 2
                            + N * H * W * C_out
                            * (jnp.dtype(out_dtype).itemsize
                               + (residual.dtype.itemsize if residual is not None
                                  else 0)))),
    )(*args)
    return out


# --------------------------------------------------------------------------
# Module ports
# --------------------------------------------------------------------------
class ConvolutionalLayer:
    """Conv2d + BatchNorm2d (eval running stats) + LeakyReLU(0.1), NHWC."""

    def __init__(self, in_channels, out_channels, kernel_size, stride, padding,
                 key):
        k_w, k_b = jax.random.split(key)
        fan_in = in_channels * kernel_size * kernel_size
        bound = 1.0 / (fan_in ** 0.5)
        self.weight = jax.random.uniform(
            k_w, (out_channels, in_channels, kernel_size, kernel_size),
            jnp.float32, -bound, bound)
        self.bias = jax.random.uniform(
            k_b, (out_channels,), jnp.float32, -bound, bound)
        self.gamma = jnp.ones((out_channels,), jnp.float32)
        self.beta = jnp.zeros((out_channels,), jnp.float32)
        self.running_mean = jnp.zeros((out_channels,), jnp.float32)
        self.running_var = jnp.ones((out_channels,), jnp.float32)
        self.kernel_size = kernel_size
        self.stride = stride
        self.padding = padding

    def __call__(self, x_nhwc, *, residual=None, out_dtype=None):
        k, s, p = self.kernel_size, self.stride, self.padding
        if k == 1 and s == 1 and p == 0:
            assert residual is None
            return _conv1x1_bn_lrelu(
                x_nhwc, self.weight, self.bias, self.gamma, self.beta,
                self.running_mean, self.running_var, out_dtype=out_dtype)
        if k == 3 and s == 1 and p == 1:
            return _conv3x3_bn_lrelu(
                x_nhwc, self.weight, self.bias, self.gamma, self.beta,
                self.running_mean, self.running_var, residual=residual,
                out_dtype=out_dtype)
        # TODO(synk): only the 1x1/s1/p0 and 3x3/s1/p1 shapes used by the
        # Darknet-53 ResidualLayer are lowered to Pallas.
        raise NotImplementedError((k, s, p))


class ResidualLayer:
    """x + ConvBNLReLU_3x3(ConvBNLReLU_1x1(x))  (Darknet-53 residual block)."""

    def __init__(self, in_channels, key):
        k1, k2 = jax.random.split(key)
        mid = in_channels // 2
        self.conv1 = ConvolutionalLayer(in_channels, mid, 1, 1, 0, k1)
        self.conv2 = ConvolutionalLayer(mid, in_channels, 3, 1, 1, k2)

    def __call__(self, x_nchw):
        # TODO(synk): keep a full Darknet stack NHWC end-to-end; these two
        # transposes exist only because the PyTorch interface is NCHW.
        x_nhwc = jnp.transpose(x_nchw, (0, 2, 3, 1))
        # Intermediate kept bf16: its only consumer is the bf16 MXU matmul.
        y = self.conv1(x_nhwc, out_dtype=jnp.bfloat16)
        out = self.conv2(y, residual=x_nhwc, out_dtype=x_nchw.dtype)
        return jnp.transpose(out, (0, 3, 1, 2))


# --------------------------------------------------------------------------
# Plain-JAX reference (f32, bf16-matched intermediate) for correctness checks
# --------------------------------------------------------------------------
def _conv_layer_reference(layer, x_nchw, eps=1e-5):
    y = lax.conv_general_dilated(
        x_nchw, layer.weight, (layer.stride, layer.stride),
        ((layer.padding, layer.padding), (layer.padding, layer.padding)),
        dimension_numbers=("NCHW", "OIHW", "NCHW"))
    y = y + layer.bias[None, :, None, None]
    scale = layer.gamma / jnp.sqrt(layer.running_var + eps)
    y = ((y - layer.running_mean[None, :, None, None])
         * scale[None, :, None, None] + layer.beta[None, :, None, None])
    return jnp.where(y > 0, y, 0.1 * y)


def _residual_layer_reference(layer, x_nchw):
    y = _conv_layer_reference(layer.conv1, x_nchw)
    # Match the kernel's bf16 intermediate so a tight tolerance is meaningful.
    y = y.astype(jnp.bfloat16).astype(jnp.float32)
    return x_nchw + _conv_layer_reference(layer.conv2, y)


if __name__ == "__main__":
    key = jax.random.PRNGKey(0)
    k_p1, k_x1, k_p2, k_x2 = jax.random.split(key, 4)

    # Test 1: small shapes (batch=2, channels=16, 16x16 spatial, NCHW input).
    layer = ResidualLayer(in_channels=16, key=k_p1)
    x = jax.random.normal(k_x1, (2, 16, 16, 16), jnp.float32)
    out = jax.jit(layer.__call__)(x)
    jax.block_until_ready(out)
    assert out.shape == x.shape, out.shape
    err = float(jnp.max(jnp.abs(out - _residual_layer_reference(layer, x))))
    assert err < 6e-2, f"test1 max abs error vs reference: {err}"

    # Test 2: larger channel count + non-multiple-of-8 width (exercises tap
    # ordering and bf16 accumulation at a more realistic contraction size).
    layer2 = ResidualLayer(in_channels=32, key=k_p2)
    x2 = jax.random.normal(k_x2, (1, 32, 8, 12), jnp.float32)
    out2 = jax.jit(layer2.__call__)(x2)
    jax.block_until_ready(out2)
    assert out2.shape == x2.shape, out2.shape
    err2 = float(jnp.max(jnp.abs(out2 - _residual_layer_reference(layer2, x2))))
    assert err2 < 6e-2, f"test2 max abs error vs reference: {err2}"

    print("KERNEL_OK")
</pallas_src>

<mosaic_0001>
module attributes {stable_mosaic.version = 11 : i64} {
  func.func @_conv1x1_kernel(%arg0: i32, %arg1: memref<512x16xf32, #tpu.memory_space<vmem>>, %arg2: memref<16x8xbf16, #tpu.memory_space<vmem>>, %arg3: memref<1x8xf32, #tpu.memory_space<vmem>>, %arg4: memref<512x8xbf16, #tpu.memory_space<vmem>>) attributes {dimension_semantics = [#tpu.dimension_semantics<parallel>], iteration_bounds = array<i64: 1>, scalar_prefetch = 0 : i64, scratch_operands = 0 : i64, tpu.core_type = #tpu.core_type<tc>, window_params = [{transform_indices = @transform_0, window_bounds = array<i64: 512, 16>}, {pipeline_mode = #tpu.pipeline_mode<synchronous>, transform_indices = @transform_1, window_bounds = array<i64: 16, 8>}, {pipeline_mode = #tpu.pipeline_mode<synchronous>, transform_indices = @transform_2, window_bounds = array<i64: 1, 8>}, {transform_indices = @transform_3, window_bounds = array<i64: 512, 8>}]} {
    %c0 = arith.constant 0 : index
    %c0_0 = arith.constant 0 : index
    %0 = vector.load %arg1[%c0, %c0_0] : memref<512x16xf32, #tpu.memory_space<vmem>>, vector<512x16xf32>
    %1 = arith.truncf %0 : vector<512x16xf32> to vector<512x16xbf16>
    %c0_1 = arith.constant 0 : index
    %c0_2 = arith.constant 0 : index
    %2 = vector.load %arg2[%c0_1, %c0_2] : memref<16x8xbf16, #tpu.memory_space<vmem>>, vector<16x8xbf16>
    %cst = arith.constant dense<0.000000e+00> : vector<512x8xf32>
    %3 = tpu.matmul %1, %2, %cst {dimension_numbers = #tpu.dot_dimension_numbers<[1], [0], [0], [1], [0, 0, 1, 1], [], []>} : vector<512x16xbf16>, vector<16x8xbf16>, vector<512x8xf32> -> vector<512x8xf32>
    %c0_3 = arith.constant 0 : index
    %c0_4 = arith.constant 0 : index
    %4 = vector.load %arg3[%c0_3, %c0_4] : memref<1x8xf32, #tpu.memory_space<vmem>>, vector<1x8xf32>
    %5 = vector.broadcast %4 : vector<1x8xf32> to vector<512x8xf32>
    %6 = arith.addf %3, %5 : vector<512x8xf32>
    %cst_5 = arith.constant 0.000000e+00 : f32
    %7 = vector.broadcast %cst_5 : f32 to vector<512x8xf32>
    %8 = arith.cmpf ogt, %6, %7 : vector<512x8xf32>
    %cst_6 = arith.constant 1.000000e-01 : f32
    %9 = vector.broadcast %cst_6 : f32 to vector<512x8xf32>
    %10 = arith.mulf %9, %6 : vector<512x8xf32>
    %11 = arith.select %8, %6, %10 : vector<512x8xi1>, vector<512x8xf32>
    %12 = arith.truncf %11 : vector<512x8xf32> to vector<512x8xbf16>
    %c0_7 = arith.constant 0 : index
    %c0_8 = arith.constant 0 : index
    %13 = vector.load %arg4[%c0_7, %c0_8] : memref<512x8xbf16, #tpu.memory_space<vmem>>, vector<512x8xbf16>
    tpu.vector_store %arg4[%c0_7, %c0_8], %12 {strides = array<i32>} : memref<512x8xbf16, #tpu.memory_space<vmem>>, vector<512x8xbf16>,
    return
  }
  func.func @transform_0(%arg0: i32) -> (i32, i32) {
    %c0_i32 = arith.constant 0 : i32
    %c0_i32_0 = arith.constant 0 : i32
    return %arg0, %c0_i32 : i32, i32
  }
  func.func @transform_1(%arg0: i32) -> (i32, i32) {
    %c0_i32 = arith.constant 0 : i32
    %c0_i32_0 = arith.constant 0 : i32
    %c0_i32_1 = arith.constant 0 : i32
    return %c0_i32, %c0_i32_0 : i32, i32
  }
  func.func @transform_2(%arg0: i32) -> (i32, i32) {
    %c0_i32 = arith.constant 0 : i32
    %c0_i32_0 = arith.constant 0 : i32
    %c0_i32_1 = arith.constant 0 : i32
    return %c0_i32, %c0_i32_0 : i32, i32
  }
  func.func @transform_3(%arg0: i32) -> (i32, i32) {
    %c0_i32 = arith.constant 0 : i32
    %c0_i32_0 = arith.constant 0 : i32
    return %arg0, %c0_i32 : i32, i32
  }
}

module attributes {stable_mosaic.version = 11 : i64} {
  func.func @_conv3x3_kernel(%arg0: i32, %arg1: i32, %arg2: memref<1x342x8xbf16, #tpu.memory_space<vmem>>, %arg3: memref<9x8x16xbf16, #tpu.memory_space<vmem>>, %arg4: memref<1x16xf32, #tpu.memory_space<vmem>>, %arg5: memref<1x16x16x16xf32, #tpu.memory_space<vmem>>, %arg6: memref<1x16x16x16xf32, #tpu.memory_space<vmem>>, %arg7: memref<288x16xf32, #tpu.memory_space<vmem>>) attributes {dimension_semantics = [#tpu.dimension_semantics<parallel>, #tpu.dimension_semantics<parallel>], iteration_bounds = array<i64: 2, 1>, scalar_prefetch = 0 : i64, scratch_operands = 1 : i64, tpu.core_type = #tpu.core_type<tc>, window_params = [{transform_indices = @transform_0, window_bounds = array<i64: 1, 342, 8>}, {pipeline_mode = #tpu.pipeline_mode<synchronous>, transform_indices = @transform_1, window_bounds = array<i64: 9, 8, 16>}, {pipeline_mode = #tpu.pipeline_mode<synchronous>, transform_indices = @transform_2, window_bounds = array<i64: 1, 16>}, {transform_indices = @transform_3, window_bounds = array<i64: 1, 16, 16, 16>}, {transform_indices = @transform_4, window_bounds = array<i64: 1, 16, 16, 16>}]} {
    %c0 = arith.constant 0 : index
    %c0_0 = arith.constant 0 : index
    %c0_1 = arith.constant 0 : index
    %0 = vector.load %arg2[%c0, %c0_0, %c0_1] : memref<1x342x8xbf16, #tpu.memory_space<vmem>>, vector<1x288x8xbf16>
    %1 = vector.shape_cast %0 : vector<1x288x8xbf16> to vector<288x8xbf16>
    %c0_2 = arith.constant 0 : index
    %c0_3 = arith.constant 0 : index
    %c0_4 = arith.constant 0 : index
    %2 = vector.load %arg3[%c0_2, %c0_3, %c0_4] : memref<9x8x16xbf16, #tpu.memory_space<vmem>>, vector<1x8x16xbf16>
    %3 = vector.shape_cast %2 : vector<1x8x16xbf16> to vector<8x16xbf16>
    %cst = arith.constant dense<0.000000e+00> : vector<288x16xf32>
    %4 = tpu.matmul %1, %3, %cst {dimension_numbers = #tpu.dot_dimension_numbers<[1], [0], [0], [1], [0, 0, 1, 1], [], []>} : vector<288x8xbf16>, vector<8x16xbf16>, vector<288x16xf32> -> vector<288x16xf32>
    %c0_5 = arith.constant 0 : index
    %c0_6 = arith.constant 0 : index
    %5 = vector.load %arg7[%c0_5, %c0_6] : memref<288x16xf32, #tpu.memory_space<vmem>>, vector<288x16xf32>
    tpu.vector_store %arg7[%c0_5, %c0_6], %4 {strides = array<i32>} : memref<288x16xf32, #tpu.memory_space<vmem>>, vector<288x16xf32>,
    %c0_7 = arith.constant 0 : index
    %c0_8 = arith.constant 0 : index
    %6 = vector.load %arg7[%c0_7, %c0_8] : memref<288x16xf32, #tpu.memory_space<vmem>>, vector<288x16xf32>
    %c0_9 = arith.constant 0 : index
    %c1 = arith.constant 1 : index
    %c0_10 = arith.constant 0 : index
    %7 = vector.load %arg2[%c0_9, %c1, %c0_10] : memref<1x342x8xbf16, #tpu.memory_space<vmem>>, vector<1x288x8xbf16>
    %8 = vector.shape_cast %7 : vector<1x288x8xbf16> to vector<288x8xbf16>
    %c1_11 = arith.constant 1 : index
    %c0_12 = arith.constant 0 : index
    %c0_13 = arith.constant 0 : index
    %9 = vector.load %arg3[%c1_11, %c0_12, %c0_13] : memref<9x8x16xbf16, #tpu.memory_space<vmem>>, vector<1x8x16xbf16>
    %10 = vector.shape_cast %9 : vector<1x8x16xbf16> to vector<8x16xbf16>
    %cst_14 = arith.constant dense<0.000000e+00> : vector<288x16xf32>
    %11 = tpu.matmul %8, %10, %cst_14 {dimension_numbers = #tpu.dot_dimension_numbers<[1], [0], [0], [1], [0, 0, 1, 1], [], []>} : vector<288x8xbf16>, vector<8x16xbf16>, vector<288x16xf32> -> vector<288x16xf32>
    %12 = arith.addf %6, %11 : vector<288x16xf32>
    %c0_15 = arith.constant 0 : index
    %c0_16 = arith.constant 0 : index
    %13 = vector.load %arg7[%c0_15, %c0_16] : memref<288x16xf32, #tpu.memory_space<vmem>>, vector<288x16xf32>
    tpu.vector_store %arg7[%c0_15, %c0_16], %12 {strides = array<i32>} : memref<288x16xf32, #tpu.memory_space<vmem>>, vector<288x16xf32>,
    %c0_17 = arith.constant 0 : index
    %c0_18 = arith.constant 0 : index
    %14 = vector.load %arg7[%c0_17, %c0_18] : memref<288x16xf32, #tpu.memory_space<vmem>>, vector<288x16xf32>
    %c0_19 = arith.constant 0 : index
    %c2 = arith.constant 2 : index
    %c0_20 = arith.constant 0 : index
    %15 = vector.load %arg2[%c0_19, %c2, %c0_20] : memref<1x342x8xbf16, #tpu.memory_space<vmem>>, vector<1x288x8xbf16>
    %16 = vector.shape_cast %15 : vector<1x288x8xbf16> to vector<288x8xbf16>
    %c2_21 = arith.constant 2 : index
    %c0_22 = arith.constant 0 : index
    %c0_23 = arith.constant 0 : index
    %17 = vector.load %arg3[%c2_21, %c0_22, %c0_23] : memref<9x8x16xbf16, #tpu.memory_space<vmem>>, vector<1x8x16xbf16>
    %18 = vector.shape_cast %17 : vector<1x8x16xbf16> to vector<8x16xbf16>
    %cst_24 = arith.constant dense<0.000000e+00> : vector<288x16xf32>
    %19 = tpu.matmul %16, %18, %cst_24 {dimension_numbers = #tpu.dot_dimension_numbers<[1], [0], [0], [1], [0, 0, 1, 1], [], []>} : vector<288x8xbf16>, vector<8x16xbf16>, vector<288x16xf32> -> vector<288x16xf32>
    %20 = arith.addf %14, %19 : vector<288x16xf32>
    %c0_25 = arith.constant 0 : index
    %c0_26 = arith.constant 0 : index
    %21 = vector.load %arg7[%c0_25, %c0_26] : memref<288x16xf32, #tpu.memory_space<vmem>>, vector<288x16xf32>
    tpu.vector_store %arg7[%c0_25, %c0_26], %20 {strides = array<i32>} : memref<288x16xf32, #tpu.memory_space<vmem>>, vector<288x16xf32>,
    %c0_27 = arith.constant 0 : index
    %c0_28 = arith.constant 0 : index
    %22 = vector.load %arg7[%c0_27, %c0_28] : memref<288x16xf32, #tpu.memory_space<vmem>>, vector<288x16xf32>
    %c0_29 = arith.constant 0 : index
    %c18 = arith.constant 18 : index
    %c0_30 = arith.constant 0 : index
    %23 = vector.load %arg2[%c0_29, %c18, %c0_30] : memref<1x342x8xbf16, #tpu.memory_space<vmem>>, vector<1x288x8xbf16>
    %24 = vector.shape_cast %23 : vector<1x288x8xbf16> to vector<288x8xbf16>
    %c3 = arith.constant 3 : index
    %c0_31 = arith.constant 0 : index
    %c0_32 = arith.constant 0 : index
    %25 = vector.load %arg3[%c3, %c0_31, %c0_32] : memref<9x8x16xbf16, #tpu.memory_space<vmem>>, vector<1x8x16xbf16>
    %26 = vector.shape_cast %25 : vector<1x8x16xbf16> to vector<8x16xbf16>
    %cst_33 = arith.constant dense<0.000000e+00> : vector<288x16xf32>
    %27 = tpu.matmul %24, %26, %cst_33 {dimension_numbers = #tpu.dot_dimension_numbers<[1], [0], [0], [1], [0, 0, 1, 1], [], []>} : vector<288x8xbf16>, vector<8x16xbf16>, vector<288x16xf32> -> vector<288x16xf32>
    %28 = arith.addf %22, %27 : vector<288x16xf32>
    %c0_34 = arith.constant 0 : index
    %c0_35 = arith.constant 0 : index
    %29 = vector.load %arg7[%c0_34, %c0_35] : memref<288x16xf32, #tpu.memory_space<vmem>>, vector<288x16xf32>
    tpu.vector_store %arg7[%c0_34, %c0_35], %28 {strides = array<i32>} : memref<288x16xf32, #tpu.memory_space<vmem>>, vector<288x16xf32>,
    %c0_36 = arith.constant 0 : index
    %c0_37 = arith.constant 0 : index
    %30 = vector.load %arg7[%c0_36, %c0_37] : memref<288x16xf32, #tpu.memory_space<vmem>>, vector<288x16xf32>
    %c0_38 = arith.constant 0 : index
    %c19 = arith.constant 19 : index
    %c0_39 = arith.constant 0 : index
    %31 = vector.load %arg2[%c0_38, %c19, %c0_39] : memref<1x342x8xbf16, #tpu.memory_space<vmem>>, vector<1x288x8xbf16>
    %32 = vector.shape_cast %31 : vector<1x288x8xbf16> to vector<288x8xbf16>
    %c4 = arith.constant 4 : index
    %c0_40 = arith.constant 0 : index
    %c0_41 = arith.constant 0 : index
    %33 = vector.load %arg3[%c4, %c0_40, %c0_41] : memref<9x8x16xbf16, #tpu.memory_space<vmem>>, vector<1x8x16xbf16>
    %34 = vector.shape_cast %33 : vector<1x8x16xbf16> to vector<8x16xbf16>
    %cst_42 = arith.constant dense<0.000000e+00> : vector<288x16xf32>
    %35 = tpu.matmul %32, %34, %cst_42 {dimension_numbers = #tpu.dot_dimension_numbers<[1], [0], [0], [1], [0, 0, 1, 1], [], []>} : vector<288x8xbf16>, vector<8x16xbf16>, vector<288x16xf32> -> vector<288x16xf32>
    %36 = arith.addf %30, %35 : vector<288x16xf32>
    %c0_43 = arith.constant 0 : index
    %c0_44 = arith.constant 0 : index
    %37 = vector.load %arg7[%c0_43, %c0_44] : memref<288x16xf32, #tpu.memory_space<vmem>>, vector<288x16xf32>
    tpu.vector_store %arg7[%c0_43, %c0_44], %36 {strides = array<i32>} : memref<288x16xf32, #tpu.memory_space<vmem>>, vector<288x16xf32>,
    %c0_45 = arith.constant 0 : index
    %c0_46 = arith.constant 0 : index
    %38 = vector.load %arg7[%c0_45, %c0_46] : memref<288x16xf32, #tpu.memory_space<vmem>>, vector<288x16xf32>
    %c0_47 = arith.constant 0 : index
    %c20 = arith.constant 20 : index
    %c0_48 = arith.constant 0 : index
    %39 = vector.load %arg2[%c0_47, %c20, %c0_48] : memref<1x342x8xbf16, #tpu.memory_space<vmem>>, vector<1x288x8xbf16>
    %40 = vector.shape_cast %39 : vector<1x288x8xbf16> to vector<288x8xbf16>
    %c5 = arith.constant 5 : index
    %c0_49 = arith.constant 0 : index
    %c0_50 = arith.constant 0 : index
    %41 = vector.load %arg3[%c5, %c0_49, %c0_50] : memref<9x8x16xbf16, #tpu.memory_space<vmem>>, vector<1x8x16xbf16>
    %42 = vector.shape_cast %41 : vector<1x8x16xbf16> to vector<8x16xbf16>
    %cst_51 = arith.constant dense<0.000000e+00> : vector<288x16xf32>
    %43 = tpu.matmul %40, %42, %cst_51 {dimension_numbers = #tpu.dot_dimension_numbers<[1], [0], [0], [1], [0, 0, 1, 1], [], []>} : vector<288x8xbf16>, vector<8x16xbf16>, vector<288x16xf32> -> vector<288x16xf32>
    %44 = arith.addf %38, %43 : vector<288x16xf32>
    %c0_52 = arith.constant 0 : index
    %c0_53 = arith.constant 0 : index
    %45 = vector.load %arg7[%c0_52, %c0_53] : memref<288x16xf32, #tpu.memory_space<vmem>>, vector<288x16xf32>
    tpu.vector_store %arg7[%c0_52, %c0_53], %44 {strides = array<i32>} : memref<288x16xf32, #tpu.memory_space<vmem>>, vector<288x16xf32>,
    %c0_54 = arith.constant 0 : index
    %c0_55 = arith.constant 0 : index
    %46 = vector.load %arg7[%c0_54, %c0_55] : memref<288x16xf32, #tpu.memory_space<vmem>>, vector<288x16xf32>
    %c0_56 = arith.constant 0 : index
    %c36 = arith.constant 36 : index
    %c0_57 = arith.constant 0 : index
    %47 = vector.load %arg2[%c0_56, %c36, %c0_57] : memref<1x342x8xbf16, #tpu.memory_space<vmem>>, vector<1x288x8xbf16>
    %48 = vector.shape_cast %47 : vector<1x288x8xbf16> to vector<288x8xbf16>
    %c6 = arith.constant 6 : index
    %c0_58 = arith.constant 0 : index
    %c0_59 = arith.constant 0 : index
    %49 = vector.load %arg3[%c6, %c0_58, %c0_59] : memref<9x8x16xbf16, #tpu.memory_space<vmem>>, vector<1x8x16xbf16>
    %50 = vector.shape_cast %49 : vector<1x8x16xbf16> to vector<8x16xbf16>
    %cst_60 = arith.constant dense<0.000000e+00> : vector<288x16xf32>
    %51 = tpu.matmul %48, %50, %cst_60 {dimension_numbers = #tpu.dot_dimension_numbers<[1], [0], [0], [1], [0, 0, 1, 1], [], []>} : vector<288x8xbf16>, vector<8x16xbf16>, vector<288x16xf32> -> vector<288x16xf32>
    %52 = arith.addf %46, %51 : vector<288x16xf32>
    %c0_61 = arith.constant 0 : index
    %c0_62 = arith.constant 0 : index
    %53 = vector.load %arg7[%c0_61, %c0_62] : memref<288x16xf32, #tpu.memory_space<vmem>>, vector<288x16xf32>
    tpu.vector_store %arg7[%c0_61, %c0_62], %52 {strides = array<i32>} : memref<288x16xf32, #tpu.memory_space<vmem>>, vector<288x16xf32>,
    %c0_63 = arith.constant 0 : index
    %c0_64 = arith.constant 0 : index
    %54 = vector.load %arg7[%c0_63, %c0_64] : memref<288x16xf32, #tpu.memory_space<vmem>>, vector<288x16xf32>
    %c0_65 = arith.constant 0 : index
    %c37 = arith.constant 37 : index
    %c0_66 = arith.constant 0 : index
    %55 = vector.load %arg2[%c0_65, %c37, %c0_66] : memref<1x342x8xbf16, #tpu.memory_space<vmem>>, vector<1x288x8xbf16>
    %56 = vector.shape_cast %55 : vector<1x288x8xbf16> to vector<288x8xbf16>
    %c7 = arith.constant 7 : index
    %c0_67 = arith.constant 0 : index
    %c0_68 = arith.constant 0 : index
    %57 = vector.load %arg3[%c7, %c0_67, %c0_68] : memref<9x8x16xbf16, #tpu.memory_space<vmem>>, vector<1x8x16xbf16>
    %58 = vector.shape_cast %57 : vector<1x8x16xbf16> to vector<8x16xbf16>
    %cst_69 = arith.constant dense<0.000000e+00> : vector<288x16xf32>
    %59 = tpu.matmul %56, %58, %cst_69 {dimension_numbers = #tpu.dot_dimension_numbers<[1], [0], [0], [1], [0, 0, 1, 1], [], []>} : vector<288x8xbf16>, vector<8x16xbf16>, vector<288x16xf32> -> vector<288x16xf32>
    %60 = arith.addf %54, %59 : vector<288x16xf32>
    %c0_70 = arith.constant 0 : index
    %c0_71 = arith.constant 0 : index
    %61 = vector.load %arg7[%c0_70, %c0_71] : memref<288x16xf32, #tpu.memory_space<vmem>>, vector<288x16xf32>
    tpu.vector_store %arg7[%c0_70, %c0_71], %60 {strides = array<i32>} : memref<288x16xf32, #tpu.memory_space<vmem>>, vector<288x16xf32>,
    %c0_72 = arith.constant 0 : index
    %c0_73 = arith.constant 0 : index
    %62 = vector.load %arg7[%c0_72, %c0_73] : memref<288x16xf32, #tpu.memory_space<vmem>>, vector<288x16xf32>
    %c0_74 = arith.constant 0 : index
    %c38 = arith.constant 38 : index
    %c0_75 = arith.constant 0 : index
    %63 = vector.load %arg2[%c0_74, %c38, %c0_75] : memref<1x342x8xbf16, #tpu.memory_space<vmem>>, vector<1x288x8xbf16>
    %64 = vector.shape_cast %63 : vector<1x288x8xbf16> to vector<288x8xbf16>
    %c8 = arith.constant 8 : index
    %c0_76 = arith.constant 0 : index
    %c0_77 = arith.constant 0 : index
    %65 = vector.load %arg3[%c8, %c0_76, %c0_77] : memref<9x8x16xbf16, #tpu.memory_space<vmem>>, vector<1x8x16xbf16>
    %66 = vector.shape_cast %65 : vector<1x8x16xbf16> to vector<8x16xbf16>
    %cst_78 = arith.constant dense<0.000000e+00> : vector<288x16xf32>
    %67 = tpu.matmul %64, %66, %cst_78 {dimension_numbers = #tpu.dot_dimension_numbers<[1], [0], [0], [1], [0, 0, 1, 1], [], []>} : vector<288x8xbf16>, vector<8x16xbf16>, vector<288x16xf32> -> vector<288x16xf32>
    %68 = arith.addf %62, %67 : vector<288x16xf32>
    %c0_79 = arith.constant 0 : index
    %c0_80 = arith.constant 0 : index
    %69 = vector.load %arg7[%c0_79, %c0_80] : memref<288x16xf32, #tpu.memory_space<vmem>>, vector<288x16xf32>
    tpu.vector_store %arg7[%c0_79, %c0_80], %68 {strides = array<i32>} : memref<288x16xf32, #tpu.memory_space<vmem>>, vector<288x16xf32>,
    %c0_81 = arith.constant 0 : index
    %c0_82 = arith.constant 0 : index
    %70 = vector.load %arg4[%c0_81, %c0_82] : memref<1x16xf32, #tpu.memory_space<vmem>>, vector<1x16xf32>
    %c0_i32 = arith.constant 0 : i32
    %c16_i32 = arith.constant 16 : i32
    %71 = arith.addi %c0_i32, %c16_i32 : i32
    %c1_i32 = arith.constant 1 : i32
    scf.for %arg8 = %c0_i32 to %71 step %c1_i32  : i32 {
      %c18_i32 = arith.constant 18 : i32
      %72 = arith.muli %arg8, %c18_i32 : i32
      %73 = arith.index_cast %72 : i32 to index
      %c0_84 = arith.constant 0 : index
      %74 = vector.load %arg7[%73, %c0_84] : memref<288x16xf32, #tpu.memory_space<vmem>>, vector<16x16xf32>
      %75 = vector.broadcast %70 : vector<1x16xf32> to vector<16x16xf32>
      %76 = arith.addf %74, %75 : vector<16x16xf32>
      %cst_85 = arith.constant 0.000000e+00 : f32
      %77 = vector.broadcast %cst_85 : f32 to vector<16x16xf32>
      %78 = arith.cmpf ogt, %76, %77 : vector<16x16xf32>
      %cst_86 = arith.constant 1.000000e-01 : f32
      %79 = vector.broadcast %cst_86 : f32 to vector<16x16xf32>
      %80 = arith.mulf %79, %76 : vector<16x16xf32>
      %81 = arith.select %78, %76, %80 : vector<16x16xi1>, vector<16x16xf32>
      %c0_87 = arith.constant 0 : index
      %82 = arith.index_cast %arg8 : i32 to index
      %c0_88 = arith.constant 0 : index
      %c0_89 = arith.constant 0 : index
      %83 = vector.load %arg5[%c0_87, %82, %c0_88, %c0_89] : memref<1x16x16x16xf32, #tpu.memory_space<vmem>>, vector<1x1x16x16xf32>
      %84 = vector.shape_cast %83 : vector<1x1x16x16xf32> to vector<16x16xf32>
      %85 = arith.addf %81, %84 : vector<16x16xf32>
      %c0_90 = arith.constant 0 : index
      %86 = arith.index_cast %arg8 : i32 to index
      %c0_91 = arith.constant 0 : index
      %c0_92 = arith.constant 0 : index
      %87 = vector.load %arg6[%c0_90, %86, %c0_91, %c0_92] : memref<1x16x16x16xf32, #tpu.memory_space<vmem>>, vector<1x1x16x16xf32>
      %88 = vector.shape_cast %87 : vector<1x1x16x16xf32> to vector<16x16xf32>
      %89 = vector.shape_cast %85 : vector<16x16xf32> to vector<1x1x16x16xf32>
      tpu.vector_store %arg6[%c0_90, %86, %c0_91, %c0_92], %89 {strides = array<i32>} : memref<1x16x16x16xf32, #tpu.memory_space<vmem>>, vector<1x1x16x16xf32>,
    }
    %c16_i32_83 = arith.constant 16 : i32
    return
  }
  func.func @transform_0(%arg0: i32, %arg1: i32) -> (i32, i32, i32) {
    %c0_i32 = arith.constant 0 : i32
    %c0_i32_0 = arith.constant 0 : i32
    %c0_i32_1 = arith.constant 0 : i32
    return %arg0, %c0_i32, %c0_i32_0 : i32, i32, i32
  }
  func.func @transform_1(%arg0: i32, %arg1: i32) -> (i32, i32, i32) {
    %c0_i32 = arith.constant 0 : i32
    %c0_i32_0 = arith.constant 0 : i32
    %c0_i32_1 = arith.constant 0 : i32
    %c0_i32_2 = arith.constant 0 : i32
    return %c0_i32, %c0_i32_0, %c0_i32_1 : i32, i32, i32
  }
  func.func @transform_2(%arg0: i32, %arg1: i32) -> (i32, i32) {
    %c0_i32 = arith.constant 0 : i32
    %c0_i32_0 = arith.constant 0 : i32
    %c0_i32_1 = arith.constant 0 : i32
    return %c0_i32, %c0_i32_0 : i32, i32
  }
  func.func @transform_3(%arg0: i32, %arg1: i32) -> (i32, i32, i32, i32) {
    %c0_i32 = arith.constant 0 : i32
    %c0_i32_0 = arith.constant 0 : i32
    %c0_i32_1 = arith.constant 0 : i32
    return %arg0, %arg1, %c0_i32, %c0_i32_0 : i32, i32, i32, i32
  }
  func.func @transform_4(%arg0: i32, %arg1: i32) -> (i32, i32, i32, i32) {
    %c0_i32 = arith.constant 0 : i32
    %c0_i32_0 = arith.constant 0 : i32
    %c0_i32_1 = arith.constant 0 : i32
    return %arg0, %arg1, %c0_i32, %c0_i32_0 : i32, i32, i32, i32
  }
}

</mosaic_0001>

<bundles_post_ra>
// kernel: a_call__.2
= control target key start
LH: loop header
LB: loop body
LE: loop exit
PB: predicated region body
PF: predicated region fallthrough
CT: control target
= control target key end

     0   :  { %vm126_vm0 = vcmask 130048   ;;  %vm960_vm1 = vcmask 60416   ;;  %s1944_s1 = inlined_call_operand.vmem [shape: bf16[16,8], index: 1, kind: input, shape index: {}]   ;;  %s1945_s0 = inlined_call_operand.vmem [shape: f32[512,16], index: 0, kind: input, shape index: {}]   ;;  %s1946_s2 = inlined_call_operand.vmem [shape: f32[1,8], index: 2, kind: input, shape index: {}]   ;;  %s1947_s3 = inlined_call_operand.vmem [shape: bf16[512,8], index: 3, kind: output, shape index: {}]  }
   0x1   :  { %v1292_v0 = vld [vmem:[%s1944_s1] sm:$0xff]   ;;  %v16_v2 = vld [vmem:[%s1945_s0 + $0x8] sm:$0xff]  ;;  %v17_v6 = vld [vmem:[%s1945_s0 + $0x10] sm:$0xff] }
   0x2   :  { %v15_v1 = vld [vmem:[%s1945_s0] sm:$0xff]  ;;  %1224 = vmatprep.subr.bf16.mxu0 %v1292_v0  ;;  %1290 = vmatprep.subr.bf16.mxu1 %v1292_v0  ;;  %v48_v5 = vld [vmem:[%s1945_s0 + $0x108] sm:$0xff]  ;;  %v18_v7 = vld [vmem:[%s1945_s0 + $0x18] sm:$0xff] }
   0x3   :  { %v47_v3 = vld [vmem:[%s1945_s0 + $0x100] sm:$0xff]  ;;  %v79_v4 = vpack.c.bf16 %v16_v2, %v15_v1  ;;  %1225 = vmatpush3.bf16.msra.mxu0 %v1292_v0  ;;  %1291 = vmatpush3.bf16.msra.mxu1 %v1292_v0  ;;  %v80_v9 = vpack.c.bf16 %v18_v7, %v17_v6  ;;  %v49_v10 = vld [vmem:[%s1945_s0 + $0x110] sm:$0xff]  ;;  %v50_v11 = vld [vmem:[%s1945_s0 + $0x118] sm:$0xff] }
   0x4   :  { %v95_v8 = vpack.c.bf16 %v48_v5, %v47_v3  ;;  %v19_v12 = vld [vmem:[%s1945_s0 + $0x20] sm:$0xff]  ;;  %v96_v13 = vpack.c.bf16 %v50_v11, %v49_v10  ;;  %v20_v14 = vld [vmem:[%s1945_s0 + $0x28] sm:$0xff]  ;;  %v21_v19 = vld [vmem:[%s1945_s0 + $0x30] sm:$0xff] }
   0x5   :  { %1226 = vmatprep.mubr.msk.bf16.mxu0 %vm126_vm0, %v79_v4  ;;  %v51_v15 = vld [vmem:[%s1945_s0 + $0x120] sm:$0xff]  ;;  %v52_v16 = vld [vmem:[%s1945_s0 + $0x128] sm:$0xff]  ;;  %v81_v17 = vpack.c.bf16 %v20_v14, %v19_v12  ;;  %v22_v20 = vld [vmem:[%s1945_s0 + $0x38] sm:$0xff] }
   0x6   :  { %1258 = vmatprep.mubr.msk.bf16.mxu1 %vm126_vm0, %v95_v8  ;;  %v97_v18 = vpack.c.bf16 %v52_v16, %v51_v15  ;;  %1227 = vmatmul.mubr.msk.bf16.vlgmr.msra.gmra.mrb[0].mxu0 %vm126_vm0, %v80_v9  ;;  %v53_v21 = vld [vmem:[%s1945_s0 + $0x130] sm:$0xff]  ;;  %v54_v22 = vld [vmem:[%s1945_s0 + $0x138] sm:$0xff]  ;;  %v23_v23 = vld [vmem:[%s1945_s0 + $0x40] sm:$0xff]  ;;  %v82_v27 = vpack.c.bf16 %v22_v20, %v21_v19 }
   0x7   :  { %1259 = vmatmul.mubr.msk.bf16.vlgmr.msra.gmra.mrb[0].mxu1 %vm126_vm0, %v96_v13  ;;  %1230 = vmatprep.mubr.msk.bf16.mxu0 %vm126_vm0, %v81_v17  ;;  %v24_v24 = vld [vmem:[%s1945_s0 + $0x48] sm:$0xff]  ;;  %v55_v25 = vld [vmem:[%s1945_s0 + $0x140] sm:$0xff]  ;;  %v98_v28 = vpack.c.bf16 %v54_v22, %v53_v21  ;;  %v25_v31 = vld [vmem:[%s1945_s0 + $0x50] sm:$0xff] }
   0x8   :  { %1262 = vmatprep.mubr.msk.bf16.mxu1 %vm126_vm0, %v97_v18  ;;  %v56_v26 = vld [vmem:[%s1945_s0 + $0x148] sm:$0xff]  ;;  %v83_v29 = vpack.c.bf16 %v24_v24, %v23_v23  ;;  %v26_v32 = vld [vmem:[%s1945_s0 + $0x58] sm:$0xff]  ;;  %v57_v33 = vld [vmem:[%s1945_s0 + $0x150] sm:$0xff] }
   0x9   :  { %v99_v30 = vpack.c.bf16 %v56_v26, %v55_v25  ;;  %v58_v34 = vld [vmem:[%s1945_s0 + $0x158] sm:$0xff]  ;;  %v27_v35 = vld [vmem:[%s1945_s0 + $0x60] sm:$0xff]  ;;  %v28_v36 = vld [vmem:[%s1945_s0 + $0x68] sm:$0xff]  ;;  %v84_v39 = vpack.c.bf16 %v26_v32, %v25_v31 }
   0xa   :  { %v59_v37 = vld [vmem:[%s1945_s0 + $0x160] sm:$0xff]  ;;  %v60_v38 = vld [vmem:[%s1945_s0 + $0x168] sm:$0xff]  ;;  %v100_v40 = vpack.c.bf16 %v58_v34, %v57_v33  ;;  %v85_v41 = vpack.c.bf16 %v28_v36, %v27_v35  ;;  %v29_v43 = vld [vmem:[%s1945_s0 + $0x70] sm:$0xff] }
   0xb   :  { %v101_v42 = vpack.c.bf16 %v60_v38, %v59_v37  ;;  %v30_v44 = vld [vmem:[%s1945_s0 + $0x78] sm:$0xff]  ;;  %v61_v45 = vld [vmem:[%s1945_s0 + $0x170] sm:$0xff]  ;;  %v31_v47 = vld [vmem:[%s1945_s0 + $0x80] sm:$0xff] }
   0xc   :  { %v62_v46 = vld [vmem:[%s1945_s0 + $0x178] sm:$0xff]  ;;  %v32_v48 = vld [vmem:[%s1945_s0 + $0x88] sm:$0xff]  ;;  %v63_v49 = vld [vmem:[%s1945_s0 + $0x180] sm:$0xff]  ;;  %v86_v51 = vpack.c.bf16 %v30_v44, %v29_v43 }
   0xd   :  { %v64_v50 = vld [vmem:[%s1945_s0 + $0x188] sm:$0xff]  ;;  %v102_v52 = vpack.c.bf16 %v62_v46, %v61_v45  ;;  %v87_v53 = vpack.c.bf16 %v32_v48, %v31_v47  ;;  %v33_v55 = vld [vmem:[%s1945_s0 + $0x90] sm:$0xff]  ;;  %v34_v56 = vld [vmem:[%s1945_s0 + $0x98] sm:$0xff] }
   0xe   :  { %1231 = vmatmul.mubr.msk.bf16.gmra.mrb[4].mxu0 %vm126_vm0, %v82_v27  ;;  %v103_v54 = vpack.c.bf16 %v64_v50, %v63_v49  ;;  %v65_v57 = vld [vmem:[%s1945_s0 + $0x190] sm:$0xff]  ;;  %v66_v58 = vld [vmem:[%s1945_s0 + $0x198] sm:$0xff]  ;;  %v35_v59 = vld [vmem:[%s1945_s0 + $0xa0] sm:$0xff]  ;;  %v88_v63 = vpack.c.bf16 %v34_v56, %v33_v55 }
   0xf   :  { %1263 = vmatmul.mubr.msk.bf16.gmra.mrb[4].mxu1 %vm126_vm0, %v98_v28  ;;  %1234 = vmatprep.mubr.msk.bf16.mxu0 %vm126_vm0, %v83_v29  ;;  %v36_v60 = vld [vmem:[%s1945_s0 + $0xa8] sm:$0xff]  ;;  %v67_v61 = vld [vmem:[%s1945_s0 + $0x1a0] sm:$0xff]  ;;  %v104_v0 = vpack.c.bf16 %v66_v58, %v65_v57  ;;  %v37_v3 = vld [vmem:[%s1945_s0 + $0xb0] sm:$0xff] }
  0x10   :  { %1266 = vmatprep.mubr.msk.bf16.mxu1 %vm126_vm0, %v99_v30  ;;  %v68_v62 = vld [vmem:[%s1945_s0 + $0x1a8] sm:$0xff]  ;;  %v89_v1 = vpack.c.bf16 %v36_v60, %v35_v59  ;;  %v38_v4 = vld [vmem:[%s1945_s0 + $0xb8] sm:$0xff]  ;;  %v69_v5 = vld [vmem:[%s1945_s0 + $0x1b0] sm:$0xff] }
  0x11   :  { %v105_v2 = vpack.c.bf16 %v68_v62, %v67_v61  ;;  %v70_v6 = vld [vmem:[%s1945_s0 + $0x1b8] sm:$0xff]  ;;  %v39_v7 = vld [vmem:[%s1945_s0 + $0xc0] sm:$0xff]  ;;  %v40_v8 = vld [vmem:[%s1945_s0 + $0xc8] sm:$0xff]  ;;  %v90_v11 = vpack.c.bf16 %v38_v4, %v37_v3 }
  0x12   :  { %v71_v9 = vld [vmem:[%s1945_s0 + $0x1c0] sm:$0xff]  ;;  %v72_v10 = vld [vmem:[%s1945_s0 + $0x1c8] sm:$0xff]  ;;  %v106_v12 = vpack.c.bf16 %v70_v6, %v69_v5  ;;  %v91_v13 = vpack.c.bf16 %v40_v8, %v39_v7  ;;  %v41_v15 = vld [vmem:[%s1945_s0 + $0xd0] sm:$0xff] }
  0x13   :  { %v107_v14 = vpack.c.bf16 %v72_v10, %v71_v9  ;;  %v42_v16 = vld [vmem:[%s1945_s0 + $0xd8] sm:$0xff]  ;;  %v73_v17 = vld [vmem:[%s1945_s0 + $0x1d0] sm:$0xff]  ;;  %v43_v19 = vld [vmem:[%s1945_s0 + $0xe0] sm:$0xff] }
  0x14   :  { %v74_v18 = vld [vmem:[%s1945_s0 + $0x1d8] sm:$0xff]  ;;  %v44_v20 = vld [vmem:[%s1945_s0 + $0xe8] sm:$0xff]  ;;  %v75_v21 = vld [vmem:[%s1945_s0 + $0x1e0] sm:$0xff]  ;;  %v92_v23 = vpack.c.bf16 %v42_v16, %v41_v15 }
  0x15   :  { %v76_v22 = vld [vmem:[%s1945_s0 + $0x1e8] sm:$0xff]  ;;  %v108_v24 = vpack.c.bf16 %v74_v18, %v73_v17  ;;  %v93_v25 = vpack.c.bf16 %v44_v20, %v43_v19  ;;  %v45_v27 = vld [vmem:[%s1945_s0 + $0xf0] sm:$0xff]  ;;  %v46_v28 = vld [vmem:[%s1945_s0 + $0xf8] sm:$0xff] }
  0x16   :  { %1235 = vmatmul.mubr.msk.bf16.gmra.mrb[8].mxu0 %vm126_vm0, %v84_v39  ;;  %v109_v26 = vpack.c.bf16 %v76_v22, %v75_v21  ;;  %v77_v29 = vld [vmem:[%s1945_s0 + $0x1f0] sm:$0xff]  ;;  %v78_v30 = vld [vmem:[%s1945_s0 + $0x1f8] sm:$0xff]  ;;  %v94_v31 = vpack.c.bf16 %v46_v28, %v45_v27  ;;  %v1543_v33 = vld [vmem:[%s1946_s2] ss:$0 sm:$0xff] }
  0x17   :  { %1267 = vmatmul.mubr.msk.bf16.gmra.mrb[8].mxu1 %vm126_vm0, %v100_v40  ;;  %1238 = vmatprep.mubr.msk.bf16.mxu0 %vm126_vm0, %v85_v41  ;;  %v110_v32 = vpack.c.bf16 %v78_v30, %v77_v29 }
  0x18   :  { %1270 = vmatprep.mubr.msk.bf16.mxu1 %vm126_vm0, %v101_v42 }
  0x1e   :  { %1239 = vmatmul.mubr.msk.bf16.gmra.mrb[12].mxu0 %vm126_vm0, %v86_v51 }
  0x1f   :  { %1271 = vmatmul.mubr.msk.bf16.gmra.mrb[12].mxu1 %vm126_vm0, %v102_v52  ;;  %1242 = vmatprep.mubr.msk.bf16.mxu0 %vm126_vm0, %v87_v53 }
  0x20   :  { %1274 = vmatprep.mubr.msk.bf16.mxu1 %vm126_vm0, %v103_v54 }
  0x26   :  { %1243 = vmatmul.mubr.msk.bf16.gmra.mrb[16].mxu0 %vm126_vm0, %v88_v63 }
  0x27   :  { %1275 = vmatmul.mubr.msk.bf16.gmra.mrb[16].mxu1 %vm126_vm0, %v104_v0  ;;  %1246 = vmatprep.mubr.msk.bf16.mxu0 %vm126_vm0, %v89_v1 }
  0x28   :  { %1278 = vmatprep.mubr.msk.bf16.mxu1 %vm126_vm0, %v105_v2 }
  0x2e   :  { %1247 = vmatmul.mubr.msk.bf16.gmra.mrb[20].mxu0 %vm126_vm0, %v90_v11 }
  0x2f   :  { %1279 = vmatmul.mubr.msk.bf16.gmra.mrb[20].mxu1 %vm126_vm0, %v106_v12  ;;  %1250 = vmatprep.mubr.msk.bf16.mxu0 %vm126_vm0, %v91_v13 }
  0x30   :  { %1282 = vmatprep.mubr.msk.bf16.mxu1 %vm126_vm0, %v107_v14 }
  0x36   :  { %1251 = vmatmul.mubr.msk.bf16.gmra.mrb[24].mxu0 %vm126_vm0, %v92_v23 }
  0x37   :  { %1283 = vmatmul.mubr.msk.bf16.gmra.mrb[24].mxu1 %vm126_vm0, %v108_v24  ;;  %1254 = vmatprep.mubr.msk.bf16.mxu0 %vm126_vm0, %v93_v25 }
  0x38   :  { %1286 = vmatprep.mubr.msk.bf16.mxu1 %vm126_vm0, %v109_v26 }
  0x3e   :  { %1255 = vmatmul.mubr.msk.bf16.gmra.mrb[28].mxu0 %vm126_vm0, %v94_v31 }
  0x3f   :  { %1287 = vmatmul.mubr.msk.bf16.gmra.mrb[28].mxu1 %vm126_vm0, %v110_v32 }
  0xd9   :  { %v1228_v34 = vpop.f32.mrb[0].mxu0 }
  0xda   :  { %v1260_v35 = vpop.f32.mrb[0].mxu1  ;;  %v266_v36 = vadd.f32 %v1228_v34, %v1543_v33  ;;  %v257_v38 = vpop.f32.mrb[1].mxu0 }
  0xdb   :  { %v394_v37 = vadd.f32 %v1260_v35, %v1543_v33  ;;  %v385_v39 = vpop.f32.mrb[1].mxu1  ;;  %v258_v40 = vadd.f32 %v1543_v33, %v257_v38  ;;  %v1229_v42 = vpop.f32.mrb[2].mxu0 }
  0xdc   :  { %v386_v41 = vadd.f32 %v1543_v33, %v385_v39  ;;  %v1261_v43 = vpop.f32.mrb[2].mxu1  ;;  %vm514_vm2 = vcmp.gt.f32.partialorder %v266_v36, 0.0  ;;  %v578_v44 = vmul.f32 0.1, %v266_v36  ;;  %v269_v50 = vadd.f32 %v1229_v42, %v1543_v33  ;;  %v260_v52 = vpop.f32.mrb[3].mxu0 }
  0xdd   :  { %vm546_vm3 = vcmp.gt.f32.partialorder %v394_v37, 0.0  ;;  %v610_v45 = vmul.f32 0.1, %v394_v37  ;;  %vm512_vm4 = vcmp.gt.f32.partialorder %v258_v40, 0.0  ;;  %v576_v46 = vmul.f32 0.1, %v258_v40 }
  0xde   :  { %vm544_vm5 = vcmp.gt.f32.partialorder %v386_v41, 0.0  ;;  %v608_v47 = vmul.f32 0.1, %v386_v41  ;;  %v642_v48 = vsel %vm514_vm2, %v266_v36, %v578_v44  ;;  %v397_v51 = vadd.f32 %v1261_v43, %v1543_v33  ;;  %v388_v53 = vpop.f32.mrb[3].mxu1 }
  0xdf   :  { %v674_v49 = vsel %vm546_vm3, %v394_v37, %v610_v45  ;;  %v1129_v54 = vpack.c.bf16 %v642_v48, %v642_v48  ;;  %v640_v56 = vsel %vm512_vm4, %v258_v40, %v576_v46  ;;  %vm515_vm6 = vcmp.gt.f32.partialorder %v269_v50, 0.0 }
  0xe0   :  { %v1161_v55 = vpack.c.bf16 %v674_v49, %v674_v49  ;;  %v672_v57 = vsel %vm544_vm5, %v386_v41, %v608_v47  ;;  %v1127_v58 = vpack.c.bf16 %v640_v56, %v640_v56  ;;  %v579_v60 = vmul.f32 0.1, %v269_v50 }
  0xe1   :  { %v1159_v59 = vpack.c.bf16 %v672_v57, %v672_v57  ;;  %963 = vst.msk [vmem:[%s1947_s3 + $0x8] sm:$0xf] %vm960_vm1, %v1129_v54  ;;  %vm547_vm7 = vcmp.gt.f32.partialorder %v397_v51, 0.0  ;;  %v611_v61 = vmul.f32 0.1, %v397_v51  ;;  %v261_v62 = vadd.f32 %v1543_v33, %v260_v52  ;;  %v1232_v0 = vpop.f32.mrb[4].mxu0 }
  0xe2   :  { %995 = vst.msk [vmem:[%s1947_s3 + $0x88] sm:$0xf] %vm960_vm1, %v1161_v55  ;;  %v389_v63 = vadd.f32 %v1543_v33, %v388_v53  ;;  %v1264_v1 = vpop.f32.mrb[4].mxu1  ;;  %961 = vst.msk [vmem:[%s1947_s3] sm:$0xf] %vm960_vm1, %v1127_v58  ;;  %v643_v2 = vsel %vm515_vm6, %v269_v50, %v579_v60  ;;  %v282_v3 = vadd.f32 %v1232_v0, %v1543_v33  ;;  %v273_v5 = vpop.f32.mrb[5].mxu0 }
  0xe3   :  { %993 = vst.msk [vmem:[%s1947_s3 + $0x80] sm:$0xf] %vm960_vm1, %v1159_v59  ;;  %v410_v4 = vadd.f32 %v1264_v1, %v1543_v33  ;;  %v401_v6 = vpop.f32.mrb[5].mxu1  ;;  %v1130_v7 = vpack.c.bf16 %v643_v2, %v643_v2  ;;  %v675_v8 = vsel %vm547_vm7, %v397_v51, %v611_v61  ;;  %vm513_vm8 = vcmp.gt.f32.partialorder %v261_v62, 0.0  ;;  %v1233_v10 = vpop.f32.mrb[6].mxu0 }
  0xe4   :  { %v577_v9 = vmul.f32 0.1, %v261_v62  ;;  %v1265_v11 = vpop.f32.mrb[6].mxu1  ;;  %v1162_v12 = vpack.c.bf16 %v675_v8, %v675_v8  ;;  %vm545_vm9 = vcmp.gt.f32.partialorder %v389_v63, 0.0  ;;  %v609_v13 = vmul.f32 0.1, %v389_v63 }
  0xe5   :  { %vm518_vm10 = vcmp.gt.f32.partialorder %v282_v3, 0.0  ;;  %v276_v14 = vpop.f32.mrb[7].mxu0  ;;  %v404_v15 = vpop.f32.mrb[7].mxu1  ;;  %964 = vst.msk [vmem:[%s1947_s3 + $0xc] sm:$0xf] %vm960_vm1, %v1130_v7  ;;  %vm550_vm11 = vcmp.gt.f32.partialorder %v410_v4, 0.0  ;;  %v274_v21 = vadd.f32 %v1543_v33, %v273_v5  ;;  %v402_v22 = vadd.f32 %v1543_v33, %v401_v6 }
  0xe6   :  { %v641_v16 = vsel %vm513_vm8, %v261_v62, %v577_v9  ;;  %v582_v17 = vmul.f32 0.1, %v282_v3  ;;  %v614_v18 = vmul.f32 0.1, %v410_v4  ;;  %996 = vst.msk [vmem:[%s1947_s3 + $0x8c] sm:$0xf] %vm960_vm1, %v1162_v12  ;;  %v673_v20 = vsel %vm545_vm9, %v389_v63, %v609_v13 }
  0xe7   :  { %v1128_v19 = vpack.c.bf16 %v641_v16, %v641_v16  ;;  %v1160_v23 = vpack.c.bf16 %v673_v20, %v673_v20  ;;  %v285_v26 = vadd.f32 %v1233_v10, %v1543_v33  ;;  %vm516_vm12 = vcmp.gt.f32.partialorder %v274_v21, 0.0 }
  0xe8   :  { %v646_v24 = vsel %vm518_vm10, %v282_v3, %v582_v17  ;;  %v678_v25 = vsel %vm550_vm11, %v410_v4, %v614_v18  ;;  %v580_v29 = vmul.f32 0.1, %v274_v21  ;;  %vm548_vm13 = vcmp.gt.f32.partialorder %v402_v22, 0.0 }
  0xe9   :  { %962 = vst.msk [vmem:[%s1947_s3 + $0x4] sm:$0xf] %vm960_vm1, %v1128_v19  ;;  %v1133_v27 = vpack.c.bf16 %v646_v24, %v646_v24  ;;  %v1165_v28 = vpack.c.bf16 %v678_v25, %v678_v25  ;;  %994 = vst.msk [vmem:[%s1947_s3 + $0x84] sm:$0xf] %vm960_vm1, %v1160_v23  ;;  %v612_v30 = vmul.f32 0.1, %v402_v22  ;;  %v413_v34 = vadd.f32 %v1265_v11, %v1543_v33 }
  0xea   :  { %vm519_vm14 = vcmp.gt.f32.partialorder %v285_v26, 0.0  ;;  %v583_v31 = vmul.f32 0.1, %v285_v26  ;;  %v644_v32 = vsel %vm516_vm12, %v274_v21, %v580_v29  ;;  %v277_v35 = vadd.f32 %v1543_v33, %v276_v14  ;;  %v1236_v37 = vpop.f32.mrb[8].mxu0  ;;  %v1268_v38 = vpop.f32.mrb[8].mxu1 }
  0xeb   :  { %967 = vst.msk [vmem:[%s1947_s3 + $0x18] sm:$0xf] %vm960_vm1, %v1133_v27  ;;  %999 = vst.msk [vmem:[%s1947_s3 + $0x98] sm:$0xf] %vm960_vm1, %v1165_v28  ;;  %v405_v36 = vadd.f32 %v1543_v33, %v404_v15  ;;  %v1131_v39 = vpack.c.bf16 %v644_v32, %v644_v32  ;;  %v676_v40 = vsel %vm548_vm13, %v402_v22, %v612_v30  ;;  %v289_v43 = vpop.f32.mrb[9].mxu0  ;;  %v417_v44 = vpop.f32.mrb[9].mxu1 }
  0xec   :  { %v647_v41 = vsel %vm519_vm14, %v285_v26, %v583_v31  ;;  %v298_v42 = vadd.f32 %v1236_v37, %v1543_v33  ;;  %v1163_v45 = vpack.c.bf16 %v676_v40, %v676_v40  ;;  %vm551_vm15 = vcmp.gt.f32.partialorder %v413_v34, 0.0  ;;  %v1237_v48 = vpop.f32.mrb[10].mxu0  ;;  %v1269_v49 = vpop.f32.mrb[10].mxu1 }
  0xed   :  { %v1134_v46 = vpack.c.bf16 %v647_v41, %v647_v41  ;;  %v615_v47 = vmul.f32 0.1, %v413_v34  ;;  %965 = vst.msk [vmem:[%s1947_s3 + $0x10] sm:$0xf] %vm960_vm1, %v1131_v39  ;;  %vm517_vm0 = vcmp.gt.f32.partialorder %v277_v35, 0.0  ;;  %vm549_vm2 = vcmp.gt.f32.partialorder %v405_v36, 0.0 }
  0xee   :  { %v581_v50 = vmul.f32 0.1, %v277_v35  ;;  %v613_v51 = vmul.f32 0.1, %v405_v36  ;;  %997 = vst.msk [vmem:[%s1947_s3 + $0x90] sm:$0xf] %vm960_vm1, %v1163_v45  ;;  %v426_v54 = vadd.f32 %v1268_v38, %v1543_v33  ;;  %v290_v60 = vadd.f32 %v1543_v33, %v289_v43 }
  0xef   :  { %968 = vst.msk [vmem:[%s1947_s3 + $0x1c] sm:$0xf] %vm960_vm1, %v1134_v46  ;;  %v679_v52 = vsel %vm551_vm15, %v413_v34, %v615_v47  ;;  %vm522_vm3 = vcmp.gt.f32.partialorder %v298_v42, 0.0  ;;  %v586_v53 = vmul.f32 0.1, %v298_v42  ;;  %v292_v55 = vpop.f32.mrb[11].mxu0  ;;  %v418_v4 = vadd.f32 %v1543_v33, %v417_v44 }
  0xf0   :  { %v420_v56 = vpop.f32.mrb[11].mxu1  ;;  %v1166_v57 = vpack.c.bf16 %v679_v52, %v679_v52  ;;  %v645_v58 = vsel %vm517_vm0, %v277_v35, %v581_v50  ;;  %v677_v59 = vsel %vm549_vm2, %v405_v36, %v613_v51  ;;  %vm554_vm4 = vcmp.gt.f32.partialorder %v426_v54, 0.0 }
  0xf1   :  { %v1132_v61 = vpack.c.bf16 %v645_v58, %v645_v58  ;;  %v1164_v62 = vpack.c.bf16 %v677_v59, %v677_v59  ;;  %v650_v63 = vsel %vm522_vm3, %v298_v42, %v586_v53  ;;  %v618_v1 = vmul.f32 0.1, %v426_v54  ;;  %v1240_v3 = vpop.f32.mrb[12].mxu0 }
  0xf2   :  { %1000 = vst.msk [vmem:[%s1947_s3 + $0x9c] sm:$0xf] %vm960_vm1, %v1166_v57  ;;  %v1137_v0 = vpack.c.bf16 %v650_v63, %v650_v63  ;;  %vm520_vm5 = vcmp.gt.f32.partialorder %v290_v60, 0.0  ;;  %v584_v2 = vmul.f32 0.1, %v290_v60  ;;  %v301_v5 = vadd.f32 %v1237_v48, %v1543_v33  ;;  %v1272_v8 = vpop.f32.mrb[12].mxu1 }
  0xf3   :  { %966 = vst.msk [vmem:[%s1947_s3 + $0x14] sm:$0xf] %vm960_vm1, %v1132_v61  ;;  %998 = vst.msk [vmem:[%s1947_s3 + $0x94] sm:$0xf] %vm960_vm1, %v1164_v62  ;;  %v429_v6 = vadd.f32 %v1269_v49, %v1543_v33  ;;  %v293_v7 = vadd.f32 %v1543_v33, %v292_v55  ;;  %v305_v9 = vpop.f32.mrb[13].mxu0  ;;  %v682_v10 = vsel %vm554_vm4, %v426_v54, %v618_v1  ;;  %v433_v14 = vpop.f32.mrb[13].mxu1 }
  0xf4   :  { %971 = vst.msk [vmem:[%s1947_s3 + $0x28] sm:$0xf] %vm960_vm1, %v1137_v0  ;;  %v648_v11 = vsel %vm520_vm5, %v290_v60, %v584_v2  ;;  %v421_v12 = vadd.f32 %v1543_v33, %v420_v56  ;;  %v314_v13 = vadd.f32 %v1240_v3, %v1543_v33  ;;  %v1241_v15 = vpop.f32.mrb[14].mxu0  ;;  %v1169_v16 = vpack.c.bf16 %v682_v10, %v682_v10  ;;  %v1273_v19 = vpop.f32.mrb[14].mxu1 }
  0xf5   :  { %v1135_v17 = vpack.c.bf16 %v648_v11, %v648_v11  ;;  %vm552_vm6 = vcmp.gt.f32.partialorder %v418_v4, 0.0  ;;  %v616_v18 = vmul.f32 0.1, %v418_v4  ;;  %v308_v20 = vpop.f32.mrb[15].mxu0  ;;  %vm523_vm7 = vcmp.gt.f32.partialorder %v301_v5, 0.0  ;;  %v436_v25 = vpop.f32.mrb[15].mxu1 }
  0xf6   :  { %v587_v21 = vmul.f32 0.1, %v301_v5  ;;  %vm555_vm8 = vcmp.gt.f32.partialorder %v429_v6, 0.0  ;;  %v619_v22 = vmul.f32 0.1, %v429_v6  ;;  %vm521_vm9 = vcmp.gt.f32.partialorder %v293_v7, 0.0 }
  0xf7   :  { %1003 = vst.msk [vmem:[%s1947_s3 + $0xa8] sm:$0xf] %vm960_vm1, %v1169_v16  ;;  %969 = vst.msk [vmem:[%s1947_s3 + $0x20] sm:$0xf] %vm960_vm1, %v1135_v17  ;;  %v680_v23 = vsel %vm552_vm6, %v418_v4, %v616_v18  ;;  %v585_v24 = vmul.f32 0.1, %v293_v7  ;;  %v442_v37 = vadd.f32 %v1272_v8, %v1543_v33  ;;  %v306_v41 = vadd.f32 %v1543_v33, %v305_v9 }
  0xf8   :  { %vm553_vm10 = vcmp.gt.f32.partialorder %v421_v12, 0.0  ;;  %v1167_v26 = vpack.c.bf16 %v680_v23, %v680_v23  ;;  %v651_v27 = vsel %vm523_vm7, %v301_v5, %v587_v21  ;;  %v683_v28 = vsel %vm555_vm8, %v429_v6, %v619_v22 }
  0xf9   :  { %v617_v29 = vmul.f32 0.1, %v421_v12  ;;  %v1138_v30 = vpack.c.bf16 %v651_v27, %v651_v27  ;;  %v1170_v31 = vpack.c.bf16 %v683_v28, %v683_v28  ;;  %v649_v32 = vsel %vm521_vm9, %v293_v7, %v585_v24  ;;  %v1244_v38 = vpop.f32.mrb[16].mxu0 }
  0xfa   :  { %vm526_vm11 = vcmp.gt.f32.partialorder %v314_v13, 0.0  ;;  %1001 = vst.msk [vmem:[%s1947_s3 + $0xa0] sm:$0xf] %vm960_vm1, %v1167_v26  ;;  %v1136_v34 = vpack.c.bf16 %v649_v32, %v649_v32  ;;  %v590_v36 = vmul.f32 0.1, %v314_v13  ;;  %v1276_v39 = vpop.f32.mrb[16].mxu1  ;;  %v434_v42 = vadd.f32 %v1543_v33, %v433_v14 }
  0xfb   :  { %v681_v35 = vsel %vm553_vm10, %v421_v12, %v617_v29  ;;  %972 = vst.msk [vmem:[%s1947_s3 + $0x2c] sm:$0xf] %vm960_vm1, %v1138_v30  ;;  %1004 = vst.msk [vmem:[%s1947_s3 + $0xac] sm:$0xf] %vm960_vm1, %v1170_v31  ;;  %v317_v43 = vadd.f32 %v1241_v15, %v1543_v33  ;;  %v321_v44 = vpop.f32.mrb[17].mxu0  ;;  %v449_v45 = vpop.f32.mrb[17].mxu1  ;;  %v445_v48 = vadd.f32 %v1273_v19, %v1543_v33 }
  0xfc   :  { %v1168_v40 = vpack.c.bf16 %v681_v35, %v681_v35  ;;  %970 = vst.msk [vmem:[%s1947_s3 + $0x24] sm:$0xf] %vm960_vm1, %v1136_v34  ;;  %v654_v46 = vsel %vm526_vm11, %v314_v13, %v590_v36  ;;  %vm558_vm12 = vcmp.gt.f32.partialorder %v442_v37, 0.0  ;;  %v622_v47 = vmul.f32 0.1, %v442_v37  ;;  %v1669_v49 = vpop.f32.mrb[18].mxu0 }
  0xfd   :  { %v1671_v50 = vpop.f32.mrb[18].mxu1  ;;  %v1141_v51 = vpack.c.bf16 %v654_v46, %v654_v46  ;;  %vm524_vm13 = vcmp.gt.f32.partialorder %v306_v41, 0.0  ;;  %v588_v52 = vmul.f32 0.1, %v306_v41  ;;  %vm556_vm14 = vcmp.gt.f32.partialorder %v434_v42, 0.0  ;;  %v1677_v53 = vpop.f32.mrb[19].mxu0 }
  0xfe   :  { %1002 = vst.msk [vmem:[%s1947_s3 + $0xa4] sm:$0xf] %vm960_vm1, %v1168_v40  ;;  %v1679_v54 = vpop.f32.mrb[19].mxu1  ;;  %v686_v55 = vsel %vm558_vm12, %v442_v37, %v622_v47  ;;  %v620_v56 = vmul.f32 0.1, %v434_v42  ;;  %vm527_vm15 = vcmp.gt.f32.partialorder %v317_v43, 0.0  ;;  %v309_v0 = vadd.f32 %v1543_v33, %v308_v20 }
  0xff   :  { %v591_v57 = vmul.f32 0.1, %v317_v43  ;;  %975 = vst.msk [vmem:[%s1947_s3 + $0x38] sm:$0xf] %vm960_vm1, %v1141_v51  ;;  %v1173_v58 = vpack.c.bf16 %v686_v55, %v686_v55  ;;  %v652_v59 = vsel %vm524_vm13, %v306_v41, %v588_v52  ;;  %vm559_vm0 = vcmp.gt.f32.partialorder %v445_v48, 0.0 }
 0x100   :  { %v623_v60 = vmul.f32 0.1, %v445_v48  ;;  %v1139_v61 = vpack.c.bf16 %v652_v59, %v652_v59  ;;  %v684_v62 = vsel %vm556_vm14, %v434_v42, %v620_v56  ;;  %v437_v4 = vadd.f32 %v1543_v33, %v436_v25 }
 0x101   :  { %v655_v63 = vsel %vm527_vm15, %v317_v43, %v591_v57  ;;  %1007 = vst.msk [vmem:[%s1947_s3 + $0xb8] sm:$0xf] %vm960_vm1, %v1173_v58  ;;  %v1171_v1 = vpack.c.bf16 %v684_v62, %v684_v62  ;;  %vm525_vm2 = vcmp.gt.f32.partialorder %v309_v0, 0.0  ;;  %v589_v6 = vmul.f32 0.1, %v309_v0  ;;  %v1248_v8 = vpop.f32.mrb[20].mxu0 }
 0x102   :  { %v1142_v2 = vpack.c.bf16 %v655_v63, %v655_v63  ;;  %v687_v3 = vsel %vm559_vm0, %v445_v48, %v623_v60  ;;  %973 = vst.msk [vmem:[%s1947_s3 + $0x30] sm:$0xf] %vm960_vm1, %v1139_v61  ;;  %v330_v7 = vadd.f32 %v1244_v38, %v1543_v33  ;;  %v1280_v9 = vpop.f32.mrb[20].mxu1  ;;  %vm557_vm3 = vcmp.gt.f32.partialorder %v437_v4, 0.0  ;;  %v337_v13 = vpop.f32.mrb[21].mxu0 }
 0x103   :  { %v1174_v5 = vpack.c.bf16 %v687_v3, %v687_v3  ;;  %1005 = vst.msk [vmem:[%s1947_s3 + $0xb0] sm:$0xf] %vm960_vm1, %v1171_v1  ;;  %v621_v10 = vmul.f32 0.1, %v437_v4  ;;  %v458_v11 = vadd.f32 %v1276_v39, %v1543_v33  ;;  %v322_v12 = vadd.f32 %v1543_v33, %v321_v44  ;;  %v1706_v14 = vpop.f32.mrb[21].mxu1  ;;  %v1713_v18 = vpop.f32.mrb[22].mxu0 }
 0x104   :  { %976 = vst.msk [vmem:[%s1947_s3 + $0x3c] sm:$0xf] %vm960_vm1, %v1142_v2  ;;  %v653_v15 = vsel %vm525_vm2, %v309_v0, %v589_v6  ;;  %vm530_vm4 = vcmp.gt.f32.partialorder %v330_v7, 0.0  ;;  %v594_v16 = vmul.f32 0.1, %v330_v7  ;;  %v450_v17 = vadd.f32 %v1543_v33, %v449_v45  ;;  %v1715_v19 = vpop.f32.mrb[22].mxu1 }
 0x105   :  { %1008 = vst.msk [vmem:[%s1947_s3 + $0xbc] sm:$0xf] %vm960_vm1, %v1174_v5  ;;  %v1140_v20 = vpack.c.bf16 %v653_v15, %v653_v15  ;;  %v685_v21 = vsel %vm557_vm3, %v437_v4, %v621_v10  ;;  %vm562_vm5 = vcmp.gt.f32.partialorder %v458_v11, 0.0  ;;  %v626_v22 = vmul.f32 0.1, %v458_v11  ;;  %v1717_v23 = vpop.f32.mrb[23].mxu0 }
 0x106   :  { %v1719_v24 = vpop.f32.mrb[23].mxu1  ;;  %v1172_v25 = vpack.c.bf16 %v685_v21, %v685_v21  ;;  %v658_v26 = vsel %vm530_vm4, %v330_v7, %v594_v16  ;;  %vm528_vm6 = vcmp.gt.f32.partialorder %v322_v12, 0.0  ;;  %v592_v27 = vmul.f32 0.1, %v322_v12 }
 0x107   :  { %974 = vst.msk [vmem:[%s1947_s3 + $0x34] sm:$0xf] %vm960_vm1, %v1140_v20  ;;  %v1145_v28 = vpack.c.bf16 %v658_v26, %v658_v26  ;;  %v690_v29 = vsel %vm562_vm5, %v458_v11, %v626_v22  ;;  %vm560_vm7 = vcmp.gt.f32.partialorder %v450_v17, 0.0  ;;  %v624_v30 = vmul.f32 0.1, %v450_v17 }
 0x108   :  { %1006 = vst.msk [vmem:[%s1947_s3 + $0xb4] sm:$0xf] %vm960_vm1, %v1172_v25  ;;  %v1177_v31 = vpack.c.bf16 %v690_v29, %v690_v29  ;;  %v656_v32 = vsel %vm528_vm6, %v322_v12, %v592_v27  ;;  %v333_v34 = vadd.f32 %v1669_v49, %v1543_v33  ;;  %v461_v35 = vadd.f32 %v1671_v50, %v1543_v33 }
 0x109   :  { %979 = vst.msk [vmem:[%s1947_s3 + $0x48] sm:$0xf] %vm960_vm1, %v1145_v28  ;;  %v1143_v36 = vpack.c.bf16 %v656_v32, %v656_v32  ;;  %v688_v37 = vsel %vm560_vm7, %v450_v17, %v624_v30  ;;  %v325_v38 = vadd.f32 %v1543_v33, %v1677_v53  ;;  %v453_v39 = vadd.f32 %v1543_v33, %v1679_v54  ;;  %v1745_v42 = vpop.f32.mrb[24].mxu0 }
 0x10a   :  { %1011 = vst.msk [vmem:[%s1947_s3 + $0xc8] sm:$0xf] %vm960_vm1, %v1177_v31  ;;  %v1175_v40 = vpack.c.bf16 %v688_v37, %v688_v37  ;;  %vm531_vm8 = vcmp.gt.f32.partialorder %v333_v34, 0.0  ;;  %v595_v41 = vmul.f32 0.1, %v333_v34  ;;  %vm563_vm9 = vcmp.gt.f32.partialorder %v461_v35, 0.0 }
 0x10b   :  { %v1747_v43 = vpop.f32.mrb[24].mxu1  ;;  %977 = vst.msk [vmem:[%s1947_s3 + $0x40] sm:$0xf] %vm960_vm1, %v1143_v36  ;;  %v627_v44 = vmul.f32 0.1, %v461_v35  ;;  %vm529_vm10 = vcmp.gt.f32.partialorder %v325_v38, 0.0  ;;  %v346_v48 = vadd.f32 %v1248_v8, %v1543_v33  ;;  %v474_v49 = vadd.f32 %v1280_v9, %v1543_v33 }
 0x10c   :  { %v593_v45 = vmul.f32 0.1, %v325_v38  ;;  %vm561_vm11 = vcmp.gt.f32.partialorder %v453_v39, 0.0  ;;  %1009 = vst.msk [vmem:[%s1947_s3 + $0xc0] sm:$0xf] %vm960_vm1, %v1175_v40  ;;  %v659_v46 = vsel %vm531_vm8, %v333_v34, %v595_v41  ;;  %v1759_v50 = vpop.f32.mrb[25].mxu0  ;;  %v338_v55 = vadd.f32 %v1543_v33, %v337_v13 }
 0x10d   :  { %v625_v47 = vmul.f32 0.1, %v453_v39  ;;  %v1761_v51 = vpop.f32.mrb[25].mxu1  ;;  %v1146_v52 = vpack.c.bf16 %v659_v46, %v659_v46  ;;  %v691_v53 = vsel %vm563_vm9, %v461_v35, %v627_v44  ;;  %v1765_v56 = vpop.f32.mrb[26].mxu0  ;;  %vm534_vm12 = vcmp.gt.f32.partialorder %v346_v48, 0.0 }
 0x10e   :  { %v657_v54 = vsel %vm529_vm10, %v325_v38, %v593_v45  ;;  %v1767_v57 = vpop.f32.mrb[26].mxu1  ;;  %v1178_v58 = vpack.c.bf16 %v691_v53, %v691_v53  ;;  %v1770_v61 = vpop.f32.mrb[27].mxu0  ;;  %v598_v0 = vmul.f32 0.1, %v346_v48  ;;  %vm566_vm13 = vcmp.gt.f32.partialorder %v474_v49, 0.0 }
 0x10f   :  { %v1144_v59 = vpack.c.bf16 %v657_v54, %v657_v54  ;;  %v689_v60 = vsel %vm561_vm11, %v453_v39, %v625_v47  ;;  %v1772_v62 = vpop.f32.mrb[27].mxu1  ;;  %980 = vst.msk [vmem:[%s1947_s3 + $0x4c] sm:$0xf] %vm960_vm1, %v1146_v52  ;;  %v630_v1 = vmul.f32 0.1, %v474_v49  ;;  %vm532_vm14 = vcmp.gt.f32.partialorder %v338_v55, 0.0 }
 0x110   :  { %v1176_v63 = vpack.c.bf16 %v689_v60, %v689_v60  ;;  %1012 = vst.msk [vmem:[%s1947_s3 + $0xcc] sm:$0xf] %vm960_vm1, %v1178_v58  ;;  %v596_v2 = vmul.f32 0.1, %v338_v55  ;;  %v466_v3 = vadd.f32 %v1543_v33, %v1706_v14  ;;  %v349_v4 = vadd.f32 %v1713_v18, %v1543_v33 }
 0x111   :  { %978 = vst.msk [vmem:[%s1947_s3 + $0x44] sm:$0xf] %vm960_vm1, %v1144_v59  ;;  %v662_v5 = vsel %vm534_vm12, %v346_v48, %v598_v0  ;;  %v694_v6 = vsel %vm566_vm13, %v474_v49, %v630_v1  ;;  %v477_v7 = vadd.f32 %v1715_v19, %v1543_v33  ;;  %v341_v8 = vadd.f32 %v1543_v33, %v1717_v23  ;;  %v1798_v12 = vpop.f32.mrb[28].mxu0 }
 0x112   :  { %1010 = vst.msk [vmem:[%s1947_s3 + $0xc4] sm:$0xf] %vm960_vm1, %v1176_v63  ;;  %v1149_v9 = vpack.c.bf16 %v662_v5, %v662_v5  ;;  %v1181_v10 = vpack.c.bf16 %v694_v6, %v694_v6  ;;  %v660_v11 = vsel %vm532_vm14, %v338_v55, %v596_v2  ;;  %vm564_vm15 = vcmp.gt.f32.partialorder %v466_v3, 0.0  ;;  %v1800_v13 = vpop.f32.mrb[28].mxu1  ;;  %v1802_v17 = vpop.f32.mrb[29].mxu0 }
 0x113   :  { %v1147_v14 = vpack.c.bf16 %v660_v11, %v660_v11  ;;  %v628_v15 = vmul.f32 0.1, %v466_v3  ;;  %vm535_vm0 = vcmp.gt.f32.partialorder %v349_v4, 0.0  ;;  %v599_v16 = vmul.f32 0.1, %v349_v4  ;;  %v1820_v25 = vpop.f32.mrb[29].mxu1 }
 0x114   :  { %983 = vst.msk [vmem:[%s1947_s3 + $0x58] sm:$0xf] %vm960_vm1, %v1149_v9  ;;  %1015 = vst.msk [vmem:[%s1947_s3 + $0xd8] sm:$0xf] %vm960_vm1, %v1181_v10  ;;  %vm567_vm2 = vcmp.gt.f32.partialorder %v477_v7, 0.0  ;;  %vm533_vm3 = vcmp.gt.f32.partialorder %v341_v8, 0.0  ;;  %v469_v22 = vadd.f32 %v1543_v33, %v1719_v24  ;;  %v362_v23 = vadd.f32 %v1745_v42, %v1543_v33 }
 0x115   :  { %v631_v18 = vmul.f32 0.1, %v477_v7  ;;  %v597_v19 = vmul.f32 0.1, %v341_v8  ;;  %981 = vst.msk [vmem:[%s1947_s3 + $0x50] sm:$0xf] %vm960_vm1, %v1147_v14  ;;  %v692_v20 = vsel %vm564_vm15, %v466_v3, %v628_v15  ;;  %v663_v21 = vsel %vm535_vm0, %v349_v4, %v599_v16 }
 0x116   :  { %v1822_v26 = vpop.f32.mrb[30].mxu0  ;;  %v1179_v27 = vpack.c.bf16 %v692_v20, %v692_v20  ;;  %v1150_v28 = vpack.c.bf16 %v663_v21, %v663_v21  ;;  %v1824_v31 = vpop.f32.mrb[30].mxu1  ;;  %vm565_vm4 = vcmp.gt.f32.partialorder %v469_v22, 0.0  ;;  %v629_v36 = vmul.f32 0.1, %v469_v22 }
 0x117   :  { %v695_v29 = vsel %vm567_vm2, %v477_v7, %v631_v18  ;;  %v661_v30 = vsel %vm533_vm3, %v341_v8, %v597_v19  ;;  %v1826_v32 = vpop.f32.mrb[31].mxu0  ;;  %v1828_v24 = vpop.f32.mrb[31].mxu1  ;;  %vm538_vm5 = vcmp.gt.f32.partialorder %v362_v23, 0.0  ;;  %v602_v37 = vmul.f32 0.1, %v362_v23 }
 0x118   :  { %v1182_v34 = vpack.c.bf16 %v695_v29, %v695_v29  ;;  %v1148_v35 = vpack.c.bf16 %v661_v30, %v661_v30  ;;  %1013 = vst.msk [vmem:[%s1947_s3 + $0xd0] sm:$0xf] %vm960_vm1, %v1179_v27  ;;  %984 = vst.msk [vmem:[%s1947_s3 + $0x5c] sm:$0xf] %vm960_vm1, %v1150_v28  ;;  %v490_v38 = vadd.f32 %v1747_v43, %v1543_v33 }
 0x119   :  { %v354_v39 = vadd.f32 %v1543_v33, %v1759_v50  ;;  %v693_v40 = vsel %vm565_vm4, %v469_v22, %v629_v36  ;;  %v482_v41 = vadd.f32 %v1543_v33, %v1761_v51  ;;  %v365_v42 = vadd.f32 %v1765_v56, %v1543_v33 }
 0x11a   :  { %1016 = vst.msk [vmem:[%s1947_s3 + $0xdc] sm:$0xf] %vm960_vm1, %v1182_v34  ;;  %982 = vst.msk [vmem:[%s1947_s3 + $0x54] sm:$0xf] %vm960_vm1, %v1148_v35  ;;  %v493_v43 = vadd.f32 %v1767_v57, %v1543_v33  ;;  %v1180_v44 = vpack.c.bf16 %v693_v40, %v693_v40  ;;  %v666_v45 = vsel %vm538_vm5, %v362_v23, %v602_v37  ;;  %vm570_vm6 = vcmp.gt.f32.partialorder %v490_v38, 0.0 }
 0x11b   :  { %v634_v46 = vmul.f32 0.1, %v490_v38  ;;  %v1153_v47 = vpack.c.bf16 %v666_v45, %v666_v45  ;;  %vm536_vm7 = vcmp.gt.f32.partialorder %v354_v39, 0.0  ;;  %v600_v48 = vmul.f32 0.1, %v354_v39 }
 0x11c   :  { %vm568_vm8 = vcmp.gt.f32.partialorder %v482_v41, 0.0  ;;  %1014 = vst.msk [vmem:[%s1947_s3 + $0xd4] sm:$0xf] %vm960_vm1, %v1180_v44  ;;  %v632_v50 = vmul.f32 0.1, %v482_v41  ;;  %vm539_vm9 = vcmp.gt.f32.partialorder %v365_v42, 0.0  ;;  %v357_v58 = vadd.f32 %v1543_v33, %v1770_v61 }
 0x11d   :  { %v698_v49 = vsel %vm570_vm6, %v490_v38, %v634_v46  ;;  %v603_v51 = vmul.f32 0.1, %v365_v42  ;;  %987 = vst.msk [vmem:[%s1947_s3 + $0x68] sm:$0xf] %vm960_vm1, %v1153_v47  ;;  %v664_v53 = vsel %vm536_vm7, %v354_v39, %v600_v48  ;;  %vm571_vm10 = vcmp.gt.f32.partialorder %v493_v43, 0.0 }
 0x11e   :  { %v1185_v52 = vpack.c.bf16 %v698_v49, %v698_v49  ;;  %v635_v54 = vmul.f32 0.1, %v493_v43  ;;  %v1151_v55 = vpack.c.bf16 %v664_v53, %v664_v53  ;;  %v696_v56 = vsel %vm568_vm8, %v482_v41, %v632_v50 }
 0x11f   :  { %v667_v57 = vsel %vm539_vm9, %v365_v42, %v603_v51  ;;  %v1183_v59 = vpack.c.bf16 %v696_v56, %v696_v56  ;;  %v485_v0 = vadd.f32 %v1543_v33, %v1772_v62  ;;  %vm537_vm11 = vcmp.gt.f32.partialorder %v357_v58, 0.0 }
 0x120   :  { %1019 = vst.msk [vmem:[%s1947_s3 + $0xe8] sm:$0xf] %vm960_vm1, %v1185_v52  ;;  %v1154_v60 = vpack.c.bf16 %v667_v57, %v667_v57  ;;  %v699_v63 = vsel %vm571_vm10, %v493_v43, %v635_v54  ;;  %985 = vst.msk [vmem:[%s1947_s3 + $0x60] sm:$0xf] %vm960_vm1, %v1151_v55  ;;  %v601_v2 = vmul.f32 0.1, %v357_v58  ;;  %v378_v61 = vadd.f32 %v1798_v12, %v1543_v33 }
 0x121   :  { %v1186_v1 = vpack.c.bf16 %v699_v63, %v699_v63  ;;  %1017 = vst.msk [vmem:[%s1947_s3 + $0xe0] sm:$0xf] %vm960_vm1, %v1183_v59  ;;  %vm569_vm12 = vcmp.gt.f32.partialorder %v485_v0, 0.0  ;;  %v633_v62 = vmul.f32 0.1, %v485_v0  ;;  %v506_v3 = vadd.f32 %v1800_v13, %v1543_v33 }
 0x122   :  { %988 = vst.msk [vmem:[%s1947_s3 + $0x6c] sm:$0xf] %vm960_vm1, %v1154_v60  ;;  %v370_v4 = vadd.f32 %v1543_v33, %v1802_v17  ;;  %v665_v5 = vsel %vm537_vm11, %v357_v58, %v601_v2  ;;  %vm542_vm13 = vcmp.gt.f32.partialorder %v378_v61, 0.0  ;;  %v606_v6 = vmul.f32 0.1, %v378_v61 }
 0x123   :  { %1020 = vst.msk [vmem:[%s1947_s3 + $0xec] sm:$0xf] %vm960_vm1, %v1186_v1  ;;  %v498_v7 = vadd.f32 %v1543_v33, %v1820_v25  ;;  %v1152_v8 = vpack.c.bf16 %v665_v5, %v665_v5  ;;  %v697_v9 = vsel %vm569_vm12, %v485_v0, %v633_v62  ;;  %vm574_vm14 = vcmp.gt.f32.partialorder %v506_v3, 0.0 }
 0x124   :  { %v638_v10 = vmul.f32 0.1, %v506_v3  ;;  %v1184_v11 = vpack.c.bf16 %v697_v9, %v697_v9  ;;  %v670_v12 = vsel %vm542_vm13, %v378_v61, %v606_v6  ;;  %vm540_vm15 = vcmp.gt.f32.partialorder %v370_v4, 0.0 }
 0x125   :  { %v604_v13 = vmul.f32 0.1, %v370_v4  ;;  %986 = vst.msk [vmem:[%s1947_s3 + $0x64] sm:$0xf] %vm960_vm1, %v1152_v8  ;;  %v1157_v14 = vpack.c.bf16 %v670_v12, %v670_v12  ;;  %vm572_vm0 = vcmp.gt.f32.partialorder %v498_v7, 0.0  ;;  %v381_v19 = vadd.f32 %v1822_v26, %v1543_v33 }
 0x126   :  { %v702_v15 = vsel %vm574_vm14, %v506_v3, %v638_v10  ;;  %v636_v16 = vmul.f32 0.1, %v498_v7  ;;  %1018 = vst.msk [vmem:[%s1947_s3 + $0xe4] sm:$0xf] %vm960_vm1, %v1184_v11  ;;  %v509_v20 = vadd.f32 %v1824_v31, %v1543_v33  ;;  %v373_v23 = vadd.f32 %v1543_v33, %v1826_v32 }
 0x127   :  { %v1189_v17 = vpack.c.bf16 %v702_v15, %v702_v15  ;;  %v668_v18 = vsel %vm540_vm15, %v370_v4, %v604_v13  ;;  %991 = vst.msk [vmem:[%s1947_s3 + $0x78] sm:$0xf] %vm960_vm1, %v1157_v14  ;;  %v501_v25 = vadd.f32 %v1543_v33, %v1828_v24  ;;  %vm543_vm2 = vcmp.gt.f32.partialorder %v381_v19, 0.0 }
 0x128   :  { %v1155_v21 = vpack.c.bf16 %v668_v18, %v668_v18  ;;  %v700_v22 = vsel %vm572_vm0, %v498_v7, %v636_v16  ;;  %v607_v27 = vmul.f32 0.1, %v381_v19  ;;  %vm575_vm3 = vcmp.gt.f32.partialorder %v509_v20, 0.0 }
 0x129   :  { %1023 = vst.msk [vmem:[%s1947_s3 + $0xf8] sm:$0xf] %vm960_vm1, %v1189_v17  ;;  %v1187_v26 = vpack.c.bf16 %v700_v22, %v700_v22  ;;  %v639_v28 = vmul.f32 0.1, %v509_v20  ;;  %vm541_vm4 = vcmp.gt.f32.partialorder %v373_v23, 0.0  ;;  %vm573_vm5 = vcmp.gt.f32.partialorder %v501_v25, 0.0 }
 0x12a   :  { %989 = vst.msk [vmem:[%s1947_s3 + $0x70] sm:$0xf] %vm960_vm1, %v1155_v21  ;;  %v605_v29 = vmul.f32 0.1, %v373_v23  ;;  %v671_v33 = vsel %vm543_vm2, %v381_v19, %v607_v27  ;;  %v637_v30 = vmul.f32 0.1, %v501_v25 }
 0x12b   :  { %1021 = vst.msk [vmem:[%s1947_s3 + $0xf0] sm:$0xf] %vm960_vm1, %v1187_v26  ;;  %v1158_v31 = vpack.c.bf16 %v671_v33, %v671_v33  ;;  %v703_v32 = vsel %vm575_vm3, %v509_v20, %v639_v28 }
 0x12c   :  { %v669_v34 = vsel %vm541_vm4, %v373_v23, %v605_v29  ;;  %v1190_v35 = vpack.c.bf16 %v703_v32, %v703_v32  ;;  %v701_v24 = vsel %vm573_vm5, %v501_v25, %v637_v30 }
 0x12d   :  { %v1156_v36 = vpack.c.bf16 %v669_v34, %v669_v34  ;;  %992 = vst.msk [vmem:[%s1947_s3 + $0x7c] sm:$0xf] %vm960_vm1, %v1158_v31  ;;  %v1188_v37 = vpack.c.bf16 %v701_v24, %v701_v24 }
 0x12e   :  { %1024 = vst.msk [vmem:[%s1947_s3 + $0xfc] sm:$0xf] %vm960_vm1, %v1190_v35 }
 0x12f   :  { %990 = vst.msk [vmem:[%s1947_s3 + $0x74] sm:$0xf] %vm960_vm1, %v1156_v36  ;;  %1022 = vst.msk [vmem:[%s1947_s3 + $0xf4] sm:$0xf] %vm960_vm1, %v1188_v37 }

// kernel: a_call__.3
= control target key start
LH: loop header
LB: loop body
LE: loop exit
PB: predicated region body
PF: predicated region fallthrough
CT: control target
= control target key end

     0   :  { %s6428_s15 = smov 0   ;;  %s6430_s16 = smov 0   ;;  %s7479_s0 = inlined_call_operand.vmem [shape: bf16[2,342,8], index: 0, kind: input, shape index: {}]   ;;  %s7480_s1 = inlined_call_operand.vmem [shape: bf16[9,8,16], index: 1, kind: input, shape index: {}]   ;;  %s7481_s2 = inlined_call_operand.vmem [shape: f32[1,16], index: 2, kind: input, shape index: {}]   ;;  %s7482_s3 = inlined_call_operand.vmem [shape: f32[2,16,16,16], index: 3, kind: input, shape index: {}]   ;;  %s7483_s4 = inlined_call_operand.vmem [shape: f32[2,16,16,16], index: 4, kind: output, shape index: {}]  }
   0x1   :  { %s6432_s17 = smov 0  }
   0x2 LB: > { %s26_s18 = sadd.s32 1, %s6393_s16  ;;  %p5291_p0 = scmp.ge.s32.totalorder %s6397_s17, 1  ;;  %s6397_s17 = sphi %s6432_s17, %s14_s17   ;;  %s6393_s16 = sphi %s6430_s16, %s7485_s16   ;;  %s6389_s15 = sphi %s6428_s15, %s7484_s15  }
   0x3   : > { %p28_p1 = scmp.ge.s32.totalorder %s26_s18, 2  ;;  %p194_p2 = scmp.lt.s32.totalorder %s6397_s17, 3 }
   0x5   : > { %s7487_s18 = smov (%p28_p1, %s26_s18), 0  ;;  %p195_p3 = pnand %p5291_p0, %p194_p2 }
   0x6   : > { %v299_v0 = vld [vmem:[%s7480_s1] sm:$0xf] (!%p195_p3)  ;;  %vm445_vm0 = vcmask (!%p195_p3), 1043456   ;;  %p235_p4 = scmp.lt.s32.totalorder (!%p195_p3), %s6389_s15, 1  ;;  %v5333_v2 = vld [vmem:[%s7480_s1 + $0x4] sm:$0xf] (!%p195_p3) }
   0x7   : > { %198 = sbr.rel (%p195_p3) target bundleno = 575 (0x23f), region = 36  ;;  %6159 = vmatprep.subr.msk.bf16.mxu1 (!%p195_p3), %vm445_vm0, %v299_v0  ;;  %6158 = vmatprep.subr.msk.bf16.mxu0 (!%p195_p3), %vm445_vm0, %v299_v0  ;;  %v447_v1 = vsel (!%p195_p3), %vm445_vm0, %v299_v0, 0  ;;  %v5371_v3 = vld [vmem:[%s7480_s1 + $0x8] sm:$0xf] (!%p195_p3)  ;;  %vm390_vm1 = vcmask (!%p195_p3), 64512   ;;  %v1035_v10 = vsel (!%p195_p3), %vm445_vm0, %v5333_v2, 0 }
   0x8   : > { %6157 = vmatpush3.bf16.msra.mxu1 (!%p195_p3), %v447_v1  ;;  %5815 = vmatpush3.bf16.msra.mxu0 (!%p195_p3), %v447_v1  ;;  %v1547_v7 = vsel (!%p195_p3), %vm445_vm0, %v5371_v3, 0  ;;  %v6483_v8 = vld [vmem:[%s7480_s1 + $0xc] sm:$0xf] (!%p195_p3)  ;;  %v6491_v11 = vld [vmem:[%s7480_s1 + $0x10] sm:$0xf] (!%p195_p3)  ;;  %vm1454_vm3 = vcmask (!%p195_p3), 1046528  }
   0x9   : > { %6160 = vmatprep.subr.msk.bf16.mxu1 (!%p195_p3), %vm445_vm0, %v5333_v2  ;;  %6161 = vmatprep.subr.msk.bf16.mxu0 (!%p195_p3), %vm445_vm0, %v5371_v3  ;;  %vm831_vm2 = vsmask.f32 (!%p195_p3), 7424  ;;  %v6543_v57 = vld [vmem:[%s7480_s1 + $0x14] sm:$0xf] (!%p195_p3)  ;;  %v2058_v58 = vsel (!%p195_p3), %vm445_vm0, %v6483_v8, 0  ;;  %vm3122_vm5 = vcmask (!%p195_p3), 1045504  }
   0xa   : > { %vm2477_vm4 = vsmask.f32 (!%p195_p3), 6400  ;;  %vm626_vm6 = vcmask (!%p195_p3), 130048   ;;  %vm4145_vm7 = vsmask.f32 (!%p195_p3), 5376  ;;  %vm4790_vm8 = vcmask (!%p195_p3), 1044480  }
   0xb   : > { %s6399_s27 = smov (!%p195_p3), 0  }
   0xe   : > { %s7489_s15 = smov (!%p235_p4, %s6389_s15), 1 }
   0xf   : > { %s6168_s25 = smul.u32 172, %s7489_s15  ;;  %s5641_s26 = sshll.u32 %s7489_s15, 8 }
  0x10   : > { %s6463_s29 = scalar_lea.vmem %s7482_s3, %s5641_s26  ;;  %s6468_s6 = scalar_lea.vmem %s7483_s4, %s5641_s26 }
  0x11   : > { %s6473_s9 = scalar_lea.vmem %s7479_s0, %s6168_s25 }
  0x12   : > { %v6201_v4 = vld [vmem:[%s6473_s9] sm:$0xff]   ;;  %v6202_v5 = vld [vmem:[%s6473_s9 + $0x50] sm:$0xff]   ;;  %v6203_v6 = vld [vmem:[%s6473_s9 + $0x8] sm:$0xff]  }
  0x13   : > { %5816 = vmatprep.mubr.msk.bf16.mxu0 %vm390_vm1, %v6201_v4  ;;  %5836 = vmatprep.mubr.msk.bf16.mxu1 %vm390_vm1, %v6202_v5  ;;  %v6204_v9 = vld [vmem:[%s6473_s9 + $0x58] sm:$0xff]   ;;  %v6205_v12 = vld [vmem:[%s6473_s9 + $0x10] sm:$0xff]   ;;  %v6206_v13 = vld [vmem:[%s6473_s9 + $0x60] sm:$0xff]  }
  0x14   : > { %5817 = vmatmul.mubr.msk.bf16.vlgmr.msra.gmra.mrb[0].mxu0 %vm390_vm1, %v6203_v6  ;;  %5837 = vmatmul.mubr.msk.bf16.vlgmr.msra.gmra.mrb[0].mxu1 %vm390_vm1, %v6204_v9  ;;  %v6207_v14 = vld [vmem:[%s6473_s9 + $0x18] sm:$0xff]   ;;  %v6208_v15 = vld [vmem:[%s6473_s9 + $0x68] sm:$0xff]   ;;  %v6209_v16 = vld [vmem:[%s6473_s9 + $0x20] sm:$0xff]  }
  0x15   : > { %5891 = vmatpush3.bf16.msra.mxu0 %v1547_v7  ;;  %5853 = vmatpush3.bf16.msra.mxu1 %v1035_v10  ;;  %v6210_v17 = vld [vmem:[%s6473_s9 + $0x70] sm:$0xff]   ;;  %v6211_v18 = vld [vmem:[%s6473_s9 + $0x28] sm:$0xff]   ;;  %v6212_v19 = vld [vmem:[%s6473_s9 + $0x78] sm:$0xff]  }
  0x16   : > { %5820 = vmatprep.mubr.msk.bf16.mxu0 %vm390_vm1, %v6205_v12  ;;  %5840 = vmatprep.mubr.msk.bf16.mxu1 %vm390_vm1, %v6206_v13  ;;  %v6213_v20 = vld [vmem:[%s6473_s9 + $0x30] sm:$0xff]   ;;  %v6214_v21 = vld [vmem:[%s6473_s9 + $0x80] sm:$0xff]   ;;  %v6219_v23 = vld [vmem:[%s6473_s9 + $0x8] sm:$0xff]  }
  0x17   : > { %6162 = vmatprep.subr.msk.bf16.mxu1 %vm445_vm0, %v6483_v8  ;;  %6163 = vmatprep.subr.msk.bf16.mxu0 %vm445_vm0, %v6491_v11  ;;  %v6218_v22 = vld [vmem:[%s6473_s9] sm:$0xff]   ;;  %v840_v26 = vshll.u32 %v6219_v23, 16  ;;  %v6221_v27 = vld [vmem:[%s6473_s9 + $0x10] sm:$0xff]   ;;  %v6215_v28 = vld [vmem:[%s6473_s9 + $0x38] sm:$0xff]   ;;  %v844_v35 = vshrl.u32 %v6219_v23, 16  ;;  %v2703_v8 = vsel %vm445_vm0, %v6491_v11, 0 }
  0x18   : > { %v833_v24 = vshrl.u32 %v6218_v22, 16  ;;  %v835_v25 = vshll.u32 %v6218_v22, 16  ;;  %v6222_v31 = vld [vmem:[%s6473_s9 + $0x18] sm:$0xff]   ;;  %v6216_v32 = vld [vmem:[%s6473_s9 + $0x88] sm:$0xff]   ;;  %v6217_v34 = vld [vmem:[%s6473_s9 + $0x40] sm:$0xff]   ;;  %v848_v36 = vshll.u32 %v6221_v27, 16 }
  0x19   : > { %v842_v30 = vrot.slane %v840_v26, 1  ;;  %v6224_v37 = vld [vmem:[%s6473_s9 + $0x8] sm:$0xff]   ;;  %v6223_v38 = vld [vmem:[%s6473_s9] sm:$0xfe]   ;;  %v852_v40 = vshrl.u32 %v6221_v27, 16  ;;  %v856_v41 = vshll.u32 %v6222_v31, 16 }
  0x1a   : > { %v837_v29 = vrot.slane %v835_v25, 1  ;;  %v6225_v42 = vld [vmem:[%s6473_s9 + $0x20] sm:$0xff]   ;;  %v850_v43 = vrot.slane %v848_v36, 1  ;;  %v1455_v45 = vrot.slane %v6223_v38, 1  ;;  %v1456_v46 = vrot.slane %v6224_v37, 1  ;;  %v6227_v49 = vld [vmem:[%s6473_s9 + $0x28] sm:$0xff]  }
  0x1b   : > { %v846_v44 = vor.u32 %v844_v35, %v842_v30  ;;  %v858_v48 = vrot.slane %v856_v41, 1  ;;  %v6220_v50 = vld [vmem:[%s6473_s9 + $0x48] sm:$0xff]   ;;  %v864_v51 = vshll.u32 %v6225_v42, 16  ;;  %v6226_v52 = vld [vmem:[%s6473_s9 + $0x10] sm:$0xff]   ;;  %v860_v55 = vshrl.u32 %v6222_v31, 16  ;;  %v6228_v56 = vld [vmem:[%s6473_s9 + $0x18] sm:$0xff]  }
  0x1c   : > { %5821 = vmatmul.mubr.msk.bf16.gmra.mrb[4].mxu0 %vm390_vm1, %v6207_v14  ;;  %5841 = vmatmul.mubr.msk.bf16.gmra.mrb[4].mxu1 %vm390_vm1, %v6208_v15  ;;  %v838_v33 = vor.u32 %v837_v29, %v833_v24  ;;  %v854_v47 = vor.u32 %v852_v40, %v850_v43  ;;  %v1457_v54 = vsel %vm1454_vm3, %v1455_v45, %v1456_v46  ;;  %v868_v60 = vshrl.u32 %v6225_v42, 16  ;;  %v6229_v0 = vld [vmem:[%s6473_s9 + $0x30] sm:$0xff]   ;;  %v6231_v5 = vld [vmem:[%s6473_s9 + $0x38] sm:$0xff]   ;;  %v6230_v6 = vld [vmem:[%s6473_s9 + $0x20] sm:$0xff]  }
  0x1d   : > { %5824 = vmatprep.mubr.msk.bf16.mxu0 %vm390_vm1, %v6209_v16  ;;  %5844 = vmatprep.mubr.msk.bf16.mxu1 %vm390_vm1, %v6210_v17  ;;  %v851_v53 = vsel %vm831_vm2, %v846_v44, %v850_v43  ;;  %v872_v61 = vshll.u32 %v6227_v49, 16  ;;  %v866_v62 = vrot.slane %v864_v51, 1  ;;  %v1458_v63 = vrot.slane %v6226_v52, 1  ;;  %v6232_v13 = vld [vmem:[%s6473_s9 + $0x28] sm:$0xff]   ;;  %v6565_v14 = vld [vmem:[%s7480_s1 + $0x18] sm:$0xf] }
  0x1e   : > { %v843_v39 = vsel %vm831_vm2, %v838_v33, %v842_v30  ;;  %v859_v59 = vsel %vm831_vm2, %v854_v47, %v858_v48  ;;  %v862_v1 = vor.u32 %v860_v55, %v858_v48  ;;  %v1460_v2 = vrot.slane %v6228_v56, 1  ;;  %v6235_v25 = vld [vmem:[%s6473_s9 + $0x48] sm:$0xff]   ;;  %v6234_v29 = vld [vmem:[%s6473_s9 + $0x30] sm:$0xff]   ;;  %v6236_v33 = vld [vmem:[%s6473_s9 + $0x38] sm:$0xff]  }
  0x1f   : > { %v870_v3 = vor.u32 %v868_v60, %v866_v62  ;;  %v874_v4 = vrot.slane %v872_v61, 1  ;;  %v1459_v7 = vsel %vm1454_vm3, %v1456_v46, %v1458_v63  ;;  %v880_v9 = vshll.u32 %v6229_v0, 16  ;;  %v6237_v36 = vld [vmem:[%s6473_s9 + $0x50] sm:$0xff]   ;;  %v6239_v44 = vld [vmem:[%s6473_s9 + $0x58] sm:$0xff]   ;;  %v6238_v45 = vld [vmem:[%s6473_s9 + $0x40] sm:$0xff]  }
  0x20   : > { %v867_v10 = vsel %vm831_vm2, %v862_v1, %v866_v62  ;;  %v876_v12 = vshrl.u32 %v6227_v49, 16  ;;  %v1461_v16 = vsel %vm1454_vm3, %v1458_v63, %v1460_v2  ;;  %v884_v17 = vshrl.u32 %v6229_v0, 16  ;;  %v6240_v48 = vld [vmem:[%s6473_s9 + $0x48] sm:$0xff]   ;;  %v6241_v56 = vld [vmem:[%s6473_s9 + $0x60] sm:$0xff]   ;;  %v6242_v63 = vld [vmem:[%s6473_s9 + $0x50] sm:$0xff]  }
  0x21   : > { %v875_v15 = vsel %vm831_vm2, %v870_v3, %v874_v4  ;;  %v1462_v11 = vrot.slane %v6230_v6, 1  ;;  %v1464_v22 = vrot.slane %v6232_v13, 1  ;;  %v892_v27 = vshrl.u32 %v6231_v5, 16  ;;  %v6243_v60 = vld [vmem:[%s6473_s9 + $0x68] sm:$0xff]  }
  0x22   : > { %v904_v35 = vshll.u32 %v6235_v25, 16  ;;  %v1466_v38 = vrot.slane %v6234_v29, 1  ;;  %v1468_v40 = vrot.slane %v6236_v33, 1  ;;  %v912_v43 = vshll.u32 %v6237_v36, 16 }
  0x23   : > { %v1463_v26 = vsel %vm1454_vm3, %v1460_v2, %v1462_v11  ;;  %v1465_v31 = vsel %vm1454_vm3, %v1462_v11, %v1464_v22  ;;  %v908_v47 = vshrl.u32 %v6235_v25, 16  ;;  %v1470_v55 = vrot.slane %v6238_v45, 1 }
  0x24   : > { %5825 = vmatmul.mubr.msk.bf16.gmra.mrb[8].mxu0 %vm390_vm1, %v6211_v18  ;;  %5845 = vmatmul.mubr.msk.bf16.gmra.mrb[8].mxu1 %vm390_vm1, %v6212_v19  ;;  %v888_v18 = vshll.u32 %v6231_v5, 16  ;;  %v882_v19 = vrot.slane %v880_v9, 1  ;;  %v906_v42 = vrot.slane %v904_v35, 1  ;;  %v1467_v46 = vsel %vm1454_vm3, %v1464_v22, %v1466_v38  ;;  %v6251_v35 = vld [vmem:[%s6473_s9 + $0x88] sm:$0xff]  }
  0x25   : > { %5828 = vmatprep.mubr.msk.bf16.mxu0 %vm390_vm1, %v6213_v20  ;;  %5848 = vmatprep.mubr.msk.bf16.mxu1 %vm390_vm1, %v6214_v21  ;;  %v6233_v20 = vld [vmem:[%s6473_s9 + $0x40] sm:$0xff]   ;;  %v878_v21 = vor.u32 %v876_v12, %v874_v4  ;;  %v914_v52 = vrot.slane %v912_v43, 1  ;;  %v1471_v1 = vsel %vm1454_vm3, %v1468_v40, %v1470_v55  ;;  %v928_v2 = vshll.u32 %v6241_v56, 16  ;;  %v6245_v12 = vld [vmem:[%s6473_s9 + $0x70] sm:$0xff]  }
  0x26   : > { %v886_v23 = vor.u32 %v884_v17, %v882_v19  ;;  %v890_v24 = vrot.slane %v888_v18, 1  ;;  %v924_v4 = vshrl.u32 %v6239_v44, 16  ;;  %v932_v5 = vshrl.u32 %v6241_v56, 16  ;;  %v6247_v18 = vld [vmem:[%s6473_s9 + $0x78] sm:$0xff]  }
  0x27   : > { %v883_v30 = vsel %vm831_vm2, %v878_v21, %v882_v19  ;;  %v936_v6 = vshll.u32 %v6243_v60, 16  ;;  %v1474_v9 = vrot.slane %v6242_v63, 1  ;;  %v944_v19 = vshll.u32 %v6245_v12, 16  ;;  %v6256_v63 = vld [vmem:[%s6473_s9 + $0x8] sm:$0xfe]  }
  0x28   : > { %v968_v45 = vshll.u32 %v6251_v35, 16 }
  0x29   : > { %v938_v17 = vrot.slane %v936_v6, 1 }
  0x2c   : > { %5829 = vmatmul.mubr.msk.bf16.gmra.mrb[12].mxu0 %vm390_vm1, %v6215_v28  ;;  %5849 = vmatmul.mubr.msk.bf16.gmra.mrb[12].mxu1 %vm390_vm1, %v6216_v32  ;;  %v896_v28 = vshll.u32 %v6233_v20, 16  ;;  %v900_v32 = vshrl.u32 %v6233_v20, 16  ;;  %v6246_v20 = vld [vmem:[%s6473_s9 + $0x60] sm:$0xff]  }
  0x2d   : > { %5832 = vmatprep.mubr.msk.bf16.mxu0 %vm390_vm1, %v6217_v34  ;;  %5854 = vmatprep.mubr.msk.bf16.mxu1 %vm390_vm1, %v843_v39  ;;  %v891_v34 = vsel %vm831_vm2, %v886_v23, %v890_v24  ;;  %v894_v39 = vor.u32 %v892_v27, %v890_v24  ;;  %v940_v23 = vshrl.u32 %v6243_v60, 16  ;;  %v6248_v24 = vld [vmem:[%s6473_s9 + $0x68] sm:$0xff]   ;;  %v952_v27 = vshll.u32 %v6247_v18, 16 }
  0x2e   : > { %v898_v37 = vrot.slane %v896_v28, 1  ;;  %v946_v28 = vrot.slane %v944_v19, 1  ;;  %v1478_v29 = vrot.slane %v6246_v20, 1  ;;  %v6261_v60 = vld [vmem:[%s6473_s9 + $0x8] sm:$0xfe]   ;;  %v6264_v19 = vld [vmem:[%s6473_s9 + $0x18] sm:$0xff]  }
  0x2f   : > { %v2479_v6 = vshrl.u32 %v6261_v60, 16 }
  0x30   : > { %v902_v41 = vor.u32 %v900_v32, %v898_v37  ;;  %v899_v49 = vsel %vm831_vm2, %v894_v39, %v898_v37  ;;  %v1480_v32 = vrot.slane %v6248_v24, 1 }
  0x31   : > { %v2481_v20 = vrot.slane %v2479_v6, 1 }
  0x32   : > { %v907_v51 = vsel %vm831_vm2, %v902_v41, %v906_v42  ;;  %v956_v41 = vshrl.u32 %v6247_v18, 16 }
  0x34   : > { %5833 = vmatmul.mubr.msk.bf16.gmra.mrb[16].mxu0 %vm390_vm1, %v6220_v50  ;;  %5855 = vmatmul.mubr.msk.bf16.vlgmr.msra.gmra.mrb[16].mxu1 %vm390_vm1, %v851_v53  ;;  %v1469_v50 = vsel %vm1454_vm3, %v1466_v38, %v1468_v40  ;;  %v916_v53 = vshrl.u32 %v6237_v36, 16  ;;  %v6250_v38 = vld [vmem:[%s6473_s9 + $0x70] sm:$0xff]   ;;  %v1481_v40 = vsel %vm1454_vm3, %v1478_v29, %v1480_v32 }
  0x35   : > { %5892 = vmatprep.mubr.msk.bf16.mxu0 %vm390_vm1, %v1457_v54  ;;  %5929 = vmatpush3.bf16.msra.mxu1 %v2058_v58  ;;  %v920_v54 = vshll.u32 %v6239_v44, 16  ;;  %v910_v58 = vor.u32 %v908_v47, %v906_v42  ;;  %v6252_v42 = vld [vmem:[%s6473_s9 + $0x78] sm:$0xff]  }
  0x36   : > { %5858 = vmatprep.mubr.msk.bf16.mxu1 %vm390_vm1, %v859_v59  ;;  %6164 = vmatprep.subr.msk.bf16.mxu1 %vm445_vm0, %v6543_v57  ;;  %v1472_v59 = vrot.slane %v6240_v48, 1  ;;  %v918_v61 = vor.u32 %v916_v53, %v914_v52  ;;  %v1482_v48 = vrot.slane %v6250_v38, 1  ;;  %v972_v53 = vshrl.u32 %v6251_v35, 16 }
  0x37   : > { %v922_v62 = vrot.slane %v920_v54, 1  ;;  %v915_v0 = vsel %vm831_vm2, %v910_v58, %v914_v52  ;;  %v970_v52 = vrot.slane %v968_v45, 1  ;;  %v6254_v54 = vld [vmem:[%s6473_s9 + $0x80] sm:$0xff]   ;;  %v6262_v58 = vld [vmem:[%s6473_s9 + $0x10] sm:$0xff]  }
  0x38   : > { %v1473_v3 = vsel %vm1454_vm3, %v1470_v55, %v1472_v59  ;;  %v1475_v11 = vsel %vm1454_vm3, %v1472_v59, %v1474_v9  ;;  %v6255_v55 = vld [vmem:[%s6473_s9 + $0x88] sm:$0xff]   ;;  %v1483_v59 = vsel %vm1454_vm3, %v1480_v32, %v1482_v48 }
  0x39   : > { %v926_v13 = vor.u32 %v924_v4, %v922_v62 }
  0x3c   : > { %5893 = vmatmul.mubr.msk.bf16.vlgmr.msra.gmra.mrb[20].mxu0 %vm390_vm1, %v1459_v7  ;;  %5859 = vmatmul.mubr.msk.bf16.gmra.mrb[20].mxu1 %vm390_vm1, %v867_v10  ;;  %v6244_v7 = vld [vmem:[%s6473_s9 + $0x58] sm:$0xff]   ;;  %v930_v10 = vrot.slane %v928_v2, 1  ;;  %v6257_v2 = vld [vmem:[%s6473_s9 + $0x10] sm:$0xff]  }
  0x3d   : > { %5967 = vmatpush3.bf16.msra.mxu0 %v2703_v8  ;;  %5862 = vmatprep.mubr.msk.bf16.mxu1 %vm390_vm1, %v875_v15  ;;  %v923_v8 = vsel %vm831_vm2, %v918_v61, %v922_v62  ;;  %v1476_v15 = vrot.slane %v6244_v7, 1  ;;  %v2482_v7 = vshll.u32 %v6261_v60, 16 }
  0x3e   : > { %5896 = vmatprep.mubr.msk.bf16.mxu0 %vm390_vm1, %v1461_v16  ;;  %6165 = vmatprep.subr.msk.bf16.mxu0 %vm445_vm0, %v6565_v14  ;;  %v934_v16 = vor.u32 %v932_v5, %v930_v10  ;;  %v931_v21 = vsel %vm831_vm2, %v926_v13, %v930_v10  ;;  %v1488_v5 = vrot.slane %v6255_v55, 1  ;;  %v1966_v10 = vrot.slane %v6256_v63, 1  ;;  %v6258_v13 = vld [vmem:[%s6473_s9 + $0x90] ss:$0 sps:$4 sm:$0x11]  }
  0x3f   : > { %v1477_v22 = vsel %vm1454_vm3, %v1474_v9, %v1476_v15  ;;  %v1479_v36 = vsel %vm1454_vm3, %v1476_v15, %v1478_v29  ;;  %v2490_v9 = vshll.u32 %v6262_v58, 16  ;;  %v6259_v15 = vld [vmem:[%s6473_s9 + $0x18] sm:$0xff]  }
  0x40   : > { %v939_v25 = vsel %vm831_vm2, %v934_v16, %v938_v17  ;;  %v1969_v29 = vrot.slane %v6259_v15, 1  ;;  %v6680_v55 = vld [vmem:[%s7480_s1 + $0x1c] sm:$0xf]  ;;  %v6701_v15 = vld [vmem:[%s7480_s1 + $0x20] sm:$0xf] }
  0x44   : > { %5897 = vmatmul.mubr.msk.bf16.gmra.mrb[24].mxu0 %vm390_vm1, %v1463_v26  ;;  %5863 = vmatmul.mubr.msk.bf16.gmra.mrb[24].mxu1 %vm390_vm1, %v883_v30  ;;  %v948_v26 = vshrl.u32 %v6245_v12, 16  ;;  %v6249_v30 = vld [vmem:[%s6473_s9 + $0x80] sm:$0xff]   ;;  %v1967_v12 = vrot.slane %v6257_v2, 1 }
  0x45   : > { %5900 = vmatprep.mubr.msk.bf16.mxu0 %vm390_vm1, %v1465_v31  ;;  %5866 = vmatprep.mubr.msk.bf16.mxu1 %vm390_vm1, %v891_v34  ;;  %v942_v31 = vor.u32 %v940_v23, %v938_v17  ;;  %v954_v34 = vrot.slane %v952_v27, 1  ;;  %v960_v37 = vshll.u32 %v6249_v30, 16  ;;  %v964_v44 = vshrl.u32 %v6249_v30, 16 }
  0x46   : > { %v950_v33 = vor.u32 %v948_v26, %v946_v28  ;;  %v2492_v23 = vrot.slane %v2490_v9, 2  ;;  %v1968_v24 = vsel %vm1454_vm3, %v1966_v10, %v1967_v12  ;;  %v1490_v26 = vrot.slane %v6258_v13, 1 }
  0x47   : > { %v947_v39 = vsel %vm831_vm2, %v942_v31, %v946_v28  ;;  %v962_v47 = vrot.slane %v960_v37, 1  ;;  %v2496_v27 = vshrl.u32 %v6264_v19, 16  ;;  %v2499_v28 = vshll.u32 %v6264_v19, 16 }
  0x48   : > { %v955_v43 = vsel %vm831_vm2, %v950_v33, %v954_v34  ;;  %v1491_v35 = vsel %vm1454_vm3, %v1488_v5, %v1490_v26  ;;  %v6273_v26 = vld [vmem:[%s6473_s9 + $0x50] sm:$0xff]  }
  0x49   : > { %v2498_v37 = vrot.slane %v2496_v27, 1  ;;  %v2501_v38 = vrot.slane %v2499_v28, 2 }
  0x4c   : > { %5901 = vmatmul.mubr.msk.bf16.gmra.mrb[28].mxu0 %vm390_vm1, %v1467_v46  ;;  %5867 = vmatmul.mubr.msk.bf16.gmra.mrb[28].mxu1 %vm390_vm1, %v899_v49  ;;  %v6253_v46 = vld [vmem:[%s6473_s9 + $0x90] ss:$0 sps:$4 sm:$0x11]   ;;  %v958_v49 = vor.u32 %v956_v41, %v954_v34  ;;  %v1970_v41 = vsel %vm1454_vm3, %v1967_v12, %v1969_v29 }
  0x4d   : > { %5904 = vmatprep.mubr.msk.bf16.mxu0 %vm390_vm1, %v1469_v50  ;;  %5870 = vmatprep.mubr.msk.bf16.mxu1 %vm390_vm1, %v907_v51  ;;  %v1484_v50 = vrot.slane %v6252_v42, 1  ;;  %v966_v51 = vor.u32 %v964_v44, %v962_v47  ;;  %v976_v56 = vshll.u32 %v6253_v46, 16  ;;  %v3215_v42 = vsel %vm445_vm0, %v6543_v57, 0  ;;  %v6270_v44 = vld [vmem:[%s6473_s9 + $0x30] sm:$0xff]  }
  0x4e   : > { %v963_v61 = vsel %vm831_vm2, %v958_v49, %v962_v47 }
  0x4f   : > { %v1485_v62 = vsel %vm1454_vm3, %v1482_v48, %v1484_v50  ;;  %v978_v4 = vrot.slane %v976_v56, 1  ;;  %v2502_v48 = vor.u32 %v2501_v38, %v2498_v37  ;;  %v3726_v56 = vsel %vm445_vm0, %v6565_v14, 0  ;;  %v6280_v37 = vld [vmem:[%s6473_s9 + $0x58] sm:$0xff]  }
  0x54   : > { %5905 = vmatmul.mubr.msk.bf16.gmra.mrb[32].mxu0 %vm390_vm1, %v1471_v1  ;;  %5871 = vmatmul.mubr.msk.bf16.gmra.mrb[32].mxu1 %vm390_vm1, %v915_v0  ;;  %v971_v0 = vsel %vm831_vm2, %v966_v51, %v970_v52  ;;  %v1486_v1 = vrot.slane %v6254_v54, 1  ;;  %v2523_v51 = vshrl.u32 %v6270_v44, 16 }
  0x55   : > { %5908 = vmatprep.mubr.msk.bf16.mxu0 %vm390_vm1, %v1473_v3  ;;  %5874 = vmatprep.mubr.msk.bf16.mxu1 %vm390_vm1, %v923_v8  ;;  %v974_v3 = vor.u32 %v972_v53, %v970_v52  ;;  %v2487_v8 = vshrl.u32 %v6262_v58, 16  ;;  %v2526_v52 = vshll.u32 %v6270_v44, 16  ;;  %v6267_v58 = vld [vmem:[%s6473_s9 + $0x38] sm:$0xff]   ;;  %v6282_v44 = vld [vmem:[%s6473_s9 + $0x60] sm:$0xff]  }
  0x56   : > { %v1487_v17 = vsel %vm1454_vm3, %v1484_v50, %v1486_v1  ;;  %v1489_v18 = vsel %vm1454_vm3, %v1486_v1, %v1488_v5  ;;  %v2525_v1 = vrot.slane %v2523_v51, 1  ;;  %v1977_v6 = vrot.slane %v6267_v58, 1  ;;  %v6284_v58 = vld [vmem:[%s6473_s9 + $0x68] sm:$0xff]  }
  0x57   : > { %v979_v16 = vsel %vm831_vm2, %v974_v3, %v978_v4  ;;  %v2528_v2 = vrot.slane %v2526_v52, 2  ;;  %v6274_v3 = vld [vmem:[%s6473_s9 + $0x40] sm:$0xff]   ;;  %v2577_v51 = vshrl.u32 %v6282_v44, 16  ;;  %v2580_v52 = vshll.u32 %v6282_v44, 16  ;;  %v6289_v44 = vld [vmem:[%s6473_s9 + $0x90] sm:$0xff]  }
  0x58   : > { %v2541_v10 = vshrl.u32 %v6274_v3, 16  ;;  %v2544_v12 = vshll.u32 %v6274_v3, 16  ;;  %v6281_v3 = vld [vmem:[%s6473_s9 + $0x70] sm:$0xff]  }
  0x59   : > { %v2529_v9 = vor.u32 %v2528_v2, %v2525_v1  ;;  %v2582_v1 = vrot.slane %v2580_v52, 2  ;;  %v1999_v52 = vrot.slane %v6289_v44, 1 }
  0x5c   : > { %5909 = vmatmul.mubr.msk.bf16.gmra.mrb[36].mxu0 %vm390_vm1, %v1475_v11  ;;  %5875 = vmatmul.mubr.msk.bf16.gmra.mrb[36].mxu1 %vm390_vm1, %v931_v21  ;;  %v6260_v11 = vld [vmem:[%s6473_s9 + $0x20] sm:$0xff]   ;;  %v2484_v21 = vrot.slane %v2482_v7, 2 }
  0x5d   : > { %5912 = vmatprep.mubr.msk.bf16.mxu0 %vm390_vm1, %v1477_v22  ;;  %5878 = vmatprep.mubr.msk.bf16.mxu1 %vm390_vm1, %v939_v25  ;;  %v2489_v22 = vrot.slane %v2487_v8, 1  ;;  %v6266_v25 = vld [vmem:[%s6473_s9 + $0x20] sm:$0xff]   ;;  %v1971_v32 = vrot.slane %v6260_v11, 1 }
  0x5e   : > { %v2485_v30 = vor.u32 %v2484_v21, %v2481_v20  ;;  %v2505_v33 = vshrl.u32 %v6266_v25, 16  ;;  %v2508_v34 = vshll.u32 %v6266_v25, 16  ;;  %v6278_v20 = vld [vmem:[%s6473_s9 + $0x50] sm:$0xff]  }
  0x5f   : > { %v2493_v31 = vor.u32 %v2492_v23, %v2489_v22  ;;  %v1972_v45 = vsel %vm1454_vm3, %v1969_v29, %v1971_v32  ;;  %v2543_v23 = vrot.slane %v2541_v10, 1  ;;  %v1991_v10 = vrot.slane %v6281_v3, 1 }
  0x60   : > { %v2507_v46 = vrot.slane %v2505_v33, 1  ;;  %v2510_v47 = vrot.slane %v2508_v34, 2  ;;  %v2562_v33 = vshll.u32 %v6278_v20, 16  ;;  %v1983_v34 = vrot.slane %v6273_v26, 1 }
  0x61   : > { %v2503_v60 = vsel %vm2477_vm4, %v2493_v31, %v2502_v48 }
  0x62   : > { %v2511_v54 = vor.u32 %v2510_v47, %v2507_v46  ;;  %v6277_v46 = vld [vmem:[%s6473_s9 + $0x60] sm:$0xff]   ;;  %v2568_v47 = vshrl.u32 %v6280_v37, 16 }
  0x64   : > { %5913 = vmatmul.mubr.msk.bf16.gmra.mrb[40].mxu0 %vm390_vm1, %v1479_v36  ;;  %5879 = vmatmul.mubr.msk.bf16.gmra.mrb[40].mxu1 %vm390_vm1, %v947_v39  ;;  %v6263_v36 = vld [vmem:[%s6473_s9 + $0x28] sm:$0xff]   ;;  %v6265_v39 = vld [vmem:[%s6473_s9 + $0x30] sm:$0xff]   ;;  %v2512_v14 = vsel %vm2477_vm4, %v2502_v48, %v2511_v54 }
  0x65   : > { %5916 = vmatprep.mubr.msk.bf16.mxu0 %vm390_vm1, %v1481_v40  ;;  %5882 = vmatprep.mubr.msk.bf16.mxu1 %vm390_vm1, %v955_v43  ;;  %v6268_v40 = vld [vmem:[%s6473_s9 + $0x28] sm:$0xff]   ;;  %v2494_v43 = vsel %vm2477_vm4, %v2485_v30, %v2493_v31  ;;  %v1973_v57 = vrot.slane %v6263_v36, 1  ;;  %v1975_v53 = vrot.slane %v6265_v39, 1  ;;  %v2559_v30 = vshrl.u32 %v6278_v20, 16 }
  0x66   : > { %v2514_v49 = vshrl.u32 %v6268_v40, 16  ;;  %v2517_v50 = vshll.u32 %v6268_v40, 16 }
  0x67   : > { %v1974_v63 = vsel %vm1454_vm3, %v1971_v32, %v1973_v57  ;;  %v1976_v4 = vsel %vm1454_vm3, %v1973_v57, %v1975_v53  ;;  %v1978_v21 = vsel %vm1454_vm3, %v1975_v53, %v1977_v6  ;;  %v2561_v40 = vrot.slane %v2559_v30, 1 }
  0x68   : > { %v1987_v53 = vrot.slane %v6277_v46, 1 }
  0x6c   : > { %5917 = vmatmul.mubr.msk.bf16.gmra.mrb[44].mxu0 %vm390_vm1, %v1483_v59  ;;  %5883 = vmatmul.mubr.msk.bf16.gmra.mrb[44].mxu1 %vm390_vm1, %v963_v61  ;;  %v6272_v59 = vld [vmem:[%s6473_s9 + $0x38] sm:$0xff]   ;;  %v2516_v61 = vrot.slane %v2514_v49, 1 }
  0x6d   : > { %5920 = vmatprep.mubr.msk.bf16.mxu0 %vm390_vm1, %v1485_v62  ;;  %5886 = vmatprep.mubr.msk.bf16.mxu1 %vm390_vm1, %v971_v0  ;;  %v2519_v62 = vrot.slane %v2517_v50, 2  ;;  %v6269_v0 = vld [vmem:[%s6473_s9 + $0x40] sm:$0xff]   ;;  %v2532_v5 = vshrl.u32 %v6272_v59, 16  ;;  %v2535_v8 = vshll.u32 %v6272_v59, 16  ;;  %v2571_v50 = vshll.u32 %v6280_v37, 16 }
  0x6e   : > { %v1979_v13 = vrot.slane %v6269_v0, 1  ;;  %v2579_v0 = vrot.slane %v2577_v51, 1  ;;  %v6296_v51 = vld [vmem:[%s6473_s9 + $0x98] ss:$0 sps:$4 sm:$0x33]  }
  0x6f   : > { %v2520_v7 = vor.u32 %v2519_v62, %v2516_v61  ;;  %v2537_v19 = vrot.slane %v2535_v8, 2  ;;  %v6286_v61 = vld [vmem:[%s6473_s9 + $0x70] sm:$0xff]  }
  0x70   : > { %v1980_v25 = vsel %vm1454_vm3, %v1977_v6, %v1979_v13  ;;  %v2595_v6 = vshrl.u32 %v6286_v61, 16  ;;  %v2583_v8 = vor.u32 %v2582_v1, %v2579_v0  ;;  %v6295_v1 = vld [vmem:[%s6473_s9 + $0x10] sm:$0xff]  }
  0x71   : > { %v2521_v11 = vsel %vm2477_vm4, %v2511_v54, %v2520_v7  ;;  %v2530_v22 = vsel %vm2477_vm4, %v2520_v7, %v2529_v9  ;;  %v6279_v54 = vld [vmem:[%s6473_s9 + $0x68] sm:$0xff]  }
  0x72   : > { %v1989_v7 = vrot.slane %v6279_v54, 1 }
  0x74   : > { %5921 = vmatmul.mubr.msk.bf16.gmra.mrb[48].mxu0 %vm390_vm1, %v1487_v17  ;;  %5887 = vmatmul.mubr.msk.bf16.gmra.mrb[48].mxu1 %vm390_vm1, %v979_v16  ;;  %v6271_v16 = vld [vmem:[%s6473_s9 + $0x48] sm:$0xff]   ;;  %v2534_v17 = vrot.slane %v2532_v5, 1 }
  0x75   : > { %5924 = vmatprep.mubr.msk.bf16.mxu0 %vm390_vm1, %v1489_v18  ;;  %5930 = vmatprep.mubr.msk.bf16.mxu1 %vm390_vm1, %v1968_v24  ;;  %v6276_v18 = vld [vmem:[%s6473_s9 + $0x48] sm:$0xff]   ;;  %v2546_v24 = vrot.slane %v2544_v12, 2  ;;  %v1981_v31 = vrot.slane %v6271_v16, 1  ;;  %v6283_v12 = vld [vmem:[%s6473_s9 + $0x78] sm:$0xff]  }
  0x76   : > { %v2550_v27 = vshrl.u32 %v6276_v18, 16  ;;  %v2538_v28 = vor.u32 %v2537_v19, %v2534_v17  ;;  %v2553_v29 = vshll.u32 %v6276_v18, 16  ;;  %v2597_v18 = vrot.slane %v2595_v6, 1 }
  0x77   : > { %v2547_v32 = vor.u32 %v2546_v24, %v2543_v23  ;;  %v1990_v19 = vsel %vm1454_vm3, %v1987_v53, %v1989_v7  ;;  %v1992_v23 = vsel %vm1454_vm3, %v1989_v7, %v1991_v10  ;;  %v6285_v24 = vld [vmem:[%s6473_s9 + $0x80] sm:$0xff]   ;;  %v3124_v7 = vrot.slane %v6295_v1, 2 }
  0x78   : > { %v2552_v36 = vrot.slane %v2550_v27, 1  ;;  %v2539_v38 = vsel %vm2477_vm4, %v2529_v9, %v2538_v28  ;;  %v2555_v39 = vrot.slane %v2553_v29, 2  ;;  %v2598_v9 = vshll.u32 %v6286_v61, 16 }
  0x7a   : > { %v2556_v49 = vor.u32 %v2555_v39, %v2552_v36 }
  0x7c   : > { %5925 = vmatmul.mubr.msk.bf16.gmra.mrb[52].mxu0 %vm390_vm1, %v1491_v35  ;;  %5931 = vmatmul.mubr.msk.bf16.vlgmr.msra.gmra.mrb[52].mxu1 %vm390_vm1, %v1970_v41  ;;  %v6275_v35 = vld [vmem:[%s6473_s9 + $0x58] sm:$0xff]   ;;  %v1982_v41 = vsel %vm1454_vm3, %v1979_v13, %v1981_v31  ;;  %v2557_v59 = vsel %vm2477_vm4, %v2547_v32, %v2556_v49 }
  0x7d   : > { %5968 = vmatprep.mubr.msk.bf16.mxu0 %vm390_vm1, %v2494_v43  ;;  %6005 = vmatpush3.bf16.msra.mxu1 %v3215_v42  ;;  %v2548_v42 = vsel %vm2477_vm4, %v2538_v28, %v2547_v32  ;;  %v2564_v43 = vrot.slane %v2562_v33, 2  ;;  %v1985_v48 = vrot.slane %v6275_v35, 1  ;;  %v1995_v32 = vrot.slane %v6285_v24, 1  ;;  %v6287_v33 = vld [vmem:[%s6473_s9 + $0x88] sm:$0xff]   ;;  %v6293_v35 = vld [vmem:[%s6473_s9 + $0x90] sm:$0xff]  }
  0x7e   : > { %5934 = vmatprep.mubr.msk.bf16.mxu1 %vm390_vm1, %v1972_v45  ;;  %6166 = vmatprep.subr.msk.bf16.mxu1 %vm445_vm0, %v6680_v55  ;;  %v1984_v45 = vsel %vm1454_vm3, %v1981_v31, %v1983_v34 }
  0x7f   : > { %v2565_v57 = vor.u32 %v2564_v43, %v2561_v40  ;;  %v1986_v62 = vsel %vm1454_vm3, %v1983_v34, %v1985_v48  ;;  %v1988_v2 = vsel %vm1454_vm3, %v1985_v48, %v1987_v53  ;;  %v6292_v34 = vld [vmem:[%s6473_s9 + $0x88] sm:$0xff]   ;;  %v2631_v48 = vshrl.u32 %v6293_v35, 16  ;;  %v6291_v53 = vld [vmem:[%s6473_s9 + $0x98] ss:$0 sps:$4 sm:$0x11]  }
  0x80   : > { %v2622_v46 = vshrl.u32 %v6292_v34, 16 }
  0x81   : > { %v2633_v61 = vrot.slane %v2631_v48, 1 }
  0x84   : > { %5969 = vmatmul.mubr.msk.bf16.vlgmr.msra.gmra.mrb[56].mxu0 %vm390_vm1, %v2503_v60  ;;  %5935 = vmatmul.mubr.msk.bf16.gmra.mrb[56].mxu1 %vm390_vm1, %v1974_v63  ;;  %v2573_v60 = vrot.slane %v2571_v50, 2  ;;  %v2566_v63 = vsel %vm2477_vm4, %v2556_v49, %v2565_v57 }
  0x85   : > { %6043 = vmatpush3.bf16.msra.mxu0 %v3726_v56  ;;  %5938 = vmatprep.mubr.msk.bf16.mxu1 %vm390_vm1, %v1976_v4  ;;  %v2570_v56 = vrot.slane %v2568_v47, 1  ;;  %v2586_v4 = vshrl.u32 %v6284_v58, 16  ;;  %v2625_v47 = vshll.u32 %v6292_v34, 16 }
  0x86   : > { %5972 = vmatprep.mubr.msk.bf16.mxu0 %vm390_vm1, %v2512_v14  ;;  %6167 = vmatprep.subr.msk.bf16.mxu0 %vm445_vm0, %v6701_v15  ;;  %v2589_v14 = vshll.u32 %v6284_v58, 16 }
  0x87   : > { %v2574_v5 = vor.u32 %v2573_v60, %v2570_v56  ;;  %v2588_v13 = vrot.slane %v2586_v4, 1  ;;  %v2624_v56 = vrot.slane %v2622_v46, 1  ;;  %v2627_v58 = vrot.slane %v2625_v47, 2 }
  0x88   : > { %v2591_v16 = vrot.slane %v2589_v14, 2  ;;  %v2643_v4 = vshll.u32 %v6296_v51, 16  ;;  %v2001_v14 = vrot.slane %v6291_v53, 1  ;;  %v6312_v53 = vld [vmem:[%s6473_s9 + $0x48] sm:$0xff]  }
  0x89   : > { %v2575_v17 = vsel %vm2477_vm4, %v2565_v57, %v2574_v5  ;;  %v2584_v20 = vsel %vm2477_vm4, %v2574_v5, %v2583_v8  ;;  %v2634_v57 = vshll.u32 %v6293_v35, 16  ;;  %v2628_v3 = vor.u32 %v2627_v58, %v2624_v56  ;;  %v6311_v56 = vld [vmem:[%s6473_s9 + $0x50] sm:$0xff]  }
  0x8a   : > { %v2592_v26 = vor.u32 %v2591_v16, %v2588_v13  ;;  %v6300_v13 = vld [vmem:[%s6473_s9 + $0x18] sm:$0xff]   ;;  %v2002_v16 = vsel %vm1454_vm3, %v1999_v52, %v2001_v14  ;;  %v6315_v14 = vld [vmem:[%s6473_s9 + $0x60] sm:$0xff]  }
  0x8c   : > { %5973 = vmatmul.mubr.msk.bf16.gmra.mrb[60].mxu0 %vm390_vm1, %v2521_v11  ;;  %5939 = vmatmul.mubr.msk.bf16.gmra.mrb[60].mxu1 %vm390_vm1, %v1978_v21  ;;  %v6288_v11 = vld [vmem:[%s6473_s9 + $0x78] sm:$0xff]   ;;  %v2600_v21 = vrot.slane %v2598_v9, 2  ;;  %v2593_v36 = vsel %vm2477_vm4, %v2583_v8, %v2592_v26 }
  0x8d   : > { %5976 = vmatprep.mubr.msk.bf16.mxu0 %vm390_vm1, %v2530_v22  ;;  %5942 = vmatprep.mubr.msk.bf16.mxu1 %vm390_vm1, %v1980_v25  ;;  %v6290_v22 = vld [vmem:[%s6473_s9 + $0x80] sm:$0xff]   ;;  %v1993_v25 = vrot.slane %v6283_v12, 1  ;;  %v2604_v27 = vshrl.u32 %v6288_v11, 16  ;;  %v2607_v28 = vshll.u32 %v6288_v11, 16  ;;  %v6297_v9 = vld [vmem:[%s6473_s9 + $0x18] sm:$0xff]   ;;  %v2645_v12 = vrot.slane %v2643_v4, 2 }
  0x8e   : > { %v2601_v29 = vor.u32 %v2600_v21, %v2597_v18  ;;  %v2613_v30 = vshrl.u32 %v6290_v22, 16  ;;  %v2616_v31 = vshll.u32 %v6290_v22, 16  ;;  %v6299_v18 = vld [vmem:[%s6473_s9 + $0x10] sm:$0xfc]   ;;  %v3126_v21 = vrot.slane %v6297_v9, 2 }
  0x8f   : > { %v2606_v37 = vrot.slane %v2604_v27, 1  ;;  %v1994_v39 = vsel %vm1454_vm3, %v1991_v10, %v1993_v25  ;;  %v1996_v43 = vsel %vm1454_vm3, %v1993_v25, %v1995_v32  ;;  %v3634_v22 = vrot.slane %v6299_v18, 2  ;;  %v6302_v27 = vld [vmem:[%s6473_s9 + $0x20] sm:$0xff]  }
  0x90   : > { %v2602_v40 = vsel %vm2477_vm4, %v2592_v26, %v2601_v29  ;;  %v6301_v26 = vld [vmem:[%s6473_s9 + $0x28] sm:$0xff]   ;;  %v3637_v34 = vrot.slane %v6302_v27, 2 }
  0x91   : > { %v3130_v35 = vrot.slane %v6301_v26, 2 }
  0x94   : > { %5977 = vmatmul.mubr.msk.bf16.gmra.mrb[64].mxu0 %vm390_vm1, %v2539_v38  ;;  %5943 = vmatmul.mubr.msk.bf16.gmra.mrb[64].mxu1 %vm390_vm1, %v1982_v41  ;;  %v2609_v38 = vrot.slane %v2607_v28, 2  ;;  %v2615_v41 = vrot.slane %v2613_v30, 1  ;;  %v3127_v28 = vsel %vm3122_vm5, %v3124_v7, %v3126_v21  ;;  %v6303_v30 = vld [vmem:[%s6473_s9 + $0x30] sm:$0xff]  }
  0x95   : > { %5980 = vmatprep.mubr.msk.bf16.mxu0 %vm390_vm1, %v2548_v42  ;;  %5946 = vmatprep.mubr.msk.bf16.mxu1 %vm390_vm1, %v1984_v45  ;;  %v2618_v42 = vrot.slane %v2616_v31, 2  ;;  %v1997_v45 = vrot.slane %v6287_v33, 1  ;;  %v4371_v31 = vsel %vm445_vm0, %v6680_v55, 0  ;;  %v6304_v33 = vld [vmem:[%s6473_s9 + $0x28] sm:$0xff]  }
  0x96   : > { %v2610_v49 = vor.u32 %v2609_v38, %v2606_v37  ;;  %v3639_v37 = vrot.slane %v6304_v33, 2  ;;  %v6305_v38 = vld [vmem:[%s6473_s9 + $0x38] sm:$0xff]  }
  0x97   : > { %v2619_v50 = vor.u32 %v2618_v42, %v2615_v41  ;;  %v2000_v0 = vsel %vm1454_vm3, %v1997_v45, %v1999_v52  ;;  %v4883_v41 = vsel %vm445_vm0, %v6701_v15, 0  ;;  %v6308_v42 = vld [vmem:[%s6473_s9 + $0x38] sm:$0xff]   ;;  %v3134_v15 = vrot.slane %v6305_v38, 2  ;;  %v6309_v52 = vld [vmem:[%s6473_s9 + $0x48] sm:$0xff]  }
  0x98   : > { %v2611_v54 = vsel %vm2477_vm4, %v2601_v29, %v2610_v49  ;;  %v3640_v44 = vsel %vm3122_vm5, %v3637_v34, %v3639_v37  ;;  %v3643_v47 = vrot.slane %v6308_v42, 2 }
  0x99   : > { %v2620_v60 = vsel %vm2477_vm4, %v2610_v49, %v2619_v50  ;;  %v2629_v10 = vsel %vm2477_vm4, %v2619_v50, %v2628_v3  ;;  %v6310_v50 = vld [vmem:[%s6473_s9 + $0x40] sm:$0xff]  }
  0x9a   : > { %v3645_v58 = vrot.slane %v6310_v50, 2 }
  0x9c   : > { %5981 = vmatmul.mubr.msk.bf16.gmra.mrb[68].mxu0 %vm390_vm1, %v2557_v59  ;;  %5947 = vmatmul.mubr.msk.bf16.gmra.mrb[68].mxu1 %vm390_vm1, %v1986_v62  ;;  %v1998_v59 = vsel %vm1454_vm3, %v1995_v32, %v1997_v45  ;;  %v2636_v62 = vrot.slane %v2634_v57, 2  ;;  %v6307_v45 = vld [vmem:[%s6473_s9 + $0x40] sm:$0xff]  }
  0x9d   : > { %5984 = vmatprep.mubr.msk.bf16.mxu0 %vm390_vm1, %v2566_v63  ;;  %5950 = vmatprep.mubr.msk.bf16.mxu1 %vm390_vm1, %v1988_v2  ;;  %v6294_v63 = vld [vmem:[%s6473_s9 + $0x8] sm:$0xfc]   ;;  %v2640_v2 = vshrl.u32 %v6296_v51, 16  ;;  %v3136_v48 = vrot.slane %v6307_v45, 2 }
  0x9e   : > { %v2637_v5 = vor.u32 %v2636_v62, %v2633_v61  ;;  %v3123_v6 = vrot.slane %v6294_v63, 2  ;;  %v3140_v61 = vrot.slane %v6311_v56, 2  ;;  %v3646_v62 = vsel %vm3122_vm5, %v3643_v47, %v3645_v58  ;;  %v6314_v63 = vld [vmem:[%s6473_s9 + $0x50] sm:$0xff]  }
  0x9f   : > { %v2642_v8 = vrot.slane %v2640_v2, 1  ;;  %v6313_v2 = vld [vmem:[%s6473_s9 + $0x58] sm:$0xff]  }
  0xa0   : > { %v3125_v11 = vsel %vm3122_vm5, %v3123_v6, %v3124_v7  ;;  %v3142_v6 = vrot.slane %v6313_v2, 2 }
  0xa4   : > { %5985 = vmatmul.mubr.msk.bf16.gmra.mrb[72].mxu0 %vm390_vm1, %v2575_v17  ;;  %5951 = vmatmul.mubr.msk.bf16.gmra.mrb[72].mxu1 %vm390_vm1, %v1990_v19  ;;  %v2638_v17 = vsel %vm2477_vm4, %v2628_v3, %v2637_v5  ;;  %v6298_v19 = vld [vmem:[%s6473_s9 + $0x20] sm:$0xff]   ;;  %v6316_v3 = vld [vmem:[%s6473_s9 + $0x58] sm:$0xff]  }
  0xa5   : > { %5988 = vmatprep.mubr.msk.bf16.mxu0 %vm390_vm1, %v2584_v20  ;;  %5954 = vmatprep.mubr.msk.bf16.mxu1 %vm390_vm1, %v1992_v23  ;;  %v2646_v20 = vor.u32 %v2645_v12, %v2642_v8  ;;  %v3635_v23 = vrot.slane %v6300_v13, 2  ;;  %v3128_v24 = vrot.slane %v6298_v19, 2  ;;  %v3651_v7 = vrot.slane %v6316_v3, 2 }
  0xa6   : > { %v3144_v8 = vrot.slane %v6315_v14, 2  ;;  %v3143_v12 = vsel %vm3122_vm5, %v3140_v61, %v3142_v6 }
  0xa7   : > { %v2647_v25 = vsel %vm2477_vm4, %v2637_v5, %v2646_v20  ;;  %v3636_v29 = vsel %vm3122_vm5, %v3634_v22, %v3635_v23  ;;  %v3129_v32 = vsel %vm3122_vm5, %v3126_v21, %v3128_v24  ;;  %v3638_v55 = vsel %vm3122_vm5, %v3635_v23, %v3637_v34  ;;  %v6321_v34 = vld [vmem:[%s6473_s9 + $0x78] sm:$0xff]  }
  0xa8   : > { %v3649_v5 = vrot.slane %v6314_v63, 2  ;;  %v3145_v18 = vsel %vm3122_vm5, %v3142_v6, %v3144_v8 }
  0xaa   : > { %v3652_v13 = vsel %vm3122_vm5, %v3649_v5, %v3651_v7 }
  0xac   : > { %5989 = vmatmul.mubr.msk.bf16.gmra.mrb[76].mxu0 %vm390_vm1, %v2593_v36  ;;  %5955 = vmatmul.mubr.msk.bf16.gmra.mrb[76].mxu1 %vm390_vm1, %v1994_v39  ;;  %v3132_v36 = vrot.slane %v6303_v30, 2  ;;  %v6306_v39 = vld [vmem:[%s6473_s9 + $0x30] sm:$0xff]  }
  0xad   : > { %5992 = vmatprep.mubr.msk.bf16.mxu0 %vm390_vm1, %v2602_v40  ;;  %5958 = vmatprep.mubr.msk.bf16.mxu1 %vm390_vm1, %v1996_v43  ;;  %v3131_v40 = vsel %vm3122_vm5, %v3128_v24, %v3130_v35  ;;  %v3641_v46 = vrot.slane %v6306_v39, 2  ;;  %v3150_v39 = vrot.slane %v6321_v34, 2 }
  0xae   : > { %v3133_v43 = vsel %vm3122_vm5, %v3130_v35, %v3132_v36  ;;  %v3135_v57 = vsel %vm3122_vm5, %v3132_v36, %v3134_v15  ;;  %v6864_v35 = vld [vmem:[%s6473_s9 + $0x78] sm:$0xff]  }
  0xaf   : > { %v3642_v49 = vsel %vm3122_vm5, %v3639_v37, %v3641_v46  ;;  %v3644_v51 = vsel %vm3122_vm5, %v3641_v46, %v3643_v47  ;;  %v6326_v47 = vld [vmem:[%s6473_s9 + $0x80] sm:$0xff]  }
  0xb4   : > { %5993 = vmatmul.mubr.msk.bf16.gmra.mrb[80].mxu0 %vm390_vm1, %v2611_v54  ;;  %5959 = vmatmul.mubr.msk.bf16.gmra.mrb[80].mxu1 %vm390_vm1, %v1998_v59  ;;  %v3137_v54 = vsel %vm3122_vm5, %v3134_v15, %v3136_v48  ;;  %v3138_v59 = vrot.slane %v6309_v52, 2  ;;  %v6890_v52 = vld [vmem:[%s6473_s9 + $0x90] sm:$0xff]  }
  0xb5   : > { %5996 = vmatprep.mubr.msk.bf16.mxu0 %vm390_vm1, %v2620_v60  ;;  %5962 = vmatprep.mubr.msk.bf16.mxu1 %vm390_vm1, %v2000_v0  ;;  %v3647_v60 = vrot.slane %v6312_v53, 2  ;;  %v6893_v53 = vld [vmem:[%s6473_s9 + $0x88] sm:$0xff]  }
  0xb6   : > { %v3139_v0 = vsel %vm3122_vm5, %v3136_v48, %v3138_v59  ;;  %v3141_v4 = vsel %vm3122_vm5, %v3138_v59, %v3140_v61  ;;  %v6333_v59 = vld [vmem:[%s6473_s9 + $0x18] sm:$0xff]   ;;  %v3663_v63 = vrot.slane %v6893_v53, 2 }
  0xb7   : > { %v3648_v1 = vsel %vm3122_vm5, %v3645_v58, %v3647_v60  ;;  %v3650_v9 = vsel %vm3122_vm5, %v3647_v60, %v3649_v5  ;;  %v6332_v58 = vld [vmem:[%s6473_s9 + $0x10] sm:$0xfc]   ;;  %v3661_v60 = vrot.slane %v6326_v47, 2  ;;  %v4155_v3 = vshrl.u32 %v6333_v59, 16  ;;  %v6946_v47 = vld [vmem:[%s6473_s9 + $0x18] sm:$0xff]  }
  0xb8   : > { %v4150_v2 = vshll.u32 %v6332_v58, 16  ;;  %v6341_v53 = vld [vmem:[%s6473_s9 + $0x38] sm:$0xff]  }
  0xbc   : > { %5997 = vmatmul.mubr.msk.bf16.gmra.mrb[84].mxu0 %vm390_vm1, %v2629_v10  ;;  %5963 = vmatmul.mubr.msk.bf16.gmra.mrb[84].mxu1 %vm390_vm1, %v2002_v16  ;;  %v6318_v10 = vld [vmem:[%s6473_s9 + $0x60] sm:$0xff]   ;;  %v6317_v16 = vld [vmem:[%s6473_s9 + $0x68] sm:$0xff]  }
  0xbd   : > { %6000 = vmatprep.mubr.msk.bf16.mxu0 %vm390_vm1, %v2638_v17  ;;  %6006 = vmatprep.mubr.msk.bf16.mxu1 %vm390_vm1, %v3125_v11  ;;  %v6320_v17 = vld [vmem:[%s6473_s9 + $0x68] sm:$0xff]   ;;  %v6319_v11 = vld [vmem:[%s6473_s9 + $0x70] sm:$0xff]   ;;  %v3653_v19 = vrot.slane %v6318_v10, 2  ;;  %v3146_v20 = vrot.slane %v6317_v16, 2  ;;  %v6335_v10 = vld [vmem:[%s6473_s9 + $0x20] sm:$0xff]  }
  0xbe   : > { %v3655_v21 = vrot.slane %v6320_v17, 2  ;;  %v3148_v23 = vrot.slane %v6319_v11, 2  ;;  %v6329_v11 = vld [vmem:[%s6473_s9 + $0x98] ss:$0 sps:$4 sm:$0x33]  }
  0xc0   : > { %v3656_v33 = vsel %vm3122_vm5, %v3653_v19, %v3655_v21  ;;  %v3149_v37 = vsel %vm3122_vm5, %v3146_v20, %v3148_v23  ;;  %v3151_v50 = vsel %vm3122_vm5, %v3148_v23, %v3150_v39  ;;  %v4157_v23 = vrot.slane %v4155_v3, 2 }
  0xc4   : > { %6001 = vmatmul.mubr.msk.bf16.gmra.mrb[88].mxu0 %vm390_vm1, %v2647_v25  ;;  %6007 = vmatmul.mubr.msk.bf16.vlgmr.msra.gmra.mrb[88].mxu1 %vm390_vm1, %v3127_v28  ;;  %v3654_v28 = vsel %vm3122_vm5, %v3651_v7, %v3653_v19  ;;  %v6922_v19 = vld [vmem:[%s6473_s9 + $0x98] sm:$0xff]  }
  0xc5   : > { %6044 = vmatprep.mubr.msk.bf16.mxu0 %vm390_vm1, %v3636_v29  ;;  %6081 = vmatpush3.bf16.msra.mxu1 %v4371_v31  ;;  %v6322_v29 = vld [vmem:[%s6473_s9 + $0x70] sm:$0xff]  }
  0xc6   : > { %6010 = vmatprep.mubr.msk.bf16.mxu1 %vm390_vm1, %v3129_v32  ;;  %v3147_v32 = vsel %vm3122_vm5, %v3144_v8, %v3146_v20  ;;  %v3657_v38 = vrot.slane %v6322_v29, 2  ;;  %v3158_v29 = vrot.slane %v6329_v11, 2 }
  0xc8   : > { %v3658_v15 = vsel %vm3122_vm5, %v3655_v21, %v3657_v38 }
  0xcc   : > { %6045 = vmatmul.mubr.msk.bf16.vlgmr.msra.gmra.mrb[92].mxu0 %vm390_vm1, %v3638_v55  ;;  %6011 = vmatmul.mubr.msk.bf16.gmra.mrb[92].mxu1 %vm390_vm1, %v3131_v40  ;;  %v6870_v55 = vld [vmem:[%s6473_s9 + $0x80] sm:$0xff]   ;;  %v3659_v40 = vrot.slane %v6864_v35, 2 }
  0xcd   : > { %6119 = vmatpush3.bf16.msra.mxu0 %v4883_v41  ;;  %6014 = vmatprep.mubr.msk.bf16.mxu1 %vm390_vm1, %v3133_v43  ;;  %v3152_v42 = vrot.slane %v6870_v55, 2  ;;  %v6334_v55 = vld [vmem:[%s6473_s9 + $0xa0] ss:$0 sps:$4 sm:$0x33]  }
  0xce   : > { %6048 = vmatprep.mubr.msk.bf16.mxu0 %vm390_vm1, %v3640_v44  ;;  %v3662_v8 = vsel %vm3122_vm5, %v3659_v40, %v3661_v60 }
  0xcf   : > { %v3153_v56 = vsel %vm3122_vm5, %v3150_v39, %v3152_v42 }
  0xd4   : > { %6049 = vmatmul.mubr.msk.bf16.gmra.mrb[96].mxu0 %vm390_vm1, %v3642_v49  ;;  %6015 = vmatmul.mubr.msk.bf16.gmra.mrb[96].mxu1 %vm390_vm1, %v3135_v57  ;;  %v3660_v57 = vsel %vm3122_vm5, %v3657_v38, %v3659_v40 }
  0xd5   : > { %6052 = vmatprep.mubr.msk.bf16.mxu0 %vm390_vm1, %v3644_v51  ;;  %6018 = vmatprep.mubr.msk.bf16.mxu1 %vm390_vm1, %v3137_v54  ;;  %v6325_v51 = vld [vmem:[%s6473_s9 + $0x88] sm:$0xff]  }
  0xd6   : > { %v3154_v61 = vrot.slane %v6325_v51, 2 }
  0xd8   : > { %v3155_v16 = vsel %vm3122_vm5, %v3152_v42, %v3154_v61 }
  0xdc   : > { %6053 = vmatmul.mubr.msk.bf16.gmra.mrb[100].mxu0 %vm390_vm1, %v3646_v62  ;;  %6019 = vmatmul.mubr.msk.bf16.gmra.mrb[100].mxu1 %vm390_vm1, %v3139_v0  ;;  %v3156_v62 = vrot.slane %v6890_v52, 2  ;;  %v3669_v52 = vrot.slane %v6334_v55, 2 }
  0xdd   : > { %6056 = vmatprep.mubr.msk.bf16.mxu0 %vm390_vm1, %v3648_v1  ;;  %6022 = vmatprep.mubr.msk.bf16.mxu1 %vm390_vm1, %v3141_v4  ;;  %v4147_v1 = vshrl.u32 %v6332_v58, 16  ;;  %v4158_v4 = vshll.u32 %v6333_v59, 16  ;;  %v4792_v58 = vrot.slane %v6946_v47, 3 }
  0xde   : > { %v3157_v17 = vsel %vm3122_vm5, %v3154_v61, %v3156_v62 }
  0xdf   : > { %v4149_v21 = vrot.slane %v4147_v1, 2 }
  0xe4   : > { %6057 = vmatmul.mubr.msk.bf16.gmra.mrb[104].mxu0 %vm390_vm1, %v3650_v9  ;;  %6023 = vmatmul.mubr.msk.bf16.gmra.mrb[104].mxu1 %vm390_vm1, %v3143_v12  ;;  %v6330_v9 = vld [vmem:[%s6473_s9 + $0x90] sm:$0xff]  }
  0xe5   : > { %6060 = vmatprep.mubr.msk.bf16.mxu0 %vm390_vm1, %v3652_v13  ;;  %6026 = vmatprep.mubr.msk.bf16.mxu1 %vm390_vm1, %v3145_v18  ;;  %v3664_v18 = vsel %vm3122_vm5, %v3661_v60, %v3663_v63 }
  0xe7   : > { %v5818_v22 = vpop.f32.mrb[0].mxu0  ;;  %v5838_v24 = vpop.f32.mrb[0].mxu1 }
  0xe8   : > { %629 = vst.msk [vmem:[#allocation2 + $0x10] sm:$0xff] %vm626_vm6, %v5818_v22  ;;  %v483_v25 = vpop.f32.mrb[1].mxu0  ;;  %649 = vst.msk [vmem:[#allocation2 + $0xb0] sm:$0xff] %vm626_vm6, %v5838_v24  ;;  %v563_v26 = vpop.f32.mrb[1].mxu1  ;;  %v4152_v22 = vrot.slane %v4150_v2, 3  ;;  %v4160_v24 = vrot.slane %v4158_v4, 3 }
  0xe9   : > { %627 = vst.msk [vmem:[#allocation2] sm:$0xff] %vm626_vm6, %v483_v25  ;;  %v5819_v27 = vpop.f32.mrb[2].mxu0  ;;  %647 = vst.msk [vmem:[#allocation2 + $0xa0] sm:$0xff] %vm626_vm6, %v563_v26  ;;  %v5839_v30 = vpop.f32.mrb[2].mxu1  ;;  %v6336_v25 = vld [vmem:[%s6473_s9 + $0x28] sm:$0xff]   ;;  %v3665_v26 = vrot.slane %v6330_v9, 2 }
  0xea   : > { %630 = vst.msk [vmem:[#allocation2 + $0x18] sm:$0xff] %vm626_vm6, %v5819_v27  ;;  %v486_v31 = vpop.f32.mrb[3].mxu0  ;;  %650 = vst.msk [vmem:[#allocation2 + $0xb8] sm:$0xff] %vm626_vm6, %v5839_v30  ;;  %v566_v36 = vpop.f32.mrb[3].mxu1  ;;  %v4164_v27 = vshrl.u32 %v6335_v10, 16  ;;  %v3667_v30 = vrot.slane %v6922_v19, 2 }
  0xeb   : > { %628 = vst.msk [vmem:[#allocation2 + $0x8] sm:$0xff] %vm626_vm6, %v486_v31  ;;  %648 = vst.msk [vmem:[#allocation2 + $0xa8] sm:$0xff] %vm626_vm6, %v566_v36  ;;  %v4173_v34 = vshrl.u32 %v6336_v25, 16  ;;  %v4176_v35 = vshll.u32 %v6336_v25, 16  ;;  %v3666_v40 = vsel %vm3122_vm5, %v3663_v63, %v3665_v26  ;;  %v4191_v63 = vshrl.u32 %v6341_v53, 16  ;;  %v6343_v4 = vld [vmem:[%s6473_s9 + $0x40] sm:$0xff]  }
  0xec   : > { %6061 = vmatmul.mubr.msk.bf16.gmra.mrb[108].mxu0 %vm390_vm1, %v3654_v28  ;;  %6027 = vmatmul.mubr.msk.bf16.gmra.mrb[108].mxu1 %vm390_vm1, %v3147_v32  ;;  %v4167_v28 = vshll.u32 %v6335_v10, 16  ;;  %v4153_v32 = vor.u32 %v4152_v22, %v4149_v21  ;;  %v6340_v10 = vld [vmem:[%s6473_s9 + $0x20] sm:$0xff]   ;;  %v6345_v21 = vld [vmem:[%s6473_s9 + $0x48] sm:$0xff]  }
  0xed   : > { %6064 = vmatprep.mubr.msk.bf16.mxu0 %vm390_vm1, %v3656_v33  ;;  %6030 = vmatprep.mubr.msk.bf16.mxu1 %vm390_vm1, %v3149_v37  ;;  %v4161_v33 = vor.u32 %v4160_v24, %v4157_v23  ;;  %v4178_v51 = vrot.slane %v4176_v35, 3  ;;  %v4212_v35 = vshll.u32 %v6345_v21, 16 }
  0xee   : > { %v4169_v42 = vrot.slane %v4167_v28, 3 }
  0xef   : > { %v5822_v41 = vpop.f32.mrb[4].mxu0  ;;  %v5842_v43 = vpop.f32.mrb[4].mxu1  ;;  %v665_v1 = vld [vmem:[#allocation2 + $0x10] sm:$0xff] }
  0xf0   : > { %633 = vst.msk [vmem:[#allocation2 + $0x30] sm:$0xff] %vm626_vm6, %v5822_v41  ;;  %v499_v44 = vpop.f32.mrb[5].mxu0  ;;  %653 = vst.msk [vmem:[#allocation2 + $0xd0] sm:$0xff] %vm626_vm6, %v5842_v43  ;;  %v579_v45 = vpop.f32.mrb[5].mxu1  ;;  %v4166_v41 = vrot.slane %v4164_v27, 2 }
  0xf1   : > { %631 = vst.msk [vmem:[#allocation2 + $0x20] sm:$0xff] %vm626_vm6, %v499_v44  ;;  %v5823_v46 = vpop.f32.mrb[6].mxu0  ;;  %651 = vst.msk [vmem:[#allocation2 + $0xc0] sm:$0xff] %vm626_vm6, %v579_v45  ;;  %v5843_v48 = vpop.f32.mrb[6].mxu1  ;;  %v3159_v45 = vsel %vm3122_vm5, %v3156_v62, %v3158_v29  ;;  %v4200_v29 = vshrl.u32 %v6343_v4, 16 }
  0xf2   : > { %634 = vst.msk [vmem:[#allocation2 + $0x38] sm:$0xff] %vm626_vm6, %v5823_v46  ;;  %v502_v49 = vpop.f32.mrb[7].mxu0  ;;  %654 = vst.msk [vmem:[#allocation2 + $0xd8] sm:$0xff] %vm626_vm6, %v5843_v48  ;;  %v582_v54 = vpop.f32.mrb[7].mxu1  ;;  %v3668_v46 = vsel %vm3122_vm5, %v3665_v26, %v3667_v30  ;;  %v6339_v48 = vld [vmem:[%s6473_s9 + $0x30] sm:$0xff]   ;;  %v664_v23 = vld [vmem:[#allocation2 + $0x8] sm:$0xff] }
  0xf3   : > { %632 = vst.msk [vmem:[#allocation2 + $0x28] sm:$0xff] %vm626_vm6, %v502_v49  ;;  %652 = vst.msk [vmem:[#allocation2 + $0xc8] sm:$0xff] %vm626_vm6, %v582_v54  ;;  %v4170_v54 = vor.u32 %v4169_v42, %v4166_v41  ;;  %v4182_v59 = vshrl.u32 %v6339_v48, 16  ;;  %v4185_v60 = vshll.u32 %v6339_v48, 16  ;;  %v4193_v26 = vrot.slane %v4191_v63, 2  ;;  %v6990_v41 = vld [vmem:[%s6473_s9 + $0x30] sm:$0xff]  }
  0xf4   : > { %6065 = vmatmul.mubr.msk.bf16.gmra.mrb[112].mxu0 %vm390_vm1, %v3658_v15  ;;  %6031 = vmatmul.mubr.msk.bf16.gmra.mrb[112].mxu1 %vm390_vm1, %v3151_v50  ;;  %v6337_v15 = vld [vmem:[%s6473_s9 + $0x10] sm:$0xf8]   ;;  %v4162_v50 = vsel %vm4145_vm7, %v4153_v32, %v4161_v33  ;;  %v4203_v32 = vshll.u32 %v6343_v4, 16 }
  0xf5   : > { %6068 = vmatprep.mubr.msk.bf16.mxu0 %vm390_vm1, %v3660_v57  ;;  %6034 = vmatprep.mubr.msk.bf16.mxu1 %vm390_vm1, %v3153_v56  ;;  %v4175_v57 = vrot.slane %v4173_v34, 2  ;;  %v4791_v56 = vrot.slane %v6337_v15, 3  ;;  %v4171_v9 = vsel %vm4145_vm7, %v4161_v33, %v4170_v54  ;;  %v4184_v19 = vrot.slane %v4182_v59, 2 }
  0xf6   : > { %v4209_v34 = vshrl.u32 %v6345_v21, 16  ;;  %v4205_v48 = vrot.slane %v4203_v32, 3  ;;  %v4214_v59 = vrot.slane %v4212_v35, 3  ;;  %v6351_v32 = vld [vmem:[%s6473_s9 + $0x60] sm:$0xff]  }
  0xf7   : > { %v5826_v0 = vpop.f32.mrb[8].mxu0  ;;  %v5846_v14 = vpop.f32.mrb[8].mxu1  ;;  %v6959_v62 = vor.u32 %v4178_v51, %v4175_v57  ;;  %v4793_v11 = vsel %vm4790_vm8, %v4791_v56, %v4792_v58  ;;  %v669_v55 = vld [vmem:[#allocation2 + $0x30] sm:$0xff] }
  0xf8   : > { %637 = vst.msk [vmem:[#allocation2 + $0x50] sm:$0xff] %vm626_vm6, %v5826_v0  ;;  %v515_v5 = vpop.f32.mrb[9].mxu0  ;;  %657 = vst.msk [vmem:[#allocation2 + $0xf0] sm:$0xff] %vm626_vm6, %v5846_v14  ;;  %v595_v6 = vpop.f32.mrb[9].mxu1  ;;  %v4194_v0 = vshll.u32 %v6341_v53, 16  ;;  %v4211_v47 = vrot.slane %v4209_v34, 2 }
  0xf9   : > { %635 = vst.msk [vmem:[#allocation2 + $0x40] sm:$0xff] %vm626_vm6, %v515_v5  ;;  %v5827_v7 = vpop.f32.mrb[10].mxu0  ;;  %655 = vst.msk [vmem:[#allocation2 + $0xe0] sm:$0xff] %vm626_vm6, %v595_v6  ;;  %v5847_v12 = vpop.f32.mrb[10].mxu1  ;;  %v663_v5 = vld [vmem:[#allocation2] sm:$0xff]  ;;  %v4180_v25 = vsel %vm4145_vm7, %v4170_v54, %v6959_v62  ;;  %v670_v53 = vld [vmem:[#allocation2 + $0x38] sm:$0xff] }
  0xfa   : > { %638 = vst.msk [vmem:[#allocation2 + $0x58] sm:$0xff] %vm626_vm6, %v5827_v7  ;;  %v518_v13 = vpop.f32.mrb[11].mxu0  ;;  %658 = vst.msk [vmem:[#allocation2 + $0xf8] sm:$0xff] %vm626_vm6, %v5847_v12  ;;  %v598_v20 = vpop.f32.mrb[11].mxu1  ;;  %v6968_v12 = vld [vmem:[%s6473_s9 + $0x28] sm:$0xff]   ;;  %v4196_v27 = vrot.slane %v4194_v0, 3 }
  0xfb   : > { %636 = vst.msk [vmem:[#allocation2 + $0x48] sm:$0xff] %vm626_vm6, %v518_v13  ;;  %656 = vst.msk [vmem:[#allocation2 + $0xe8] sm:$0xff] %vm626_vm6, %v598_v20  ;;  %v4187_v20 = vrot.slane %v4185_v60, 3  ;;  %v668_v63 = vld [vmem:[#allocation2 + $0x28] sm:$0xff] }
  0xfc   : > { %6069 = vmatmul.mubr.msk.bf16.gmra.mrb[116].mxu0 %vm390_vm1, %v3662_v8  ;;  %6035 = vmatmul.mubr.msk.bf16.gmra.mrb[116].mxu1 %vm390_vm1, %v3155_v16  ;;  %v3670_v8 = vsel %vm3122_vm5, %v3667_v30, %v3669_v52  ;;  %v666_v16 = vld [vmem:[#allocation2 + $0x18] sm:$0xff]  ;;  %v4794_v30 = vrot.slane %v6340_v10, 3 }
  0xfd   : > { %6072 = vmatprep.mubr.msk.bf16.mxu0 %vm390_vm1, %v3664_v18  ;;  %6038 = vmatprep.mubr.msk.bf16.mxu1 %vm390_vm1, %v3157_v17  ;;  %v4188_v33 = vor.u32 %v4187_v20, %v4184_v19 }
  0xff   : > { %v5830_v31 = vpop.f32.mrb[12].mxu0  ;;  %v5850_v36 = vpop.f32.mrb[12].mxu1  ;;  %v4189_v56 = vsel %vm4145_vm7, %v6959_v62, %v4188_v33  ;;  %v673_v19 = vld [vmem:[#allocation2 + $0x50] sm:$0xff] }
 0x100   : > { %641 = vst.msk [vmem:[#allocation2 + $0x70] sm:$0xff] %vm626_vm6, %v5830_v31  ;;  %v531_v37 = vpop.f32.mrb[13].mxu0  ;;  %661 = vst.msk [vmem:[#allocation2 + $0x110] sm:$0xff] %vm626_vm6, %v5850_v36  ;;  %v611_v38 = vpop.f32.mrb[13].mxu1  ;;  %v4796_v31 = vrot.slane %v6968_v12, 3 }
 0x101   : > { %639 = vst.msk [vmem:[#allocation2 + $0x60] sm:$0xff] %vm626_vm6, %v531_v37  ;;  %v5831_v39 = vpop.f32.mrb[14].mxu0  ;;  %659 = vst.msk [vmem:[#allocation2 + $0x100] sm:$0xff] %vm626_vm6, %v611_v38  ;;  %v5851_v43 = vpop.f32.mrb[14].mxu1  ;;  %v6987_v37 = vor.u32 %v4196_v27, %v4193_v26  ;;  %v674_v35 = vld [vmem:[#allocation2 + $0x58] sm:$0xff] }
 0x102   : > { %642 = vst.msk [vmem:[#allocation2 + $0x78] sm:$0xff] %vm626_vm6, %v5831_v39  ;;  %v534_v44 = vpop.f32.mrb[15].mxu0  ;;  %662 = vst.msk [vmem:[#allocation2 + $0x118] sm:$0xff] %vm626_vm6, %v5851_v43  ;;  %v614_v49 = vpop.f32.mrb[15].mxu1  ;;  %v667_v43 = vld [vmem:[#allocation2 + $0x20] sm:$0xff]  ;;  %v4797_v15 = vsel %vm4790_vm8, %v4794_v30, %v4796_v31 }
 0x103   : > { %640 = vst.msk [vmem:[#allocation2 + $0x68] sm:$0xff] %vm626_vm6, %v534_v44  ;;  %660 = vst.msk [vmem:[#allocation2 + $0x108] sm:$0xff] %vm626_vm6, %v614_v49  ;;  %v6999_v49 = vld [vmem:[%s6473_s9 + $0x38] sm:$0xff]  }
 0x104   : > { %6073 = vmatmul.mubr.msk.bf16.gmra.mrb[120].mxu0 %vm390_vm1, %v3666_v40  ;;  %6039 = vmatmul.mubr.msk.bf16.gmra.mrb[120].mxu1 %vm390_vm1, %v3159_v45  ;;  %v4202_v40 = vrot.slane %v4200_v29, 2 }
 0x105   : > { %6076 = vmatprep.mubr.msk.bf16.mxu0 %vm390_vm1, %v3668_v46  ;;  %6082 = vmatprep.mubr.msk.bf16.mxu1 %vm390_vm1, %v4162_v50  ;;  %v4795_v46 = vsel %vm4790_vm8, %v4792_v58, %v4794_v30  ;;  %v6347_v50 = vld [vmem:[%s6473_s9 + $0x50] sm:$0xff]  }
 0x106   : > { %v4206_v10 = vor.u32 %v4205_v48, %v4202_v40  ;;  %v6353_v40 = vld [vmem:[%s6473_s9 + $0x68] sm:$0xff]  }
 0x107   : > { %v5834_v61 = vpop.f32.mrb[16].mxu0  ;;  %v5856_v2 = vpop.f32.mrb[16].mxu1 }
 0x108   : > { %645 = vst.msk [vmem:[#allocation2 + $0x90] sm:$0xff] %vm626_vm6, %v5834_v61  ;;  %v547_v3 = vpop.f32.mrb[17].mxu0  ;;  %v1216_v14 = vadd.f32 %v5856_v2, %v665_v1  ;;  %v1071_v6 = vpop.f32.mrb[17].mxu1  ;;  %v4198_v1 = vsel %vm4145_vm7, %v4188_v33, %v6987_v37  ;;  %v6349_v2 = vld [vmem:[%s6473_s9 + $0x58] sm:$0xff]  }
 0x109   : > { %643 = vst.msk [vmem:[#allocation2 + $0x80] sm:$0xff] %vm626_vm6, %v547_v3  ;;  %v5835_v7 = vpop.f32.mrb[18].mxu0  ;;  %v1214_v13 = vadd.f32 %v1071_v6, %v663_v5  ;;  %v5857_v17 = vpop.f32.mrb[18].mxu1  ;;  %v4798_v6 = vrot.slane %v6990_v41, 3 }
 0x10a   : > { %646 = vst.msk [vmem:[#allocation2 + $0x98] sm:$0xff] %vm626_vm6, %v5835_v7  ;;  %v550_v18 = vpop.f32.mrb[19].mxu0  ;;  %1252 = vst.msk [vmem:[#allocation2 + $0x10] sm:$0xff] %vm626_vm6, %v1216_v14  ;;  %v1217_v22 = vadd.f32 %v5857_v17, %v666_v16  ;;  %v1074_v24 = vpop.f32.mrb[19].mxu1  ;;  %v4218_v7 = vshrl.u32 %v6347_v50, 16  ;;  %v4800_v16 = vrot.slane %v6999_v49, 3 }
 0x10b   : > { %644 = vst.msk [vmem:[#allocation2 + $0x88] sm:$0xff] %vm626_vm6, %v550_v18  ;;  %1250 = vst.msk [vmem:[#allocation2] sm:$0xff] %vm626_vm6, %v1214_v13  ;;  %v1215_v28 = vadd.f32 %v1074_v24, %v664_v23  ;;  %v7018_v13 = vor.u32 %v4214_v59, %v4211_v47  ;;  %v4227_v18 = vshrl.u32 %v6349_v2, 16  ;;  %v7027_v23 = vld [vmem:[%s6473_s9 + $0x48] sm:$0xff]   ;;  %v4245_v59 = vshrl.u32 %v6353_v40, 16 }
 0x10c   : > { %6077 = vmatmul.mubr.msk.bf16.gmra.mrb[124].mxu0 %vm390_vm1, %v3670_v8  ;;  %1253 = vst.msk [vmem:[#allocation2 + $0x18] sm:$0xff] %vm626_vm6, %v1217_v22  ;;  %6083 = vmatmul.mubr.msk.bf16.vlgmr.msra.gmra.mrb[124].mxu1 %vm390_vm1, %v4171_v9  ;;  %v4221_v8 = vshll.u32 %v6347_v50, 16  ;;  %v7024_v22 = vld [vmem:[%s6473_s9 + $0x40] sm:$0xff]   ;;  %v4220_v29 = vrot.slane %v4218_v7, 2  ;;  %v4801_v12 = vsel %vm4790_vm8, %v4798_v6, %v4800_v16  ;;  %v4804_v47 = vrot.slane %v7027_v23, 3 }
 0x10d   : > { %6120 = vmatprep.mubr.msk.bf16.mxu0 %vm390_vm1, %v4793_v11  ;;  %1251 = vst.msk [vmem:[#allocation2 + $0x8] sm:$0xff] %vm626_vm6, %v1215_v28  ;;  %6086 = vmatprep.mubr.msk.bf16.mxu1 %vm390_vm1, %v4180_v25  ;;  %v4230_v11 = vshll.u32 %v6349_v2, 16  ;;  %v671_v25 = vld [vmem:[#allocation2 + $0x40] sm:$0xff]  ;;  %v4799_v28 = vsel %vm4790_vm8, %v4796_v31, %v4798_v6  ;;  %v4802_v50 = vrot.slane %v7024_v22, 3 }
 0x10e   : > { %v4223_v30 = vrot.slane %v4221_v8, 3 }
 0x10f   : > { %v5894_v36 = vpop.f32.mrb[20].mxu0  ;;  %v5860_v38 = vpop.f32.mrb[20].mxu1  ;;  %v4803_v2 = vsel %vm4790_vm8, %v4800_v16, %v4802_v50 }
 0x110   : > { %v1583_v39 = vpop.f32.mrb[21].mxu0  ;;  %v1220_v42 = vadd.f32 %v5860_v38, %v669_v55  ;;  %v1087_v44 = vpop.f32.mrb[21].mxu1  ;;  %v4207_v38 = vsel %vm4145_vm7, %v6987_v37, %v4206_v10 }
 0x111   : > { %v5895_v45 = vpop.f32.mrb[22].mxu0  ;;  %v1288_v57 = vld [vmem:[#allocation2 + $0x10] sm:$0xff]  ;;  %v1218_v51 = vadd.f32 %v1087_v44, %v667_v43  ;;  %v5861_v52 = vpop.f32.mrb[22].mxu1  ;;  %v672_v43 = vld [vmem:[#allocation2 + $0x48] sm:$0xff] }
 0x112   : > { %v1586_v54 = vpop.f32.mrb[23].mxu0  ;;  %1256 = vst.msk [vmem:[#allocation2 + $0x30] sm:$0xff] %vm626_vm6, %v1220_v42  ;;  %v1728_v58 = vadd.f32 %v5894_v36, %v1288_v57  ;;  %v1286_v60 = vld [vmem:[#allocation2] sm:$0xff]  ;;  %v1221_v61 = vadd.f32 %v5861_v52, %v670_v53  ;;  %v1090_v0 = vpop.f32.mrb[23].mxu1  ;;  %v4224_v53 = vor.u32 %v4223_v30, %v4220_v29  ;;  %v4236_v52 = vshrl.u32 %v6351_v32, 16 }
 0x113   : > { %1254 = vst.msk [vmem:[#allocation2 + $0x20] sm:$0xff] %vm626_vm6, %v1218_v51  ;;  %v1726_v3 = vadd.f32 %v1583_v39, %v1286_v60  ;;  %v1289_v4 = vld [vmem:[#allocation2 + $0x18] sm:$0xff]  ;;  %v1219_v14 = vadd.f32 %v1090_v0, %v668_v63  ;;  %v4216_v39 = vsel %vm4145_vm7, %v4206_v10, %v7018_v13  ;;  %v677_v63 = vld [vmem:[#allocation2 + $0x70] sm:$0xff] }
 0x114   : > { %6121 = vmatmul.mubr.msk.bf16.vlgmr.msra.gmra.mrb[128].mxu0 %vm390_vm1, %v4795_v46  ;;  %1764 = vst.msk [vmem:[#allocation2 + $0x10] sm:$0xff] %vm626_vm6, %v1728_v58  ;;  %1257 = vst.msk [vmem:[#allocation2 + $0x38] sm:$0xff] %vm626_vm6, %v1221_v61  ;;  %v1729_v62 = vadd.f32 %v5895_v45, %v1289_v4  ;;  %v1287_v5 = vld [vmem:[#allocation2 + $0x8] sm:$0xff]  ;;  %6087 = vmatmul.mubr.msk.bf16.gmra.mrb[128].mxu1 %vm390_vm1, %v4189_v56  ;;  %v4229_v45 = vrot.slane %v4227_v18, 2  ;;  %v4232_v46 = vrot.slane %v4230_v11, 3  ;;  %v4248_v58 = vshll.u32 %v6353_v40, 16 }
 0x115   : > { %6124 = vmatprep.mubr.msk.bf16.mxu0 %vm390_vm1, %v4797_v15  ;;  %1762 = vst.msk [vmem:[#allocation2] sm:$0xff] %vm626_vm6, %v1726_v3  ;;  %1255 = vst.msk [vmem:[#allocation2 + $0x28] sm:$0xff] %vm626_vm6, %v1219_v14  ;;  %v1727_v9 = vadd.f32 %v1586_v54, %v1287_v5  ;;  %6090 = vmatprep.mubr.msk.bf16.mxu1 %vm390_vm1, %v4198_v1  ;;  %v4239_v54 = vshll.u32 %v6351_v32, 16  ;;  %v7061_v3 = vld [vmem:[%s6473_s9 + $0x50] sm:$0xff]   ;;  %v7064_v4 = vld [vmem:[%s6473_s9 + $0x58] sm:$0xff]   ;;  %v4225_v7 = vsel %vm4145_vm7, %v7018_v13, %v4224_v53 }
 0x116   : > { %1765 = vst.msk [vmem:[#allocation2 + $0x18] sm:$0xff] %vm626_vm6, %v1729_v62  ;;  %v7054_v61 = vor.u32 %v4232_v46, %v4229_v45  ;;  %v675_v62 = vld [vmem:[#allocation2 + $0x60] sm:$0xff]  ;;  %v4238_v8 = vrot.slane %v4236_v52, 2  ;;  %v7069_v10 = vld [vmem:[%s6473_s9 + $0x70] sm:$0xff]   ;;  %v678_v18 = vld [vmem:[#allocation2 + $0x78] sm:$0xff] }
 0x117   : > { %v5898_v17 = vpop.f32.mrb[24].mxu0  ;;  %1763 = vst.msk [vmem:[#allocation2 + $0x8] sm:$0xff] %vm626_vm6, %v1727_v9  ;;  %v5864_v20 = vpop.f32.mrb[24].mxu1  ;;  %v4241_v9 = vrot.slane %v4239_v54, 3  ;;  %v4257_v40 = vshll.u32 %v7069_v10, 16  ;;  %v7096_v46 = vld [vmem:[%s6473_s9 + $0x60] sm:$0xff]  }
 0x118   : > { %v1599_v21 = vpop.f32.mrb[25].mxu0  ;;  %v1224_v24 = vadd.f32 %v5864_v20, %v673_v19  ;;  %v1103_v26 = vpop.f32.mrb[25].mxu1  ;;  %v4805_v19 = vsel %vm4790_vm8, %v4802_v50, %v4804_v47  ;;  %v4247_v20 = vrot.slane %v4245_v59, 2  ;;  %v7105_v52 = vld [vmem:[%s6473_s9 + $0x68] sm:$0xff]   ;;  %v6359_v54 = vld [vmem:[%s6473_s9 + $0x80] sm:$0xff]  }
 0x119   : > { %v5899_v27 = vpop.f32.mrb[26].mxu0  ;;  %v1292_v33 = vld [vmem:[#allocation2 + $0x30] sm:$0xff]  ;;  %v1222_v34 = vadd.f32 %v1103_v26, %v671_v25  ;;  %v5865_v36 = vpop.f32.mrb[26].mxu1  ;;  %v676_v25 = vld [vmem:[#allocation2 + $0x68] sm:$0xff] }
 0x11a   : > { %v1602_v55 = vpop.f32.mrb[27].mxu0  ;;  %1260 = vst.msk [vmem:[#allocation2 + $0x50] sm:$0xff] %vm626_vm6, %v1224_v24  ;;  %v1732_v31 = vadd.f32 %v5898_v17, %v1292_v33  ;;  %v1290_v41 = vld [vmem:[#allocation2 + $0x20] sm:$0xff]  ;;  %v1225_v42 = vadd.f32 %v5865_v36, %v674_v35  ;;  %v1106_v44 = vpop.f32.mrb[27].mxu1  ;;  %v4806_v35 = vrot.slane %v7061_v3, 3  ;;  %v4808_v36 = vrot.slane %v7064_v4, 3 }
 0x11b   : > { %1258 = vst.msk [vmem:[#allocation2 + $0x40] sm:$0xff] %vm626_vm6, %v1222_v34  ;;  %v1730_v37 = vadd.f32 %v1599_v21, %v1290_v41  ;;  %v1293_v15 = vld [vmem:[#allocation2 + $0x38] sm:$0xff]  ;;  %v1223_v48 = vadd.f32 %v1106_v44, %v672_v43  ;;  %v4250_v21 = vrot.slane %v4248_v58, 3  ;;  %v681_v43 = vld [vmem:[#allocation2 + $0x90] sm:$0xff] }
 0x11c   : > { %6125 = vmatmul.mubr.msk.bf16.gmra.mrb[132].mxu0 %vm390_vm1, %v4799_v28  ;;  %1768 = vst.msk [vmem:[#allocation2 + $0x30] sm:$0xff] %vm626_vm6, %v1732_v31  ;;  %1261 = vst.msk [vmem:[#allocation2 + $0x58] sm:$0xff] %vm626_vm6, %v1225_v42  ;;  %v1733_v57 = vadd.f32 %v5899_v27, %v1293_v15  ;;  %v1291_v51 = vld [vmem:[#allocation2 + $0x28] sm:$0xff]  ;;  %6091 = vmatmul.mubr.msk.bf16.gmra.mrb[132].mxu1 %vm390_vm1, %v4207_v38  ;;  %v4234_v27 = vsel %vm4145_vm7, %v4224_v53, %v7054_v61  ;;  %v6357_v28 = vld [vmem:[%s6473_s9 + $0x78] sm:$0xff]  }
 0x11d   : > { %6128 = vmatprep.mubr.msk.bf16.mxu0 %vm390_vm1, %v4801_v12  ;;  %1766 = vst.msk [vmem:[#allocation2 + $0x20] sm:$0xff] %vm626_vm6, %v1730_v37  ;;  %1259 = vst.msk [vmem:[#allocation2 + $0x48] sm:$0xff] %vm626_vm6, %v1223_v48  ;;  %v1731_v56 = vadd.f32 %v1602_v55, %v1291_v51  ;;  %6094 = vmatprep.mubr.msk.bf16.mxu1 %vm390_vm1, %v4216_v39  ;;  %v4254_v55 = vshrl.u32 %v7069_v10, 16  ;;  %v4242_v39 = vor.u32 %v4241_v9, %v4238_v8  ;;  %v679_v15 = vld [vmem:[#allocation2 + $0x80] sm:$0xff]  ;;  %v682_v58 = vld [vmem:[#allocation2 + $0x98] sm:$0xff] }
 0x11e   : > { %1769 = vst.msk [vmem:[#allocation2 + $0x38] sm:$0xff] %vm626_vm6, %v1733_v57  ;;  %v7090_v12 = vor.u32 %v4250_v21, %v4247_v20  ;;  %v4263_v41 = vshrl.u32 %v6357_v28, 16  ;;  %v4266_v42 = vshll.u32 %v6357_v28, 16  ;;  %v4807_v57 = vsel %vm4790_vm8, %v4804_v47, %v4806_v35 }
 0x11f   : > { %v5902_v60 = vpop.f32.mrb[28].mxu0  ;;  %1767 = vst.msk [vmem:[#allocation2 + $0x28] sm:$0xff] %vm626_vm6, %v1731_v56  ;;  %v5868_v0 = vpop.f32.mrb[28].mxu1  ;;  %v4809_v51 = vsel %vm4790_vm8, %v4806_v35, %v4808_v36  ;;  %v4256_v53 = vrot.slane %v4254_v55, 2  ;;  %v4259_v47 = vrot.slane %v4257_v40, 3  ;;  %v7140_v40 = vld [vmem:[%s6473_s9 + $0x78] sm:$0xff]  }
 0x120   : > { %v1615_v1 = vpop.f32.mrb[29].mxu0  ;;  %v1228_v14 = vadd.f32 %v5868_v0, %v677_v63  ;;  %v1119_v5 = vpop.f32.mrb[29].mxu1  ;;  %v4243_v0 = vsel %vm4145_vm7, %v7054_v61, %v4242_v39  ;;  %v4252_v23 = vsel %vm4145_vm7, %v4242_v39, %v7090_v12  ;;  %v4810_v61 = vrot.slane %v7096_v46, 3 }
 0x121   : > { %v5903_v6 = vpop.f32.mrb[30].mxu0  ;;  %v1296_v17 = vld [vmem:[#allocation2 + $0x50] sm:$0xff]  ;;  %v1226_v49 = vadd.f32 %v1119_v5, %v675_v62  ;;  %v5869_v16 = vpop.f32.mrb[30].mxu1  ;;  %v680_v62 = vld [vmem:[#allocation2 + $0x88] sm:$0xff]  ;;  %v4260_v20 = vor.u32 %v4259_v47, %v4256_v53 }
 0x122   : > { %v1618_v11 = vpop.f32.mrb[31].mxu0  ;;  %1264 = vst.msk [vmem:[#allocation2 + $0x70] sm:$0xff] %vm626_vm6, %v1228_v14  ;;  %v1736_v22 = vadd.f32 %v5902_v60, %v1296_v17  ;;  %v1294_v13 = vld [vmem:[#allocation2 + $0x40] sm:$0xff]  ;;  %v1229_v24 = vadd.f32 %v5869_v16, %v678_v18  ;;  %v1122_v26 = vpop.f32.mrb[31].mxu1  ;;  %v4812_v18 = vrot.slane %v7105_v52, 3  ;;  %v4272_v16 = vshrl.u32 %v6359_v54, 16 }
 0x123   : > { %1262 = vst.msk [vmem:[#allocation2 + $0x60] sm:$0xff] %vm626_vm6, %v1226_v49  ;;  %v1734_v29 = vadd.f32 %v1615_v1, %v1294_v13  ;;  %v1297_v30 = vld [vmem:[#allocation2 + $0x58] sm:$0xff]  ;;  %v1227_v32 = vadd.f32 %v1122_v26, %v676_v25  ;;  %v6361_v1 = vld [vmem:[%s6473_s9 + $0x88] sm:$0xff]   ;;  %v685_v25 = vld [vmem:[#allocation2 + $0xb0] sm:$0xff]  ;;  %v4811_v28 = vsel %vm4790_vm8, %v4808_v36, %v4810_v61 }
 0x124   : > { %6129 = vmatmul.mubr.msk.bf16.gmra.mrb[136].mxu0 %vm390_vm1, %v4803_v2  ;;  %1772 = vst.msk [vmem:[#allocation2 + $0x50] sm:$0xff] %vm626_vm6, %v1736_v22  ;;  %1265 = vst.msk [vmem:[#allocation2 + $0x78] sm:$0xff] %vm626_vm6, %v1229_v24  ;;  %v1737_v33 = vadd.f32 %v5903_v6, %v1297_v30  ;;  %v1295_v34 = vld [vmem:[#allocation2 + $0x48] sm:$0xff]  ;;  %6095 = vmatmul.mubr.msk.bf16.gmra.mrb[136].mxu1 %vm390_vm1, %v4225_v7  ;;  %v4265_v6 = vrot.slane %v4263_v41, 2  ;;  %v4268_v7 = vrot.slane %v4266_v42, 3  ;;  %v4281_v21 = vshrl.u32 %v6361_v1, 16 }
 0x125   : > { %6132 = vmatprep.mubr.msk.bf16.mxu0 %vm390_vm1, %v4805_v19  ;;  %1770 = vst.msk [vmem:[#allocation2 + $0x40] sm:$0xff] %vm626_vm6, %v1734_v29  ;;  %1263 = vst.msk [vmem:[#allocation2 + $0x68] sm:$0xff] %vm626_vm6, %v1227_v32  ;;  %v1735_v38 = vadd.f32 %v1618_v11, %v1295_v34  ;;  %6098 = vmatprep.mubr.msk.bf16.mxu1 %vm390_vm1, %v4234_v27  ;;  %v4275_v11 = vshll.u32 %v6359_v54, 16  ;;  %v4284_v22 = vshll.u32 %v6361_v1, 16  ;;  %v7133_v29 = vld [vmem:[%s6473_s9 + $0x70] sm:$0xff]   ;;  %v686_v41 = vld [vmem:[#allocation2 + $0xb8] sm:$0xff] }
 0x126   : > { %1773 = vst.msk [vmem:[#allocation2 + $0x58] sm:$0xff] %vm626_vm6, %v1737_v33  ;;  %v7126_v24 = vor.u32 %v4268_v7, %v4265_v6  ;;  %v6363_v30 = vld [vmem:[%s6473_s9 + $0x90] sm:$0xff]   ;;  %v683_v33 = vld [vmem:[#allocation2 + $0xa0] sm:$0xff]  ;;  %v4813_v55 = vsel %vm4790_vm8, %v4810_v61, %v4812_v18  ;;  %v4816_v1 = vrot.slane %v7140_v40, 3  ;;  %v692_v40 = vld [vmem:[#allocation2 + $0xe8] sm:$0xff] }
 0x127   : > { %v5906_v31 = vpop.f32.mrb[32].mxu0  ;;  %1771 = vst.msk [vmem:[#allocation2 + $0x48] sm:$0xff] %vm626_vm6, %v1735_v38  ;;  %v5872_v44 = vpop.f32.mrb[32].mxu1  ;;  %v4274_v38 = vrot.slane %v4272_v16, 2  ;;  %v4277_v39 = vrot.slane %v4275_v11, 3  ;;  %v687_v61 = vld [vmem:[#allocation2 + $0xc0] sm:$0xff] }
 0x128   : > { %v1631_v45 = vpop.f32.mrb[33].mxu0  ;;  %v1232_v37 = vadd.f32 %v5872_v44, %v681_v43  ;;  %v1135_v48 = vpop.f32.mrb[33].mxu1  ;;  %v4261_v43 = vsel %vm4145_vm7, %v7090_v12, %v4260_v20  ;;  %v4283_v44 = vrot.slane %v4281_v21, 2  ;;  %v4290_v12 = vshrl.u32 %v6363_v30, 16  ;;  %v690_v21 = vld [vmem:[#allocation2 + $0xd8] sm:$0xff] }
 0x129   : > { %v5907_v50 = vpop.f32.mrb[34].mxu0  ;;  %v1300_v56 = vld [vmem:[#allocation2 + $0x70] sm:$0xff]  ;;  %v1230_v59 = vadd.f32 %v1135_v48, %v679_v15  ;;  %v5873_v60 = vpop.f32.mrb[34].mxu1  ;;  %v684_v48 = vld [vmem:[#allocation2 + $0xa8] sm:$0xff] }
 0x12a   : > { %v1634_v63 = vpop.f32.mrb[35].mxu0  ;;  %1268 = vst.msk [vmem:[#allocation2 + $0x90] sm:$0xff] %vm626_vm6, %v1232_v37  ;;  %v1740_v2 = vadd.f32 %v5906_v31, %v1300_v56  ;;  %v1298_v3 = vld [vmem:[#allocation2 + $0x60] sm:$0xff]  ;;  %v1233_v14 = vadd.f32 %v5873_v60, %v682_v58  ;;  %v1138_v5 = vpop.f32.mrb[35].mxu1  ;;  %v4292_v7 = vrot.slane %v4290_v12, 2  ;;  %v7203_v12 = vld [vmem:[%s6473_s9 + $0x98] sm:$0xff]  }
 0x12b   : > { %1266 = vst.msk [vmem:[#allocation2 + $0x80] sm:$0xff] %vm626_vm6, %v1230_v59  ;;  %v1738_v8 = vadd.f32 %v1631_v45, %v1298_v3  ;;  %v1301_v9 = vld [vmem:[#allocation2 + $0x78] sm:$0xff]  ;;  %v1231_v10 = vadd.f32 %v1138_v5, %v680_v62  ;;  %v4286_v45 = vrot.slane %v4284_v22, 3  ;;  %v4293_v59 = vshll.u32 %v6363_v30, 16  ;;  %v689_v62 = vld [vmem:[#allocation2 + $0xd0] sm:$0xff]  ;;  %v688_v30 = vld [vmem:[#allocation2 + $0xc8] sm:$0xff] }
 0x12c   : > { %6133 = vmatmul.mubr.msk.bf16.gmra.mrb[140].mxu0 %vm390_vm1, %v4807_v57  ;;  %1776 = vst.msk [vmem:[#allocation2 + $0x70] sm:$0xff] %vm626_vm6, %v1740_v2  ;;  %1269 = vst.msk [vmem:[#allocation2 + $0x98] sm:$0xff] %vm626_vm6, %v1233_v14  ;;  %v1741_v17 = vadd.f32 %v5907_v50, %v1301_v9  ;;  %v1299_v49 = vld [vmem:[#allocation2 + $0x68] sm:$0xff]  ;;  %6099 = vmatmul.mubr.msk.bf16.gmra.mrb[140].mxu1 %vm390_vm1, %v4243_v0  ;;  %v4270_v57 = vsel %vm4145_vm7, %v4260_v20, %v7126_v24  ;;  %v7164_v9 = vld [vmem:[%s6473_s9 + $0x80] sm:$0xff]  }
 0x12d   : > { %6136 = vmatprep.mubr.msk.bf16.mxu0 %vm390_vm1, %v4809_v51  ;;  %1774 = vst.msk [vmem:[#allocation2 + $0x60] sm:$0xff] %vm626_vm6, %v1738_v8  ;;  %1267 = vst.msk [vmem:[#allocation2 + $0x88] sm:$0xff] %vm626_vm6, %v1231_v10  ;;  %v1739_v19 = vadd.f32 %v1634_v63, %v1299_v49  ;;  %6102 = vmatprep.mubr.msk.bf16.mxu1 %vm390_vm1, %v4252_v23  ;;  %v6365_v51 = vld [vmem:[%s6473_s9 + $0x98] sm:$0xff]   ;;  %v4814_v63 = vrot.slane %v7133_v29, 3  ;;  %v4278_v23 = vor.u32 %v4277_v39, %v4274_v38 }
 0x12e   : > { %1777 = vst.msk [vmem:[#allocation2 + $0x78] sm:$0xff] %vm626_vm6, %v1741_v17  ;;  %v7158_v47 = vor.u32 %v4286_v45, %v4283_v44  ;;  %v4299_v3 = vshrl.u32 %v6365_v51, 16  ;;  %v4302_v14 = vshll.u32 %v6365_v51, 16  ;;  %v4295_v8 = vrot.slane %v4293_v59, 3 }
 0x12f   : > { %v5910_v13 = vpop.f32.mrb[36].mxu0  ;;  %1775 = vst.msk [vmem:[#allocation2 + $0x68] sm:$0xff] %vm626_vm6, %v1739_v19  ;;  %v5876_v26 = vpop.f32.mrb[36].mxu1  ;;  %v4815_v16 = vsel %vm4790_vm8, %v4812_v18, %v4814_v63  ;;  %v6367_v11 = vld [vmem:[%s6473_s9 + $0xa0] ss:$0 sps:$4 sm:$0x77]  }
 0x130   : > { %v1647_v27 = vpop.f32.mrb[37].mxu0  ;;  %v1236_v32 = vadd.f32 %v5876_v26, %v685_v25  ;;  %v1151_v34 = vpop.f32.mrb[37].mxu1  ;;  %v4279_v25 = vsel %vm4145_vm7, %v7126_v24, %v4278_v23  ;;  %v4288_v26 = vsel %vm4145_vm7, %v4278_v23, %v7158_v47 }
 0x131   : > { %v5911_v35 = vpop.f32.mrb[38].mxu0  ;;  %v1304_v31 = vld [vmem:[#allocation2 + $0x90] sm:$0xff]  ;;  %v1234_v4 = vadd.f32 %v1151_v34, %v683_v33  ;;  %v5877_v36 = vpop.f32.mrb[38].mxu1  ;;  %v4301_v33 = vrot.slane %v4299_v3, 2  ;;  %v4304_v34 = vrot.slane %v4302_v14, 3 }
 0x132   : > { %v1650_v42 = vpop.f32.mrb[39].mxu0  ;;  %1272 = vst.msk [vmem:[#allocation2 + $0xb0] sm:$0xff] %vm626_vm6, %v1236_v32  ;;  %v1744_v46 = vadd.f32 %v5910_v13, %v1304_v31  ;;  %v1302_v37 = vld [vmem:[#allocation2 + $0x80] sm:$0xff]  ;;  %v1237_v15 = vadd.f32 %v5877_v36, %v686_v41  ;;  %v1154_v50 = vpop.f32.mrb[39].mxu1  ;;  %v4296_v31 = vor.u32 %v4295_v8, %v4292_v7 }
 0x133   : > { %1270 = vst.msk [vmem:[#allocation2 + $0xa0] sm:$0xff] %vm626_vm6, %v1234_v4  ;;  %v1742_v53 = vadd.f32 %v1647_v27, %v1302_v37  ;;  %v1305_v54 = vld [vmem:[#allocation2 + $0x98] sm:$0xff]  ;;  %v1235_v56 = vadd.f32 %v1154_v50, %v684_v48  ;;  %v4817_v27 = vsel %vm4790_vm8, %v4814_v63, %v4816_v1  ;;  %v4818_v4 = vrot.slane %v7164_v9, 3  ;;  %v691_v50 = vld [vmem:[#allocation2 + $0xe0] sm:$0xff] }
 0x134   : > { %6137 = vmatmul.mubr.msk.bf16.gmra.mrb[144].mxu0 %vm390_vm1, %v4811_v28  ;;  %1780 = vst.msk [vmem:[#allocation2 + $0x90] sm:$0xff] %vm626_vm6, %v1744_v46  ;;  %1273 = vst.msk [vmem:[#allocation2 + $0xb8] sm:$0xff] %vm626_vm6, %v1237_v15  ;;  %v1745_v58 = vadd.f32 %v5911_v35, %v1305_v54  ;;  %v1303_v60 = vld [vmem:[#allocation2 + $0x88] sm:$0xff]  ;;  %6103 = vmatmul.mubr.msk.bf16.gmra.mrb[144].mxu1 %vm390_vm1, %v4261_v43  ;;  %v4311_v43 = vshll.u32 %v6367_v11, 16  ;;  %v7193_v45 = vor.u32 %v4304_v34, %v4301_v33  ;;  %v693_v46 = vld [vmem:[#allocation2 + $0xf0] sm:$0xff] }
 0x135   : > { %6140 = vmatprep.mubr.msk.bf16.mxu0 %vm390_vm1, %v4813_v55  ;;  %1778 = vst.msk [vmem:[#allocation2 + $0x80] sm:$0xff] %vm626_vm6, %v1742_v53  ;;  %1271 = vst.msk [vmem:[#allocation2 + $0xa8] sm:$0xff] %vm626_vm6, %v1235_v56  ;;  %v1743_v0 = vadd.f32 %v1650_v42, %v1303_v60  ;;  %6106 = vmatprep.mubr.msk.bf16.mxu1 %vm390_vm1, %v4270_v57  ;;  %v7178_v28 = vld [vmem:[%s6473_s9 + $0x88] sm:$0xff]   ;;  %v4308_v42 = vshrl.u32 %v6367_v11, 16  ;;  %v4297_v53 = vsel %vm4145_vm7, %v7158_v47, %v4296_v31  ;;  %v6368_v56 = vld [vmem:[%s6473_s9 + $0x90] sm:$0xff]  }
 0x136   : > { %1781 = vst.msk [vmem:[#allocation2 + $0x98] sm:$0xff] %vm626_vm6, %v1745_v58  ;;  %v4820_v36 = vrot.slane %v7178_v28, 3  ;;  %v4819_v54 = vsel %vm4790_vm8, %v4816_v1, %v4818_v4  ;;  %v694_v60 = vld [vmem:[#allocation2 + $0xf8] sm:$0xff]  ;;  %v4313_v3 = vrot.slane %v4311_v43, 3  ;;  %v4306_v1 = vsel %vm4145_vm7, %v4296_v31, %v7193_v45 }
 0x137   : > { %v5914_v2 = vpop.f32.mrb[40].mxu0  ;;  %1779 = vst.msk [vmem:[#allocation2 + $0x88] sm:$0xff] %vm626_vm6, %v1743_v0  ;;  %v5880_v5 = vpop.f32.mrb[40].mxu1  ;;  %v6370_v28 = vld [vmem:[%s6473_s9 + $0xa0] ss:$0 sps:$4 sm:$0x77]  }
 0x138   : > { %v1663_v6 = vpop.f32.mrb[41].mxu0  ;;  %v1240_v10 = vadd.f32 %v5880_v5, %v689_v62  ;;  %v1167_v17 = vpop.f32.mrb[41].mxu1  ;;  %v4821_v23 = vsel %vm4790_vm8, %v4818_v4, %v4820_v36  ;;  %v4826_v43 = vrot.slane %v6370_v28, 3 }
 0x139   : > { %v5915_v49 = vpop.f32.mrb[42].mxu0  ;;  %v1308_v19 = vld [vmem:[#allocation2 + $0xb0] sm:$0xff]  ;;  %v1238_v20 = vadd.f32 %v1167_v17, %v687_v61  ;;  %v5881_v22 = vpop.f32.mrb[42].mxu1  ;;  %v4822_v61 = vrot.slane %v6368_v56, 3 }
 0x13a   : > { %v1666_v13 = vpop.f32.mrb[43].mxu0  ;;  %1276 = vst.msk [vmem:[#allocation2 + $0xd0] sm:$0xff] %vm626_vm6, %v1240_v10  ;;  %v1748_v52 = vadd.f32 %v5914_v2, %v1308_v19  ;;  %v1306_v18 = vld [vmem:[#allocation2 + $0xa0] sm:$0xff]  ;;  %v1241_v29 = vadd.f32 %v5881_v22, %v690_v21  ;;  %v1170_v32 = vpop.f32.mrb[43].mxu1  ;;  %v4310_v2 = vrot.slane %v4308_v42, 2  ;;  %v697_v19 = vld [vmem:[#allocation2 + $0x110] sm:$0xff] }
 0x13b   : > { %1274 = vst.msk [vmem:[#allocation2 + $0xc0] sm:$0xff] %vm626_vm6, %v1238_v20  ;;  %v1746_v24 = vadd.f32 %v1663_v6, %v1306_v18  ;;  %v1309_v35 = vld [vmem:[#allocation2 + $0xb8] sm:$0xff]  ;;  %v1239_v55 = vadd.f32 %v1170_v32, %v688_v30 }
 0x13c   : > { %6141 = vmatmul.mubr.msk.bf16.gmra.mrb[148].mxu0 %vm390_vm1, %v4815_v16  ;;  %1784 = vst.msk [vmem:[#allocation2 + $0xb0] sm:$0xff] %vm626_vm6, %v1748_v52  ;;  %1277 = vst.msk [vmem:[#allocation2 + $0xd8] sm:$0xff] %vm626_vm6, %v1241_v29  ;;  %v1749_v38 = vadd.f32 %v5915_v49, %v1309_v35  ;;  %v1307_v39 = vld [vmem:[#allocation2 + $0xa8] sm:$0xff]  ;;  %6107 = vmatmul.mubr.msk.bf16.gmra.mrb[148].mxu1 %vm390_vm1, %v4279_v25  ;;  %v4314_v49 = vor.u32 %v4313_v3, %v4310_v2  ;;  %v4824_v16 = vrot.slane %v7203_v12, 3  ;;  %v698_v29 = vld [vmem:[#allocation2 + $0x118] sm:$0xff] }
 0x13d   : > { %6144 = vmatprep.mubr.msk.bf16.mxu0 %vm390_vm1, %v4817_v27  ;;  %1782 = vst.msk [vmem:[#allocation2 + $0xa0] sm:$0xff] %vm626_vm6, %v1746_v24  ;;  %1275 = vst.msk [vmem:[#allocation2 + $0xc8] sm:$0xff] %vm626_vm6, %v1239_v55  ;;  %v1747_v41 = vadd.f32 %v1666_v13, %v1307_v39  ;;  %6110 = vmatprep.mubr.msk.bf16.mxu1 %vm390_vm1, %v4288_v26  ;;  %v695_v13 = vld [vmem:[#allocation2 + $0x100] sm:$0xff]  ;;  %v4823_v27 = vsel %vm4790_vm8, %v4820_v36, %v4822_v61  ;;  %v1801_v12 = vld [vmem:[#allocation2 + $0x18] sm:$0xff] }
 0x13e   : > { %1785 = vst.msk [vmem:[#allocation2 + $0xb8] sm:$0xff] %vm626_vm6, %v1749_v38  ;;  %v4315_v33 = vsel %vm4145_vm7, %v7193_v45, %v4314_v49  ;;  %v4825_v34 = vsel %vm4790_vm8, %v4822_v61, %v4824_v16  ;;  %v696_v38 = vld [vmem:[#allocation2 + $0x108] sm:$0xff] }
 0x13f   : > { %v5918_v44 = vpop.f32.mrb[44].mxu0  ;;  %1783 = vst.msk [vmem:[#allocation2 + $0xa8] sm:$0xff] %vm626_vm6, %v1747_v41  ;;  %v5884_v37 = vpop.f32.mrb[44].mxu1 }
 0x140   : > { %v1679_v15 = vpop.f32.mrb[45].mxu0  ;;  %v1244_v48 = vadd.f32 %v5884_v37, %v693_v46  ;;  %v1183_v57 = vpop.f32.mrb[45].mxu1  ;;  %v1800_v46 = vld [vmem:[#allocation2 + $0x10] sm:$0xff] }
 0x141   : > { %v5919_v51 = vpop.f32.mrb[46].mxu0  ;;  %v1312_v59 = vld [vmem:[#allocation2 + $0xd0] sm:$0xff]  ;;  %v1242_v58 = vadd.f32 %v1183_v57, %v691_v50  ;;  %v5885_v63 = vpop.f32.mrb[46].mxu1  ;;  %v1798_v50 = vld [vmem:[#allocation2] sm:$0xff] }
 0x142   : > { %v1682_v0 = vpop.f32.mrb[47].mxu0  ;;  %1280 = vst.msk [vmem:[#allocation2 + $0xf0] sm:$0xff] %vm626_vm6, %v1244_v48  ;;  %v1752_v14 = vadd.f32 %v5918_v44, %v1312_v59  ;;  %v1310_v47 = vld [vmem:[#allocation2 + $0xc0] sm:$0xff]  ;;  %v1245_v62 = vadd.f32 %v5885_v63, %v694_v60  ;;  %v1186_v5 = vpop.f32.mrb[47].mxu1 }
 0x143   : > { %1278 = vst.msk [vmem:[#allocation2 + $0xe0] sm:$0xff] %vm626_vm6, %v1242_v58  ;;  %v1750_v6 = vadd.f32 %v1679_v15, %v1310_v47  ;;  %v1313_v7 = vld [vmem:[#allocation2 + $0xd8] sm:$0xff]  ;;  %v1243_v8 = vadd.f32 %v1186_v5, %v692_v40 }
 0x144   : > { %6145 = vmatmul.mubr.msk.bf16.gmra.mrb[152].mxu0 %vm390_vm1, %v4819_v54  ;;  %1788 = vst.msk [vmem:[#allocation2 + $0xd0] sm:$0xff] %vm626_vm6, %v1752_v14  ;;  %1281 = vst.msk [vmem:[#allocation2 + $0xf8] sm:$0xff] %vm626_vm6, %v1245_v62  ;;  %v1753_v9 = vadd.f32 %v5919_v51, %v1313_v7  ;;  %v1311_v10 = vld [vmem:[#allocation2 + $0xc8] sm:$0xff]  ;;  %6111 = vmatmul.mubr.msk.bf16.gmra.mrb[152].mxu1 %vm390_vm1, %v4297_v53  ;;  %v4827_v53 = vsel %vm4790_vm8, %v4824_v16, %v4826_v43 }
 0x145   : > { %6148 = vmatprep.mubr.msk.bf16.mxu0 %vm390_vm1, %v4821_v23  ;;  %1786 = vst.msk [vmem:[#allocation2 + $0xc0] sm:$0xff] %vm626_vm6, %v1750_v6  ;;  %1279 = vst.msk [vmem:[#allocation2 + $0xe8] sm:$0xff] %vm626_vm6, %v1243_v8  ;;  %v1751_v17 = vadd.f32 %v1682_v0, %v1311_v10  ;;  %6114 = vmatprep.mubr.msk.bf16.mxu1 %vm390_vm1, %v4306_v1  ;;  %v1799_v23 = vld [vmem:[#allocation2 + $0x8] sm:$0xff]  ;;  %v1804_v6 = vld [vmem:[#allocation2 + $0x30] sm:$0xff] }
 0x146   : > { %1789 = vst.msk [vmem:[#allocation2 + $0xd8] sm:$0xff] %vm626_vm6, %v1753_v9  ;;  %v1802_v10 = vld [vmem:[#allocation2 + $0x20] sm:$0xff] }
 0x147   : > { %v5922_v11 = vpop.f32.mrb[48].mxu0  ;;  %1787 = vst.msk [vmem:[#allocation2 + $0xc8] sm:$0xff] %vm626_vm6, %v1751_v17  ;;  %v5888_v20 = vpop.f32.mrb[48].mxu1 }
 0x148   : > { %v1695_v21 = vpop.f32.mrb[49].mxu0  ;;  %v1248_v22 = vadd.f32 %v5888_v20, %v697_v19  ;;  %v1199_v25 = vpop.f32.mrb[49].mxu1 }
 0x149   : > { %v5923_v26 = vpop.f32.mrb[50].mxu0  ;;  %v1316_v52 = vld [vmem:[#allocation2 + $0xf0] sm:$0xff]  ;;  %v1246_v18 = vadd.f32 %v1199_v25, %v695_v13  ;;  %v5889_v30 = vpop.f32.mrb[50].mxu1  ;;  %v1803_v25 = vld [vmem:[#allocation2 + $0x28] sm:$0xff] }
 0x14a   : > { %v1698_v32 = vpop.f32.mrb[51].mxu0  ;;  %1284 = vst.msk [vmem:[#allocation2 + $0x110] sm:$0xff] %vm626_vm6, %v1248_v22  ;;  %v1756_v24 = vadd.f32 %v5922_v11, %v1316_v52  ;;  %v1314_v35 = vld [vmem:[#allocation2 + $0xe0] sm:$0xff]  ;;  %v1249_v55 = vadd.f32 %v5889_v30, %v698_v29  ;;  %v1202_v39 = vpop.f32.mrb[51].mxu1  ;;  %v1805_v11 = vld [vmem:[#allocation2 + $0x38] sm:$0xff] }
 0x14b   : > { %1282 = vst.msk [vmem:[#allocation2 + $0x100] sm:$0xff] %vm626_vm6, %v1246_v18  ;;  %v1754_v31 = vadd.f32 %v1695_v21, %v1314_v35  ;;  %v1317_v4 = vld [vmem:[#allocation2 + $0xf8] sm:$0xff]  ;;  %v1247_v41 = vadd.f32 %v1202_v39, %v696_v38 }
 0x14c   : > { %6149 = vmatmul.mubr.msk.bf16.gmra.mrb[156].mxu0 %vm390_vm1, %v4823_v27  ;;  %1792 = vst.msk [vmem:[#allocation2 + $0xf0] sm:$0xff] %vm626_vm6, %v1756_v24  ;;  %1285 = vst.msk [vmem:[#allocation2 + $0x118] sm:$0xff] %vm626_vm6, %v1249_v55  ;;  %v1757_v36 = vadd.f32 %v5923_v26, %v1317_v4  ;;  %v1315_v42 = vld [vmem:[#allocation2 + $0xe8] sm:$0xff]  ;;  %6115 = vmatmul.mubr.msk.bf16.gmra.mrb[156].mxu1 %vm390_vm1, %v4315_v33  ;;  %v1808_v33 = vld [vmem:[#allocation2 + $0x50] sm:$0xff] }
 0x14d   : > { %6152 = vmatprep.mubr.msk.bf16.mxu0 %vm390_vm1, %v4825_v34  ;;  %1790 = vst.msk [vmem:[#allocation2 + $0xe0] sm:$0xff] %vm626_vm6, %v1754_v31  ;;  %1283 = vst.msk [vmem:[#allocation2 + $0x108] sm:$0xff] %vm626_vm6, %v1247_v41  ;;  %v1755_v44 = vadd.f32 %v1698_v32, %v1315_v42  ;;  %v1806_v55 = vld [vmem:[#allocation2 + $0x40] sm:$0xff]  ;;  %v1809_v41 = vld [vmem:[#allocation2 + $0x58] sm:$0xff] }
 0x14e   : > { %1793 = vst.msk [vmem:[#allocation2 + $0xf8] sm:$0xff] %vm626_vm6, %v1757_v36 }
 0x14f   : > { %v5926_v45 = vpop.f32.mrb[52].mxu0  ;;  %1791 = vst.msk [vmem:[#allocation2 + $0xe8] sm:$0xff] %vm626_vm6, %v1755_v44  ;;  %v5932_v37 = vpop.f32.mrb[52].mxu1 }
 0x150   : > { %v1711_v15 = vpop.f32.mrb[53].mxu0  ;;  %v2239_v48 = vadd.f32 %v5932_v37, %v1800_v46  ;;  %v2094_v57 = vpop.f32.mrb[53].mxu1  ;;  %v1807_v46 = vld [vmem:[#allocation2 + $0x48] sm:$0xff] }
 0x151   : > { %v5927_v51 = vpop.f32.mrb[54].mxu0  ;;  %v1320_v54 = vld [vmem:[#allocation2 + $0x110] sm:$0xff]  ;;  %v2237_v56 = vadd.f32 %v2094_v57, %v1798_v50  ;;  %v5933_v59 = vpop.f32.mrb[54].mxu1 }
 0x152   : > { %v1714_v58 = vpop.f32.mrb[55].mxu0  ;;  %v1760_v60 = vadd.f32 %v5926_v45, %v1320_v54  ;;  %2275 = vst.msk [vmem:[#allocation2 + $0x10] sm:$0xff] %vm626_vm6, %v2239_v48  ;;  %v1318_v63 = vld [vmem:[#allocation2 + $0x100] sm:$0xff]  ;;  %v2240_v0 = vadd.f32 %v5933_v59, %v1801_v12  ;;  %v2097_v2 = vpop.f32.mrb[55].mxu1 }
 0x153   : > { %v1758_v3 = vadd.f32 %v1711_v15, %v1318_v63  ;;  %2273 = vst.msk [vmem:[#allocation2] sm:$0xff] %vm626_vm6, %v2237_v56  ;;  %v1321_v14 = vld [vmem:[#allocation2 + $0x118] sm:$0xff]  ;;  %v2238_v47 = vadd.f32 %v2097_v2, %v1799_v23  ;;  %v1812_v56 = vld [vmem:[#allocation2 + $0x70] sm:$0xff] }
 0x154   : > { %6153 = vmatmul.mubr.msk.bf16.gmra.mrb[160].mxu0 %vm390_vm1, %v4827_v53  ;;  %1796 = vst.msk [vmem:[#allocation2 + $0x110] sm:$0xff] %vm626_vm6, %v1760_v60  ;;  %v1761_v62 = vadd.f32 %v5927_v51, %v1321_v14  ;;  %2276 = vst.msk [vmem:[#allocation2 + $0x18] sm:$0xff] %vm626_vm6, %v2240_v0  ;;  %v1319_v40 = vld [vmem:[#allocation2 + $0x108] sm:$0xff]  ;;  %v1810_v60 = vld [vmem:[#allocation2 + $0x60] sm:$0xff] }
 0x155   : > { %1794 = vst.msk [vmem:[#allocation2 + $0x100] sm:$0xff] %vm626_vm6, %v1758_v3  ;;  %v1759_v5 = vadd.f32 %v1714_v58, %v1319_v40  ;;  %2274 = vst.msk [vmem:[#allocation2 + $0x8] sm:$0xff] %vm626_vm6, %v2238_v47  ;;  %v1813_v3 = vld [vmem:[#allocation2 + $0x78] sm:$0xff] }
 0x156   : > { %1797 = vst.msk [vmem:[#allocation2 + $0x118] sm:$0xff] %vm626_vm6, %v1761_v62 }
 0x157   : > { %v5970_v1 = vpop.f32.mrb[56].mxu0  ;;  %1795 = vst.msk [vmem:[#allocation2 + $0x108] sm:$0xff] %vm626_vm6, %v1759_v5  ;;  %v5936_v7 = vpop.f32.mrb[56].mxu1 }
 0x158   : > { %v2739_v8 = vpop.f32.mrb[57].mxu0  ;;  %v2243_v9 = vadd.f32 %v5936_v7, %v1804_v6  ;;  %v2110_v61 = vpop.f32.mrb[57].mxu1 }
 0x159   : > { %v5971_v17 = vpop.f32.mrb[58].mxu0  ;;  %v2311_v49 = vld [vmem:[#allocation2 + $0x10] sm:$0xff]  ;;  %v2241_v16 = vadd.f32 %v2110_v61, %v1802_v10  ;;  %v5937_v19 = vpop.f32.mrb[58].mxu1 }
 0x15a   : > { %v2742_v20 = vpop.f32.mrb[59].mxu0  ;;  %2279 = vst.msk [vmem:[#allocation2 + $0x30] sm:$0xff] %vm626_vm6, %v2243_v9  ;;  %v2884_v21 = vadd.f32 %v5970_v1, %v2311_v49  ;;  %v2309_v22 = vld [vmem:[#allocation2] sm:$0xff]  ;;  %v2244_v13 = vadd.f32 %v5937_v19, %v1805_v11  ;;  %v2113_v26 = vpop.f32.mrb[59].mxu1  ;;  %v1811_v1 = vld [vmem:[#allocation2 + $0x68] sm:$0xff] }
 0x15b   : > { %2277 = vst.msk [vmem:[#allocation2 + $0x20] sm:$0xff] %vm626_vm6, %v2241_v16  ;;  %v2882_v27 = vadd.f32 %v2739_v8, %v2309_v22  ;;  %v2312_v28 = vld [vmem:[#allocation2 + $0x18] sm:$0xff]  ;;  %v2242_v52 = vadd.f32 %v2113_v26, %v1803_v25  ;;  %v1816_v16 = vld [vmem:[#allocation2 + $0x90] sm:$0xff] }
 0x15c   : > { %2920 = vst.msk [vmem:[#allocation2 + $0x10] sm:$0xff] %vm626_vm6, %v2884_v21  ;;  %2280 = vst.msk [vmem:[#allocation2 + $0x38] sm:$0xff] %vm626_vm6, %v2244_v13  ;;  %v2885_v18 = vadd.f32 %v5971_v17, %v2312_v28  ;;  %v2310_v29 = vld [vmem:[#allocation2 + $0x8] sm:$0xff]  ;;  %v1814_v21 = vld [vmem:[#allocation2 + $0x80] sm:$0xff] }
 0x15d   : > { %2918 = vst.msk [vmem:[#allocation2] sm:$0xff] %vm626_vm6, %v2882_v27  ;;  %2278 = vst.msk [vmem:[#allocation2 + $0x28] sm:$0xff] %vm626_vm6, %v2242_v52  ;;  %v2883_v30 = vadd.f32 %v2742_v20, %v2310_v29  ;;  %v1817_v27 = vld [vmem:[#allocation2 + $0x98] sm:$0xff] }
 0x15e   : > { %2921 = vst.msk [vmem:[#allocation2 + $0x18] sm:$0xff] %vm626_vm6, %v2885_v18 }
 0x15f   : > { %v5974_v32 = vpop.f32.mrb[60].mxu0  ;;  %2919 = vst.msk [vmem:[#allocation2 + $0x8] sm:$0xff] %vm626_vm6, %v2883_v30  ;;  %v5940_v34 = vpop.f32.mrb[60].mxu1 }
 0x160   : > { %v2755_v24 = vpop.f32.mrb[61].mxu0  ;;  %v2247_v35 = vadd.f32 %v5940_v34, %v1808_v33  ;;  %v2126_v38 = vpop.f32.mrb[61].mxu1 }
 0x161   : > { %v5975_v39 = vpop.f32.mrb[62].mxu0  ;;  %v2315_v31 = vld [vmem:[#allocation2 + $0x30] sm:$0xff]  ;;  %v2245_v4 = vadd.f32 %v2126_v38, %v1806_v55  ;;  %v5941_v36 = vpop.f32.mrb[62].mxu1 }
 0x162   : > { %v2758_v42 = vpop.f32.mrb[63].mxu0  ;;  %2283 = vst.msk [vmem:[#allocation2 + $0x50] sm:$0xff] %vm626_vm6, %v2247_v35  ;;  %v2888_v43 = vadd.f32 %v5974_v32, %v2315_v31  ;;  %v2313_v44 = vld [vmem:[#allocation2 + $0x20] sm:$0xff]  ;;  %v2248_v45 = vadd.f32 %v5941_v36, %v1809_v41  ;;  %v2129_v37 = vpop.f32.mrb[63].mxu1  ;;  %v1815_v32 = vld [vmem:[#allocation2 + $0x88] sm:$0xff] }
 0x163   : > { %2281 = vst.msk [vmem:[#allocation2 + $0x40] sm:$0xff] %vm626_vm6, %v2245_v4  ;;  %v2886_v15 = vadd.f32 %v2755_v24, %v2313_v44  ;;  %v2316_v48 = vld [vmem:[#allocation2 + $0x38] sm:$0xff]  ;;  %v2246_v50 = vadd.f32 %v2129_v37, %v1807_v46  ;;  %v1820_v4 = vld [vmem:[#allocation2 + $0xb0] sm:$0xff] }
 0x164   : > { %2924 = vst.msk [vmem:[#allocation2 + $0x30] sm:$0xff] %vm626_vm6, %v2888_v43  ;;  %2284 = vst.msk [vmem:[#allocation2 + $0x58] sm:$0xff] %vm626_vm6, %v2248_v45  ;;  %v2889_v57 = vadd.f32 %v5975_v39, %v2316_v48  ;;  %v2314_v51 = vld [vmem:[#allocation2 + $0x28] sm:$0xff]  ;;  %v1818_v43 = vld [vmem:[#allocation2 + $0xa0] sm:$0xff] }
 0x165   : > { %2922 = vst.msk [vmem:[#allocation2 + $0x20] sm:$0xff] %vm626_vm6, %v2886_v15  ;;  %2282 = vst.msk [vmem:[#allocation2 + $0x48] sm:$0xff] %vm626_vm6, %v2246_v50  ;;  %v2887_v53 = vadd.f32 %v2758_v42, %v2314_v51  ;;  %v1821_v15 = vld [vmem:[#allocation2 + $0xb8] sm:$0xff] }
 0x166   : > { %2925 = vst.msk [vmem:[#allocation2 + $0x38] sm:$0xff] %vm626_vm6, %v2889_v57 }
 0x167   : > { %v5978_v54 = vpop.f32.mrb[64].mxu0  ;;  %2923 = vst.msk [vmem:[#allocation2 + $0x28] sm:$0xff] %vm626_vm6, %v2887_v53  ;;  %v5944_v12 = vpop.f32.mrb[64].mxu1 }
 0x168   : > { %v2771_v59 = vpop.f32.mrb[65].mxu0  ;;  %v2251_v58 = vadd.f32 %v5944_v12, %v1812_v56  ;;  %v2142_v63 = vpop.f32.mrb[65].mxu1 }
 0x169   : > { %v5979_v0 = vpop.f32.mrb[66].mxu0  ;;  %v2319_v23 = vld [vmem:[#allocation2 + $0x50] sm:$0xff]  ;;  %v2249_v2 = vadd.f32 %v2142_v63, %v1810_v60  ;;  %v5945_v14 = vpop.f32.mrb[66].mxu1 }
 0x16a   : > { %v2774_v47 = vpop.f32.mrb[67].mxu0  ;;  %2287 = vst.msk [vmem:[#allocation2 + $0x70] sm:$0xff] %vm626_vm6, %v2251_v58  ;;  %v2892_v62 = vadd.f32 %v5978_v54, %v2319_v23  ;;  %v2317_v40 = vld [vmem:[#allocation2 + $0x40] sm:$0xff]  ;;  %v2252_v5 = vadd.f32 %v5945_v14, %v1813_v3  ;;  %v2145_v6 = vpop.f32.mrb[67].mxu1  ;;  %v1819_v54 = vld [vmem:[#allocation2 + $0xa8] sm:$0xff] }
 0x16b   : > { %2285 = vst.msk [vmem:[#allocation2 + $0x60] sm:$0xff] %vm626_vm6, %v2249_v2  ;;  %v2890_v7 = vadd.f32 %v2771_v59, %v2317_v40  ;;  %v2320_v8 = vld [vmem:[#allocation2 + $0x58] sm:$0xff]  ;;  %v2250_v9 = vadd.f32 %v2145_v6, %v1811_v1  ;;  %v1824_v2 = vld [vmem:[#allocation2 + $0xd0] sm:$0xff] }
 0x16c   : > { %2928 = vst.msk [vmem:[#allocation2 + $0x50] sm:$0xff] %vm626_vm6, %v2892_v62  ;;  %2288 = vst.msk [vmem:[#allocation2 + $0x78] sm:$0xff] %vm626_vm6, %v2252_v5  ;;  %v2893_v10 = vadd.f32 %v5979_v0, %v2320_v8  ;;  %v2318_v61 = vld [vmem:[#allocation2 + $0x48] sm:$0xff]  ;;  %v1822_v62 = vld [vmem:[#allocation2 + $0xc0] sm:$0xff] }
 0x16d   : > { %2926 = vst.msk [vmem:[#allocation2 + $0x40] sm:$0xff] %vm626_vm6, %v2890_v7  ;;  %2286 = vst.msk [vmem:[#allocation2 + $0x68] sm:$0xff] %vm626_vm6, %v2250_v9  ;;  %v2891_v17 = vadd.f32 %v2774_v47, %v2318_v61  ;;  %v1825_v7 = vld [vmem:[#allocation2 + $0xd8] sm:$0xff] }
 0x16e   : > { %2929 = vst.msk [vmem:[#allocation2 + $0x58] sm:$0xff] %vm626_vm6, %v2893_v10 }
 0x16f   : > { %v5982_v49 = vpop.f32.mrb[68].mxu0  ;;  %2927 = vst.msk [vmem:[#allocation2 + $0x48] sm:$0xff] %vm626_vm6, %v2891_v17  ;;  %v5948_v11 = vpop.f32.mrb[68].mxu1 }
 0x170   : > { %v2787_v19 = vpop.f32.mrb[69].mxu0  ;;  %v2255_v20 = vadd.f32 %v5948_v11, %v1816_v16  ;;  %v2158_v22 = vpop.f32.mrb[69].mxu1 }
 0x171   : > { %v5983_v13 = vpop.f32.mrb[70].mxu0  ;;  %v2323_v25 = vld [vmem:[#allocation2 + $0x70] sm:$0xff]  ;;  %v2253_v26 = vadd.f32 %v2158_v22, %v1814_v21  ;;  %v5949_v28 = vpop.f32.mrb[70].mxu1 }
 0x172   : > { %v2790_v52 = vpop.f32.mrb[71].mxu0  ;;  %2291 = vst.msk [vmem:[#allocation2 + $0x90] sm:$0xff] %vm626_vm6, %v2255_v20  ;;  %v2896_v18 = vadd.f32 %v5982_v49, %v2323_v25  ;;  %v2321_v29 = vld [vmem:[#allocation2 + $0x60] sm:$0xff]  ;;  %v2256_v30 = vadd.f32 %v5949_v28, %v1817_v27  ;;  %v2161_v33 = vpop.f32.mrb[71].mxu1  ;;  %v1823_v49 = vld [vmem:[#allocation2 + $0xc8] sm:$0xff] }
 0x173   : > { %2289 = vst.msk [vmem:[#allocation2 + $0x80] sm:$0xff] %vm626_vm6, %v2253_v26  ;;  %v2894_v34 = vadd.f32 %v2787_v19, %v2321_v29  ;;  %v2324_v24 = vld [vmem:[#allocation2 + $0x78] sm:$0xff]  ;;  %v2254_v35 = vadd.f32 %v2161_v33, %v1815_v32  ;;  %v1828_v26 = vld [vmem:[#allocation2 + $0xf0] sm:$0xff] }
 0x174   : > { %2932 = vst.msk [vmem:[#allocation2 + $0x70] sm:$0xff] %vm626_vm6, %v2896_v18  ;;  %2292 = vst.msk [vmem:[#allocation2 + $0x98] sm:$0xff] %vm626_vm6, %v2256_v30  ;;  %v2897_v55 = vadd.f32 %v5983_v13, %v2324_v24  ;;  %v2322_v38 = vld [vmem:[#allocation2 + $0x68] sm:$0xff]  ;;  %v1826_v18 = vld [vmem:[#allocation2 + $0xe0] sm:$0xff] }
 0x175   : > { %2930 = vst.msk [vmem:[#allocation2 + $0x60] sm:$0xff] %vm626_vm6, %v2894_v34  ;;  %2290 = vst.msk [vmem:[#allocation2 + $0x88] sm:$0xff] %vm626_vm6, %v2254_v35  ;;  %v2895_v39 = vadd.f32 %v2790_v52, %v2322_v38  ;;  %v1829_v34 = vld [vmem:[#allocation2 + $0xf8] sm:$0xff] }
 0x176   : > { %2933 = vst.msk [vmem:[#allocation2 + $0x78] sm:$0xff] %vm626_vm6, %v2897_v55 }
 0x177   : > { %v5986_v31 = vpop.f32.mrb[72].mxu0  ;;  %2931 = vst.msk [vmem:[#allocation2 + $0x68] sm:$0xff] %vm626_vm6, %v2895_v39  ;;  %v5952_v41 = vpop.f32.mrb[72].mxu1 }
 0x178   : > { %v2803_v36 = vpop.f32.mrb[73].mxu0  ;;  %v2259_v42 = vadd.f32 %v5952_v41, %v1820_v4  ;;  %v2174_v44 = vpop.f32.mrb[73].mxu1 }
 0x179   : > { %v5987_v45 = vpop.f32.mrb[74].mxu0  ;;  %v2327_v46 = vld [vmem:[#allocation2 + $0x90] sm:$0xff]  ;;  %v2257_v37 = vadd.f32 %v2174_v44, %v1818_v43  ;;  %v5953_v48 = vpop.f32.mrb[74].mxu1 }
 0x17a   : > { %v2806_v50 = vpop.f32.mrb[75].mxu0  ;;  %2295 = vst.msk [vmem:[#allocation2 + $0xb0] sm:$0xff] %vm626_vm6, %v2259_v42  ;;  %v2900_v57 = vadd.f32 %v5986_v31, %v2327_v46  ;;  %v2325_v51 = vld [vmem:[#allocation2 + $0x80] sm:$0xff]  ;;  %v2260_v53 = vadd.f32 %v5953_v48, %v1821_v15  ;;  %v2177_v56 = vpop.f32.mrb[75].mxu1  ;;  %v1827_v31 = vld [vmem:[#allocation2 + $0xe8] sm:$0xff] }
 0x17b   : > { %2293 = vst.msk [vmem:[#allocation2 + $0xa0] sm:$0xff] %vm626_vm6, %v2257_v37  ;;  %v2898_v12 = vadd.f32 %v2803_v36, %v2325_v51  ;;  %v2328_v59 = vld [vmem:[#allocation2 + $0x98] sm:$0xff]  ;;  %v2258_v58 = vadd.f32 %v2177_v56, %v1819_v54  ;;  %v1832_v37 = vld [vmem:[#allocation2 + $0x110] sm:$0xff] }
 0x17c   : > { %2936 = vst.msk [vmem:[#allocation2 + $0x90] sm:$0xff] %vm626_vm6, %v2900_v57  ;;  %2296 = vst.msk [vmem:[#allocation2 + $0xb8] sm:$0xff] %vm626_vm6, %v2260_v53  ;;  %v2901_v60 = vadd.f32 %v5987_v45, %v2328_v59  ;;  %v2326_v63 = vld [vmem:[#allocation2 + $0x88] sm:$0xff]  ;;  %v1830_v57 = vld [vmem:[#allocation2 + $0x100] sm:$0xff] }
 0x17d   : > { %2934 = vst.msk [vmem:[#allocation2 + $0x80] sm:$0xff] %vm626_vm6, %v2898_v12  ;;  %2294 = vst.msk [vmem:[#allocation2 + $0xa8] sm:$0xff] %vm626_vm6, %v2258_v58  ;;  %v2899_v0 = vadd.f32 %v2806_v50, %v2326_v63  ;;  %v1833_v12 = vld [vmem:[#allocation2 + $0x118] sm:$0xff] }
 0x17e   : > { %2937 = vst.msk [vmem:[#allocation2 + $0x98] sm:$0xff] %vm626_vm6, %v2901_v60 }
 0x17f   : > { %v5990_v23 = vpop.f32.mrb[76].mxu0  ;;  %2935 = vst.msk [vmem:[#allocation2 + $0x88] sm:$0xff] %vm626_vm6, %v2899_v0  ;;  %v5956_v3 = vpop.f32.mrb[76].mxu1 }
 0x180   : > { %v2819_v14 = vpop.f32.mrb[77].mxu0  ;;  %v2263_v47 = vadd.f32 %v5956_v3, %v1824_v2  ;;  %v2190_v40 = vpop.f32.mrb[77].mxu1 }
 0x181   : > { %v5991_v5 = vpop.f32.mrb[78].mxu0  ;;  %v2331_v1 = vld [vmem:[#allocation2 + $0xb0] sm:$0xff]  ;;  %v2261_v6 = vadd.f32 %v2190_v40, %v1822_v62  ;;  %v5957_v8 = vpop.f32.mrb[78].mxu1 }
 0x182   : > { %v2822_v9 = vpop.f32.mrb[79].mxu0  ;;  %2299 = vst.msk [vmem:[#allocation2 + $0xd0] sm:$0xff] %vm626_vm6, %v2263_v47  ;;  %v2904_v10 = vadd.f32 %v5990_v23, %v2331_v1  ;;  %v2329_v61 = vld [vmem:[#allocation2 + $0xa0] sm:$0xff]  ;;  %v2264_v17 = vadd.f32 %v5957_v8, %v1825_v7  ;;  %v2193_v16 = vpop.f32.mrb[79].mxu1  ;;  %v1831_v23 = vld [vmem:[#allocation2 + $0x108] sm:$0xff] }
 0x183   : > { %2297 = vst.msk [vmem:[#allocation2 + $0xc0] sm:$0xff] %vm626_vm6, %v2261_v6  ;;  %v2902_v11 = vadd.f32 %v2819_v14, %v2329_v61  ;;  %v2332_v19 = vld [vmem:[#allocation2 + $0xb8] sm:$0xff]  ;;  %v2262_v20 = vadd.f32 %v2193_v16, %v1823_v49  ;;  %v2956_v6 = vld [vmem:[#allocation2 + $0x10] sm:$0xff] }
 0x184   : > { %2940 = vst.msk [vmem:[#allocation2 + $0xb0] sm:$0xff] %vm626_vm6, %v2904_v10  ;;  %2300 = vst.msk [vmem:[#allocation2 + $0xd8] sm:$0xff] %vm626_vm6, %v2264_v17  ;;  %v2905_v21 = vadd.f32 %v5991_v5, %v2332_v19  ;;  %v2330_v22 = vld [vmem:[#allocation2 + $0xa8] sm:$0xff]  ;;  %v2954_v10 = vld [vmem:[#allocation2] sm:$0xff] }
 0x185   : > { %2938 = vst.msk [vmem:[#allocation2 + $0xa0] sm:$0xff] %vm626_vm6, %v2902_v11  ;;  %2298 = vst.msk [vmem:[#allocation2 + $0xc8] sm:$0xff] %vm626_vm6, %v2262_v20  ;;  %v2903_v13 = vadd.f32 %v2822_v9, %v2330_v22  ;;  %v2957_v11 = vld [vmem:[#allocation2 + $0x18] sm:$0xff] }
 0x186   : > { %2941 = vst.msk [vmem:[#allocation2 + $0xb8] sm:$0xff] %vm626_vm6, %v2905_v21 }
 0x187   : > { %v5994_v25 = vpop.f32.mrb[80].mxu0  ;;  %2939 = vst.msk [vmem:[#allocation2 + $0xa8] sm:$0xff] %vm626_vm6, %v2903_v13  ;;  %v5960_v27 = vpop.f32.mrb[80].mxu1 }
 0x188   : > { %v2835_v28 = vpop.f32.mrb[81].mxu0  ;;  %v2267_v52 = vadd.f32 %v5960_v27, %v1828_v26  ;;  %v2206_v29 = vpop.f32.mrb[81].mxu1 }
 0x189   : > { %v5995_v30 = vpop.f32.mrb[82].mxu0  ;;  %v2335_v32 = vld [vmem:[#allocation2 + $0xd0] sm:$0xff]  ;;  %v2265_v33 = vadd.f32 %v2206_v29, %v1826_v18  ;;  %v5961_v24 = vpop.f32.mrb[82].mxu1 }
 0x18a   : > { %v2838_v35 = vpop.f32.mrb[83].mxu0  ;;  %2303 = vst.msk [vmem:[#allocation2 + $0xf0] sm:$0xff] %vm626_vm6, %v2267_v52  ;;  %v2908_v55 = vadd.f32 %v5994_v25, %v2335_v32  ;;  %v2333_v38 = vld [vmem:[#allocation2 + $0xc0] sm:$0xff]  ;;  %v2268_v39 = vadd.f32 %v5961_v24, %v1829_v34  ;;  %v2209_v4 = vpop.f32.mrb[83].mxu1  ;;  %v2955_v25 = vld [vmem:[#allocation2 + $0x8] sm:$0xff] }
 0x18b   : > { %2301 = vst.msk [vmem:[#allocation2 + $0xe0] sm:$0xff] %vm626_vm6, %v2265_v33  ;;  %v2906_v41 = vadd.f32 %v2835_v28, %v2333_v38  ;;  %v2336_v36 = vld [vmem:[#allocation2 + $0xd8] sm:$0xff]  ;;  %v2266_v42 = vadd.f32 %v2209_v4, %v1827_v31  ;;  %v2960_v33 = vld [vmem:[#allocation2 + $0x30] sm:$0xff] }
 0x18c   : > { %2944 = vst.msk [vmem:[#allocation2 + $0xd0] sm:$0xff] %vm626_vm6, %v2908_v55  ;;  %2304 = vst.msk [vmem:[#allocation2 + $0xf8] sm:$0xff] %vm626_vm6, %v2268_v39  ;;  %v2909_v43 = vadd.f32 %v5995_v30, %v2336_v36  ;;  %v2334_v44 = vld [vmem:[#allocation2 + $0xc8] sm:$0xff]  ;;  %v2958_v55 = vld [vmem:[#allocation2 + $0x20] sm:$0xff] }
 0x18d   : > { %2942 = vst.msk [vmem:[#allocation2 + $0xc0] sm:$0xff] %vm626_vm6, %v2906_v41  ;;  %2302 = vst.msk [vmem:[#allocation2 + $0xe8] sm:$0xff] %vm626_vm6, %v2266_v42  ;;  %v2907_v45 = vadd.f32 %v2838_v35, %v2334_v44  ;;  %v2961_v41 = vld [vmem:[#allocation2 + $0x38] sm:$0xff] }
 0x18e   : > { %2945 = vst.msk [vmem:[#allocation2 + $0xd8] sm:$0xff] %vm626_vm6, %v2909_v43 }
 0x18f   : > { %v5998_v46 = vpop.f32.mrb[84].mxu0  ;;  %2943 = vst.msk [vmem:[#allocation2 + $0xc8] sm:$0xff] %vm626_vm6, %v2907_v45  ;;  %v5964_v15 = vpop.f32.mrb[84].mxu1 }
 0x190   : > { %v2851_v48 = vpop.f32.mrb[85].mxu0  ;;  %v2271_v50 = vadd.f32 %v5964_v15, %v1832_v37  ;;  %v2222_v51 = vpop.f32.mrb[85].mxu1 }
 0x191   : > { %v5999_v53 = vpop.f32.mrb[86].mxu0  ;;  %v2339_v54 = vld [vmem:[#allocation2 + $0xf0] sm:$0xff]  ;;  %v2269_v56 = vadd.f32 %v2222_v51, %v1830_v57  ;;  %v5965_v59 = vpop.f32.mrb[86].mxu1 }
 0x192   : > { %v2854_v58 = vpop.f32.mrb[87].mxu0  ;;  %2307 = vst.msk [vmem:[#allocation2 + $0x110] sm:$0xff] %vm626_vm6, %v2271_v50  ;;  %v2912_v60 = vadd.f32 %v5998_v46, %v2339_v54  ;;  %v2337_v63 = vld [vmem:[#allocation2 + $0xe0] sm:$0xff]  ;;  %v2272_v0 = vadd.f32 %v5965_v59, %v1833_v12  ;;  %v2225_v2 = vpop.f32.mrb[87].mxu1  ;;  %v2959_v46 = vld [vmem:[#allocation2 + $0x28] sm:$0xff] }
 0x193   : > { %2305 = vst.msk [vmem:[#allocation2 + $0x100] sm:$0xff] %vm626_vm6, %v2269_v56  ;;  %v2910_v3 = vadd.f32 %v2851_v48, %v2337_v63  ;;  %v2340_v14 = vld [vmem:[#allocation2 + $0xf8] sm:$0xff]  ;;  %v2270_v47 = vadd.f32 %v2225_v2, %v1831_v23  ;;  %v2964_v56 = vld [vmem:[#allocation2 + $0x50] sm:$0xff] }
 0x194   : > { %2948 = vst.msk [vmem:[#allocation2 + $0xf0] sm:$0xff] %vm626_vm6, %v2912_v60  ;;  %2308 = vst.msk [vmem:[#allocation2 + $0x118] sm:$0xff] %vm626_vm6, %v2272_v0  ;;  %v2913_v62 = vadd.f32 %v5999_v53, %v2340_v14  ;;  %v2338_v40 = vld [vmem:[#allocation2 + $0xe8] sm:$0xff]  ;;  %v2962_v60 = vld [vmem:[#allocation2 + $0x40] sm:$0xff] }
 0x195   : > { %2946 = vst.msk [vmem:[#allocation2 + $0xe0] sm:$0xff] %vm626_vm6, %v2910_v3  ;;  %2306 = vst.msk [vmem:[#allocation2 + $0x108] sm:$0xff] %vm626_vm6, %v2270_v47  ;;  %v2911_v5 = vadd.f32 %v2854_v58, %v2338_v40  ;;  %v2965_v3 = vld [vmem:[#allocation2 + $0x58] sm:$0xff] }
 0x196   : > { %2949 = vst.msk [vmem:[#allocation2 + $0xf8] sm:$0xff] %vm626_vm6, %v2913_v62 }
 0x197   : > { %v6002_v1 = vpop.f32.mrb[88].mxu0  ;;  %2947 = vst.msk [vmem:[#allocation2 + $0xe8] sm:$0xff] %vm626_vm6, %v2911_v5  ;;  %v6008_v7 = vpop.f32.mrb[88].mxu1 }
 0x198   : > { %v2867_v8 = vpop.f32.mrb[89].mxu0  ;;  %v3396_v9 = vadd.f32 %v6008_v7, %v2956_v6  ;;  %v3251_v61 = vpop.f32.mrb[89].mxu1 }
 0x199   : > { %v6003_v17 = vpop.f32.mrb[90].mxu0  ;;  %v2343_v49 = vld [vmem:[#allocation2 + $0x110] sm:$0xff]  ;;  %v3394_v16 = vadd.f32 %v3251_v61, %v2954_v10  ;;  %v6009_v19 = vpop.f32.mrb[90].mxu1 }
 0x19a   : > { %v2870_v20 = vpop.f32.mrb[91].mxu0  ;;  %v2916_v21 = vadd.f32 %v6002_v1, %v2343_v49  ;;  %3432 = vst.msk [vmem:[#allocation2 + $0x10] sm:$0xff] %vm626_vm6, %v3396_v9  ;;  %v2341_v22 = vld [vmem:[#allocation2 + $0x100] sm:$0xff]  ;;  %v3397_v13 = vadd.f32 %v6009_v19, %v2957_v11  ;;  %v3254_v26 = vpop.f32.mrb[91].mxu1  ;;  %v2963_v1 = vld [vmem:[#allocation2 + $0x48] sm:$0xff] }
 0x19b   : > { %v2914_v27 = vadd.f32 %v2867_v8, %v2341_v22  ;;  %3430 = vst.msk [vmem:[#allocation2] sm:$0xff] %vm626_vm6, %v3394_v16  ;;  %v2344_v28 = vld [vmem:[#allocation2 + $0x118] sm:$0xff]  ;;  %v3395_v52 = vadd.f32 %v3254_v26, %v2955_v25  ;;  %v2968_v16 = vld [vmem:[#allocation2 + $0x70] sm:$0xff]  ;;  %v2966_v22 = vld [vmem:[#allocation2 + $0x60] sm:$0xff] }
 0x19c   : > { %2952 = vst.msk [vmem:[#allocation2 + $0x110] sm:$0xff] %vm626_vm6, %v2916_v21  ;;  %v2917_v18 = vadd.f32 %v6003_v17, %v2344_v28  ;;  %3433 = vst.msk [vmem:[#allocation2 + $0x18] sm:$0xff] %vm626_vm6, %v3397_v13  ;;  %v2342_v29 = vld [vmem:[#allocation2 + $0x108] sm:$0xff]  ;;  %v2969_v28 = vld [vmem:[#allocation2 + $0x78] sm:$0xff] }
 0x19d   : > { %2950 = vst.msk [vmem:[#allocation2 + $0x100] sm:$0xff] %vm626_vm6, %v2914_v27  ;;  %v2915_v30 = vadd.f32 %v2870_v20, %v2342_v29  ;;  %3431 = vst.msk [vmem:[#allocation2 + $0x8] sm:$0xff] %vm626_vm6, %v3395_v52  ;;  %v7338_v20 = vld [vmem:[%s7481_s2] ss:$0 sm:$0xff] }
 0x19e   : > { %2953 = vst.msk [vmem:[#allocation2 + $0x118] sm:$0xff] %vm626_vm6, %v2917_v18 }
 0x19f   : > { %v6046_v32 = vpop.f32.mrb[92].mxu0  ;;  %2951 = vst.msk [vmem:[#allocation2 + $0x108] sm:$0xff] %vm626_vm6, %v2915_v30  ;;  %v6012_v34 = vpop.f32.mrb[92].mxu1 }
 0x1a0   : > { %v3762_v24 = vpop.f32.mrb[93].mxu0  ;;  %v3400_v35 = vadd.f32 %v6012_v34, %v2960_v33  ;;  %v3267_v38 = vpop.f32.mrb[93].mxu1  ;;  %v2967_v33 = vld [vmem:[#allocation2 + $0x68] sm:$0xff] }
 0x1a1   : > { %v6047_v39 = vpop.f32.mrb[94].mxu0  ;;  %v3468_v31 = vld [vmem:[#allocation2 + $0x10] sm:$0xff]  ;;  %v3398_v4 = vadd.f32 %v3267_v38, %v2958_v55  ;;  %v6013_v36 = vpop.f32.mrb[94].mxu1 }
 0x1a2   : > { %v3765_v42 = vpop.f32.mrb[95].mxu0  ;;  %3436 = vst.msk [vmem:[#allocation2 + $0x30] sm:$0xff] %vm626_vm6, %v3400_v35  ;;  %v3907_v43 = vadd.f32 %v6046_v32, %v3468_v31  ;;  %v3466_v44 = vld [vmem:[#allocation2] sm:$0xff]  ;;  %v3401_v45 = vadd.f32 %v6013_v36, %v2961_v41  ;;  %v3270_v37 = vpop.f32.mrb[95].mxu1  ;;  %v2972_v41 = vld [vmem:[#allocation2 + $0x90] sm:$0xff] }
 0x1a3   : > { %3434 = vst.msk [vmem:[#allocation2 + $0x20] sm:$0xff] %vm626_vm6, %v3398_v4  ;;  %v3905_v15 = vadd.f32 %v3762_v24, %v3466_v44  ;;  %v3469_v48 = vld [vmem:[#allocation2 + $0x18] sm:$0xff]  ;;  %v3399_v50 = vadd.f32 %v3270_v37, %v2959_v46  ;;  %v2970_v44 = vld [vmem:[#allocation2 + $0x80] sm:$0xff] }
 0x1a4   : > { %3943 = vst.msk [vmem:[#allocation2 + $0x10] sm:$0xff] %vm626_vm6, %v3907_v43  ;;  %3437 = vst.msk [vmem:[#allocation2 + $0x38] sm:$0xff] %vm626_vm6, %v3401_v45  ;;  %v3908_v57 = vadd.f32 %v6047_v39, %v3469_v48  ;;  %v3467_v51 = vld [vmem:[#allocation2 + $0x8] sm:$0xff]  ;;  %v2973_v48 = vld [vmem:[#allocation2 + $0x98] sm:$0xff] }
 0x1a5   : > { %3941 = vst.msk [vmem:[#allocation2] sm:$0xff] %vm626_vm6, %v3905_v15  ;;  %3435 = vst.msk [vmem:[#allocation2 + $0x28] sm:$0xff] %vm626_vm6, %v3399_v50  ;;  %v3906_v53 = vadd.f32 %v3765_v42, %v3467_v51 }
 0x1a6   : > { %3944 = vst.msk [vmem:[#allocation2 + $0x18] sm:$0xff] %vm626_vm6, %v3908_v57 }
 0x1a7   : > { %v6050_v54 = vpop.f32.mrb[96].mxu0  ;;  %3942 = vst.msk [vmem:[#allocation2 + $0x8] sm:$0xff] %vm626_vm6, %v3906_v53  ;;  %v6016_v12 = vpop.f32.mrb[96].mxu1 }
 0x1a8   : > { %v3778_v59 = vpop.f32.mrb[97].mxu0  ;;  %v3404_v58 = vadd.f32 %v6016_v12, %v2964_v56  ;;  %v3283_v63 = vpop.f32.mrb[97].mxu1  ;;  %v2971_v56 = vld [vmem:[#allocation2 + $0x88] sm:$0xff] }
 0x1a9   : > { %v6051_v0 = vpop.f32.mrb[98].mxu0  ;;  %v3472_v23 = vld [vmem:[#allocation2 + $0x30] sm:$0xff]  ;;  %v3402_v2 = vadd.f32 %v3283_v63, %v2962_v60  ;;  %v6017_v14 = vpop.f32.mrb[98].mxu1 }
 0x1aa   : > { %v3781_v47 = vpop.f32.mrb[99].mxu0  ;;  %3440 = vst.msk [vmem:[#allocation2 + $0x50] sm:$0xff] %vm626_vm6, %v3404_v58  ;;  %v3911_v62 = vadd.f32 %v6050_v54, %v3472_v23  ;;  %v3470_v40 = vld [vmem:[#allocation2 + $0x20] sm:$0xff]  ;;  %v3405_v5 = vadd.f32 %v6017_v14, %v2965_v3  ;;  %v3286_v6 = vpop.f32.mrb[99].mxu1  ;;  %v2976_v3 = vld [vmem:[#allocation2 + $0xb0] sm:$0xff] }
 0x1ab   : > { %3438 = vst.msk [vmem:[#allocation2 + $0x40] sm:$0xff] %vm626_vm6, %v3402_v2  ;;  %v3909_v7 = vadd.f32 %v3778_v59, %v3470_v40  ;;  %v3473_v8 = vld [vmem:[#allocation2 + $0x38] sm:$0xff]  ;;  %v3403_v9 = vadd.f32 %v3286_v6, %v2963_v1  ;;  %v2974_v40 = vld [vmem:[#allocation2 + $0xa0] sm:$0xff] }
 0x1ac   : > { %3947 = vst.msk [vmem:[#allocation2 + $0x30] sm:$0xff] %vm626_vm6, %v3911_v62  ;;  %3441 = vst.msk [vmem:[#allocation2 + $0x58] sm:$0xff] %vm626_vm6, %v3405_v5  ;;  %v3912_v10 = vadd.f32 %v6051_v0, %v3473_v8  ;;  %v3471_v61 = vld [vmem:[#allocation2 + $0x28] sm:$0xff]  ;;  %v2977_v8 = vld [vmem:[#allocation2 + $0xb8] sm:$0xff] }
 0x1ad   : > { %3945 = vst.msk [vmem:[#allocation2 + $0x20] sm:$0xff] %vm626_vm6, %v3909_v7  ;;  %3439 = vst.msk [vmem:[#allocation2 + $0x48] sm:$0xff] %vm626_vm6, %v3403_v9  ;;  %v3910_v17 = vadd.f32 %v3781_v47, %v3471_v61 }
 0x1ae   : > { %3948 = vst.msk [vmem:[#allocation2 + $0x38] sm:$0xff] %vm626_vm6, %v3912_v10 }
 0x1af   : > { %v6054_v49 = vpop.f32.mrb[100].mxu0  ;;  %3946 = vst.msk [vmem:[#allocation2 + $0x28] sm:$0xff] %vm626_vm6, %v3910_v17  ;;  %v6020_v11 = vpop.f32.mrb[100].mxu1 }
 0x1b0   : > { %v3794_v19 = vpop.f32.mrb[101].mxu0  ;;  %v3408_v21 = vadd.f32 %v6020_v11, %v2968_v16  ;;  %v3299_v13 = vpop.f32.mrb[101].mxu1  ;;  %v2975_v16 = vld [vmem:[#allocation2 + $0xa8] sm:$0xff] }
 0x1b1   : > { %v6055_v25 = vpop.f32.mrb[102].mxu0  ;;  %v3476_v26 = vld [vmem:[#allocation2 + $0x50] sm:$0xff]  ;;  %v3406_v27 = vadd.f32 %v3299_v13, %v2966_v22  ;;  %v6021_v52 = vpop.f32.mrb[102].mxu1 }
 0x1b2   : > { %v3797_v18 = vpop.f32.mrb[103].mxu0  ;;  %3444 = vst.msk [vmem:[#allocation2 + $0x70] sm:$0xff] %vm626_vm6, %v3408_v21  ;;  %v3915_v29 = vadd.f32 %v6054_v49, %v3476_v26  ;;  %v3474_v30 = vld [vmem:[#allocation2 + $0x40] sm:$0xff]  ;;  %v3409_v32 = vadd.f32 %v6021_v52, %v2969_v28  ;;  %v3302_v34 = vpop.f32.mrb[103].mxu1  ;;  %v2980_v28 = vld [vmem:[#allocation2 + $0xd0] sm:$0xff] }
 0x1b3   : > { %3442 = vst.msk [vmem:[#allocation2 + $0x60] sm:$0xff] %vm626_vm6, %v3406_v27  ;;  %v3913_v24 = vadd.f32 %v3794_v19, %v3474_v30  ;;  %v3477_v35 = vld [vmem:[#allocation2 + $0x58] sm:$0xff]  ;;  %v3407_v55 = vadd.f32 %v3302_v34, %v2967_v33  ;;  %v2978_v30 = vld [vmem:[#allocation2 + $0xc0] sm:$0xff] }
 0x1b4   : > { %3951 = vst.msk [vmem:[#allocation2 + $0x50] sm:$0xff] %vm626_vm6, %v3915_v29  ;;  %3445 = vst.msk [vmem:[#allocation2 + $0x78] sm:$0xff] %vm626_vm6, %v3409_v32  ;;  %v3916_v38 = vadd.f32 %v6055_v25, %v3477_v35  ;;  %v3475_v39 = vld [vmem:[#allocation2 + $0x48] sm:$0xff]  ;;  %v2981_v35 = vld [vmem:[#allocation2 + $0xd8] sm:$0xff] }
 0x1b5   : > { %3949 = vst.msk [vmem:[#allocation2 + $0x40] sm:$0xff] %vm626_vm6, %v3913_v24  ;;  %3443 = vst.msk [vmem:[#allocation2 + $0x68] sm:$0xff] %vm626_vm6, %v3407_v55  ;;  %v3914_v31 = vadd.f32 %v3797_v18, %v3475_v39 }
 0x1b6   : > { %3952 = vst.msk [vmem:[#allocation2 + $0x58] sm:$0xff] %vm626_vm6, %v3916_v38 }
 0x1b7   : > { %v6058_v4 = vpop.f32.mrb[104].mxu0  ;;  %3950 = vst.msk [vmem:[#allocation2 + $0x48] sm:$0xff] %vm626_vm6, %v3914_v31  ;;  %v6024_v36 = vpop.f32.mrb[104].mxu1 }
 0x1b8   : > { %v3810_v42 = vpop.f32.mrb[105].mxu0  ;;  %v3412_v43 = vadd.f32 %v6024_v36, %v2972_v41  ;;  %v3315_v45 = vpop.f32.mrb[105].mxu1  ;;  %v2979_v41 = vld [vmem:[#allocation2 + $0xc8] sm:$0xff] }
 0x1b9   : > { %v6059_v46 = vpop.f32.mrb[106].mxu0  ;;  %v3480_v37 = vld [vmem:[#allocation2 + $0x70] sm:$0xff]  ;;  %v3410_v15 = vadd.f32 %v3315_v45, %v2970_v44  ;;  %v6025_v50 = vpop.f32.mrb[106].mxu1 }
 0x1ba   : > { %v3813_v57 = vpop.f32.mrb[107].mxu0  ;;  %3448 = vst.msk [vmem:[#allocation2 + $0x90] sm:$0xff] %vm626_vm6, %v3412_v43  ;;  %v3919_v51 = vadd.f32 %v6058_v4, %v3480_v37  ;;  %v3478_v53 = vld [vmem:[#allocation2 + $0x60] sm:$0xff]  ;;  %v3413_v54 = vadd.f32 %v6025_v50, %v2973_v48  ;;  %v3318_v12 = vpop.f32.mrb[107].mxu1  ;;  %v2984_v48 = vld [vmem:[#allocation2 + $0xf0] sm:$0xff] }
 0x1bb   : > { %3446 = vst.msk [vmem:[#allocation2 + $0x80] sm:$0xff] %vm626_vm6, %v3410_v15  ;;  %v3917_v59 = vadd.f32 %v3810_v42, %v3478_v53  ;;  %v3481_v58 = vld [vmem:[#allocation2 + $0x78] sm:$0xff]  ;;  %v3411_v60 = vadd.f32 %v3318_v12, %v2971_v56  ;;  %v2982_v53 = vld [vmem:[#allocation2 + $0xe0] sm:$0xff] }
 0x1bc   : > { %3955 = vst.msk [vmem:[#allocation2 + $0x70] sm:$0xff] %vm626_vm6, %v3919_v51  ;;  %3449 = vst.msk [vmem:[#allocation2 + $0x98] sm:$0xff] %vm626_vm6, %v3413_v54  ;;  %v3920_v63 = vadd.f32 %v6059_v46, %v3481_v58  ;;  %v3479_v0 = vld [vmem:[#allocation2 + $0x68] sm:$0xff]  ;;  %v2985_v58 = vld [vmem:[#allocation2 + $0xf8] sm:$0xff] }
 0x1bd   : > { %3953 = vst.msk [vmem:[#allocation2 + $0x60] sm:$0xff] %vm626_vm6, %v3917_v59  ;;  %3447 = vst.msk [vmem:[#allocation2 + $0x88] sm:$0xff] %vm626_vm6, %v3411_v60  ;;  %v3918_v23 = vadd.f32 %v3813_v57, %v3479_v0 }
 0x1be   : > { %3956 = vst.msk [vmem:[#allocation2 + $0x78] sm:$0xff] %vm626_vm6, %v3920_v63 }
 0x1bf   : > { %v6062_v2 = vpop.f32.mrb[108].mxu0  ;;  %3954 = vst.msk [vmem:[#allocation2 + $0x68] sm:$0xff] %vm626_vm6, %v3918_v23  ;;  %v6028_v14 = vpop.f32.mrb[108].mxu1 }
 0x1c0   : > { %v3826_v47 = vpop.f32.mrb[109].mxu0  ;;  %v3416_v62 = vadd.f32 %v6028_v14, %v2976_v3  ;;  %v3331_v5 = vpop.f32.mrb[109].mxu1  ;;  %v2983_v3 = vld [vmem:[#allocation2 + $0xe8] sm:$0xff] }
 0x1c1   : > { %v6063_v1 = vpop.f32.mrb[110].mxu0  ;;  %v3484_v6 = vld [vmem:[#allocation2 + $0x90] sm:$0xff]  ;;  %v3414_v7 = vadd.f32 %v3331_v5, %v2974_v40  ;;  %v6029_v9 = vpop.f32.mrb[110].mxu1 }
 0x1c2   : > { %v3829_v10 = vpop.f32.mrb[111].mxu0  ;;  %3452 = vst.msk [vmem:[#allocation2 + $0xb0] sm:$0xff] %vm626_vm6, %v3416_v62  ;;  %v3923_v61 = vadd.f32 %v6062_v2, %v3484_v6  ;;  %v3482_v17 = vld [vmem:[#allocation2 + $0x80] sm:$0xff]  ;;  %v3417_v49 = vadd.f32 %v6029_v9, %v2977_v8  ;;  %v3334_v11 = vpop.f32.mrb[111].mxu1  ;;  %v2988_v8 = vld [vmem:[#allocation2 + $0x110] sm:$0xff] }
 0x1c3   : > { %3450 = vst.msk [vmem:[#allocation2 + $0xa0] sm:$0xff] %vm626_vm6, %v3414_v7  ;;  %v3921_v19 = vadd.f32 %v3826_v47, %v3482_v17  ;;  %v3485_v21 = vld [vmem:[#allocation2 + $0x98] sm:$0xff]  ;;  %v3415_v22 = vadd.f32 %v3334_v11, %v2975_v16  ;;  %v2986_v17 = vld [vmem:[#allocation2 + $0x100] sm:$0xff] }
 0x1c4   : > { %3959 = vst.msk [vmem:[#allocation2 + $0x90] sm:$0xff] %vm626_vm6, %v3923_v61  ;;  %3453 = vst.msk [vmem:[#allocation2 + $0xb8] sm:$0xff] %vm626_vm6, %v3417_v49  ;;  %v3924_v13 = vadd.f32 %v6063_v1, %v3485_v21  ;;  %v3483_v25 = vld [vmem:[#allocation2 + $0x88] sm:$0xff]  ;;  %v2989_v21 = vld [vmem:[#allocation2 + $0x118] sm:$0xff] }
 0x1c5   : > { %3957 = vst.msk [vmem:[#allocation2 + $0x80] sm:$0xff] %vm626_vm6, %v3921_v19  ;;  %3451 = vst.msk [vmem:[#allocation2 + $0xa8] sm:$0xff] %vm626_vm6, %v3415_v22  ;;  %v3922_v26 = vadd.f32 %v3829_v10, %v3483_v25 }
 0x1c6   : > { %3960 = vst.msk [vmem:[#allocation2 + $0x98] sm:$0xff] %vm626_vm6, %v3924_v13 }
 0x1c7   : > { %v6066_v27 = vpop.f32.mrb[112].mxu0  ;;  %3958 = vst.msk [vmem:[#allocation2 + $0x88] sm:$0xff] %vm626_vm6, %v3922_v26  ;;  %v6032_v52 = vpop.f32.mrb[112].mxu1 }
 0x1c8   : > { %v3842_v18 = vpop.f32.mrb[113].mxu0  ;;  %v3420_v29 = vadd.f32 %v6032_v52, %v2980_v28  ;;  %v3347_v32 = vpop.f32.mrb[113].mxu1  ;;  %v2987_v28 = vld [vmem:[#allocation2 + $0x108] sm:$0xff] }
 0x1c9   : > { %v6067_v33 = vpop.f32.mrb[114].mxu0  ;;  %v3488_v34 = vld [vmem:[#allocation2 + $0xb0] sm:$0xff]  ;;  %v3418_v24 = vadd.f32 %v3347_v32, %v2978_v30  ;;  %v6033_v55 = vpop.f32.mrb[114].mxu1 }
 0x1ca   : > { %v3845_v38 = vpop.f32.mrb[115].mxu0  ;;  %3456 = vst.msk [vmem:[#allocation2 + $0xd0] sm:$0xff] %vm626_vm6, %v3420_v29  ;;  %v3927_v39 = vadd.f32 %v6066_v27, %v3488_v34  ;;  %v3486_v31 = vld [vmem:[#allocation2 + $0xa0] sm:$0xff]  ;;  %v3421_v4 = vadd.f32 %v6033_v55, %v2981_v35  ;;  %v3350_v36 = vpop.f32.mrb[115].mxu1  ;;  %v3979_v35 = vld [vmem:[#allocation2 + $0x10] sm:$0xff] }
 0x1cb   : > { %3454 = vst.msk [vmem:[#allocation2 + $0xc0] sm:$0xff] %vm626_vm6, %v3418_v24  ;;  %v3925_v42 = vadd.f32 %v3842_v18, %v3486_v31  ;;  %v3489_v43 = vld [vmem:[#allocation2 + $0xb8] sm:$0xff]  ;;  %v3419_v44 = vadd.f32 %v3350_v36, %v2979_v41  ;;  %v3977_v31 = vld [vmem:[#allocation2] sm:$0xff] }
 0x1cc   : > { %3963 = vst.msk [vmem:[#allocation2 + $0xb0] sm:$0xff] %vm626_vm6, %v3927_v39  ;;  %3457 = vst.msk [vmem:[#allocation2 + $0xd8] sm:$0xff] %vm626_vm6, %v3421_v4  ;;  %v3928_v45 = vadd.f32 %v6067_v33, %v3489_v43  ;;  %v3487_v46 = vld [vmem:[#allocation2 + $0xa8] sm:$0xff]  ;;  %v3980_v43 = vld [vmem:[#allocation2 + $0x18] sm:$0xff] }
 0x1cd   : > { %3961 = vst.msk [vmem:[#allocation2 + $0xa0] sm:$0xff] %vm626_vm6, %v3925_v42  ;;  %3455 = vst.msk [vmem:[#allocation2 + $0xc8] sm:$0xff] %vm626_vm6, %v3419_v44  ;;  %v3926_v37 = vadd.f32 %v3845_v38, %v3487_v46 }
 0x1ce   : > { %3964 = vst.msk [vmem:[#allocation2 + $0xb8] sm:$0xff] %vm626_vm6, %v3928_v45 }
 0x1cf   : > { %v6070_v15 = vpop.f32.mrb[116].mxu0  ;;  %3962 = vst.msk [vmem:[#allocation2 + $0xa8] sm:$0xff] %vm626_vm6, %v3926_v37  ;;  %v6036_v50 = vpop.f32.mrb[116].mxu1 }
 0x1d0   : > { %v3858_v57 = vpop.f32.mrb[117].mxu0  ;;  %v3424_v51 = vadd.f32 %v6036_v50, %v2984_v48  ;;  %v3363_v54 = vpop.f32.mrb[117].mxu1  ;;  %v3978_v48 = vld [vmem:[#allocation2 + $0x8] sm:$0xff] }
 0x1d1   : > { %v6071_v56 = vpop.f32.mrb[118].mxu0  ;;  %v3492_v12 = vld [vmem:[#allocation2 + $0xd0] sm:$0xff]  ;;  %v3422_v59 = vadd.f32 %v3363_v54, %v2982_v53  ;;  %v6037_v60 = vpop.f32.mrb[118].mxu1 }
 0x1d2   : > { %v3861_v63 = vpop.f32.mrb[119].mxu0  ;;  %3460 = vst.msk [vmem:[#allocation2 + $0xf0] sm:$0xff] %vm626_vm6, %v3424_v51  ;;  %v3931_v0 = vadd.f32 %v6070_v15, %v3492_v12  ;;  %v3490_v23 = vld [vmem:[#allocation2 + $0xc0] sm:$0xff]  ;;  %v3425_v2 = vadd.f32 %v6037_v60, %v2985_v58  ;;  %v3366_v14 = vpop.f32.mrb[119].mxu1  ;;  %v3983_v58 = vld [vmem:[#allocation2 + $0x30] sm:$0xff] }
 0x1d3   : > { %3458 = vst.msk [vmem:[#allocation2 + $0xe0] sm:$0xff] %vm626_vm6, %v3422_v59  ;;  %v3929_v47 = vadd.f32 %v3858_v57, %v3490_v23  ;;  %v3493_v62 = vld [vmem:[#allocation2 + $0xd8] sm:$0xff]  ;;  %v3423_v40 = vadd.f32 %v3366_v14, %v2983_v3  ;;  %v3981_v23 = vld [vmem:[#allocation2 + $0x20] sm:$0xff] }
 0x1d4   : > { %3967 = vst.msk [vmem:[#allocation2 + $0xd0] sm:$0xff] %vm626_vm6, %v3931_v0  ;;  %3461 = vst.msk [vmem:[#allocation2 + $0xf8] sm:$0xff] %vm626_vm6, %v3425_v2  ;;  %v3932_v5 = vadd.f32 %v6071_v56, %v3493_v62  ;;  %v3491_v1 = vld [vmem:[#allocation2 + $0xc8] sm:$0xff]  ;;  %v3984_v62 = vld [vmem:[#allocation2 + $0x38] sm:$0xff] }
 0x1d5   : > { %3965 = vst.msk [vmem:[#allocation2 + $0xc0] sm:$0xff] %vm626_vm6, %v3929_v47  ;;  %3459 = vst.msk [vmem:[#allocation2 + $0xe8] sm:$0xff] %vm626_vm6, %v3423_v40  ;;  %v3930_v6 = vadd.f32 %v3861_v63, %v3491_v1 }
 0x1d6   : > { %3968 = vst.msk [vmem:[#allocation2 + $0xd8] sm:$0xff] %vm626_vm6, %v3932_v5 }
 0x1d7   : > { %v6074_v7 = vpop.f32.mrb[120].mxu0  ;;  %3966 = vst.msk [vmem:[#allocation2 + $0xc8] sm:$0xff] %vm626_vm6, %v3930_v6  ;;  %v6040_v9 = vpop.f32.mrb[120].mxu1 }
 0x1d8   : > { %v3874_v10 = vpop.f32.mrb[121].mxu0  ;;  %v3428_v61 = vadd.f32 %v6040_v9, %v2988_v8  ;;  %v3379_v49 = vpop.f32.mrb[121].mxu1  ;;  %v3982_v8 = vld [vmem:[#allocation2 + $0x28] sm:$0xff] }
 0x1d9   : > { %v6075_v16 = vpop.f32.mrb[122].mxu0  ;;  %v3496_v11 = vld [vmem:[#allocation2 + $0xf0] sm:$0xff]  ;;  %v3426_v19 = vadd.f32 %v3379_v49, %v2986_v17  ;;  %v6041_v22 = vpop.f32.mrb[122].mxu1 }
 0x1da   : > { %v3877_v13 = vpop.f32.mrb[123].mxu0  ;;  %3464 = vst.msk [vmem:[#allocation2 + $0x110] sm:$0xff] %vm626_vm6, %v3428_v61  ;;  %v3935_v25 = vadd.f32 %v6074_v7, %v3496_v11  ;;  %v3494_v26 = vld [vmem:[#allocation2 + $0xe0] sm:$0xff]  ;;  %v3429_v27 = vadd.f32 %v6041_v22, %v2989_v21  ;;  %v3382_v52 = vpop.f32.mrb[123].mxu1  ;;  %v3987_v21 = vld [vmem:[#allocation2 + $0x50] sm:$0xff] }
 0x1db   : > { %3462 = vst.msk [vmem:[#allocation2 + $0x100] sm:$0xff] %vm626_vm6, %v3426_v19  ;;  %v3933_v18 = vadd.f32 %v3874_v10, %v3494_v26  ;;  %v3497_v29 = vld [vmem:[#allocation2 + $0xf8] sm:$0xff]  ;;  %v3427_v30 = vadd.f32 %v3382_v52, %v2987_v28  ;;  %v3985_v26 = vld [vmem:[#allocation2 + $0x40] sm:$0xff] }
 0x1dc   : > { %3971 = vst.msk [vmem:[#allocation2 + $0xf0] sm:$0xff] %vm626_vm6, %v3935_v25  ;;  %3465 = vst.msk [vmem:[#allocation2 + $0x118] sm:$0xff] %vm626_vm6, %v3429_v27  ;;  %v3936_v32 = vadd.f32 %v6075_v16, %v3497_v29  ;;  %v3495_v33 = vld [vmem:[#allocation2 + $0xe8] sm:$0xff]  ;;  %v3988_v29 = vld [vmem:[#allocation2 + $0x58] sm:$0xff] }
 0x1dd   : > { %3969 = vst.msk [vmem:[#allocation2 + $0xe0] sm:$0xff] %vm626_vm6, %v3933_v18  ;;  %3463 = vst.msk [vmem:[#allocation2 + $0x108] sm:$0xff] %vm626_vm6, %v3427_v30  ;;  %v3934_v34 = vadd.f32 %v3877_v13, %v3495_v33 }
 0x1de   : > { %3972 = vst.msk [vmem:[#allocation2 + $0xf8] sm:$0xff] %vm626_vm6, %v3936_v32 }
 0x1df   : > { %v6078_v24 = vpop.f32.mrb[124].mxu0  ;;  %3970 = vst.msk [vmem:[#allocation2 + $0xe8] sm:$0xff] %vm626_vm6, %v3934_v34  ;;  %v6084_v55 = vpop.f32.mrb[124].mxu1 }
 0x1e0   : > { %v3890_v38 = vpop.f32.mrb[125].mxu0  ;;  %v4552_v39 = vadd.f32 %v6084_v55, %v3979_v35  ;;  %v4407_v4 = vpop.f32.mrb[125].mxu1  ;;  %v3986_v35 = vld [vmem:[#allocation2 + $0x48] sm:$0xff] }
 0x1e1   : > { %v6079_v41 = vpop.f32.mrb[126].mxu0  ;;  %v3500_v36 = vld [vmem:[#allocation2 + $0x110] sm:$0xff]  ;;  %v4550_v42 = vadd.f32 %v4407_v4, %v3977_v31  ;;  %v6085_v44 = vpop.f32.mrb[126].mxu1 }
 0x1e2   : > { %v3893_v45 = vpop.f32.mrb[127].mxu0  ;;  %v3939_v46 = vadd.f32 %v6078_v24, %v3500_v36  ;;  %4588 = vst.msk [vmem:[#allocation2 + $0x10] sm:$0xff] %vm626_vm6, %v4552_v39  ;;  %v3498_v37 = vld [vmem:[#allocation2 + $0x100] sm:$0xff]  ;;  %v4553_v15 = vadd.f32 %v6085_v44, %v3980_v43  ;;  %v4410_v50 = vpop.f32.mrb[127].mxu1  ;;  %v3991_v43 = vld [vmem:[#allocation2 + $0x70] sm:$0xff] }
 0x1e3   : > { %v3937_v57 = vadd.f32 %v3890_v38, %v3498_v37  ;;  %4586 = vst.msk [vmem:[#allocation2] sm:$0xff] %vm626_vm6, %v4550_v42  ;;  %v3501_v51 = vld [vmem:[#allocation2 + $0x118] sm:$0xff]  ;;  %v4551_v53 = vadd.f32 %v4410_v50, %v3978_v48  ;;  %v3989_v37 = vld [vmem:[#allocation2 + $0x60] sm:$0xff] }
 0x1e4   : > { %3975 = vst.msk [vmem:[#allocation2 + $0x110] sm:$0xff] %vm626_vm6, %v3939_v46  ;;  %v3940_v54 = vadd.f32 %v6079_v41, %v3501_v51  ;;  %4589 = vst.msk [vmem:[#allocation2 + $0x18] sm:$0xff] %vm626_vm6, %v4553_v15  ;;  %v3499_v56 = vld [vmem:[#allocation2 + $0x108] sm:$0xff]  ;;  %v3992_v51 = vld [vmem:[#allocation2 + $0x78] sm:$0xff] }
 0x1e5   : > { %3973 = vst.msk [vmem:[#allocation2 + $0x100] sm:$0xff] %vm626_vm6, %v3937_v57  ;;  %v3938_v12 = vadd.f32 %v3893_v45, %v3499_v56  ;;  %4587 = vst.msk [vmem:[#allocation2 + $0x8] sm:$0xff] %vm626_vm6, %v4551_v53 }
 0x1e6   : > { %3976 = vst.msk [vmem:[#allocation2 + $0x118] sm:$0xff] %vm626_vm6, %v3940_v54 }
 0x1e7   : > { %v6122_v59 = vpop.f32.mrb[128].mxu0  ;;  %3974 = vst.msk [vmem:[#allocation2 + $0x108] sm:$0xff] %vm626_vm6, %v3938_v12  ;;  %v6088_v60 = vpop.f32.mrb[128].mxu1 }
 0x1e8   : > { %v4919_v63 = vpop.f32.mrb[129].mxu0  ;;  %v4556_v0 = vadd.f32 %v6088_v60, %v3983_v58  ;;  %v4423_v2 = vpop.f32.mrb[129].mxu1  ;;  %v3990_v58 = vld [vmem:[#allocation2 + $0x68] sm:$0xff] }
 0x1e9   : > { %v6123_v3 = vpop.f32.mrb[130].mxu0  ;;  %v4624_v14 = vld [vmem:[#allocation2 + $0x10] sm:$0xff]  ;;  %v4554_v47 = vadd.f32 %v4423_v2, %v3981_v23  ;;  %v6089_v40 = vpop.f32.mrb[130].mxu1 }
 0x1ea   : > { %v4922_v5 = vpop.f32.mrb[131].mxu0  ;;  %4592 = vst.msk [vmem:[#allocation2 + $0x30] sm:$0xff] %vm626_vm6, %v4556_v0  ;;  %v5064_v1 = vadd.f32 %v6122_v59, %v4624_v14  ;;  %v4622_v6 = vld [vmem:[#allocation2] sm:$0xff]  ;;  %v4557_v7 = vadd.f32 %v6089_v40, %v3984_v62  ;;  %v4426_v9 = vpop.f32.mrb[131].mxu1  ;;  %v3995_v62 = vld [vmem:[#allocation2 + $0x90] sm:$0xff] }
 0x1eb   : > { %4590 = vst.msk [vmem:[#allocation2 + $0x20] sm:$0xff] %vm626_vm6, %v4554_v47  ;;  %v5062_v10 = vadd.f32 %v4919_v63, %v4622_v6  ;;  %v4625_v61 = vld [vmem:[#allocation2 + $0x18] sm:$0xff]  ;;  %v4555_v17 = vadd.f32 %v4426_v9, %v3982_v8  ;;  %v3993_v6 = vld [vmem:[#allocation2 + $0x80] sm:$0xff] }
 0x1ec   : > { %5100 = vst.msk [vmem:[#allocation2 + $0x10] sm:$0xff] %vm626_vm6, %v5064_v1  ;;  %4593 = vst.msk [vmem:[#allocation2 + $0x38] sm:$0xff] %vm626_vm6, %v4557_v7  ;;  %v5065_v49 = vadd.f32 %v6123_v3, %v4625_v61  ;;  %v4623_v16 = vld [vmem:[#allocation2 + $0x8] sm:$0xff]  ;;  %v3996_v61 = vld [vmem:[#allocation2 + $0x98] sm:$0xff] }
 0x1ed   : > { %5098 = vst.msk [vmem:[#allocation2] sm:$0xff] %vm626_vm6, %v5062_v10  ;;  %4591 = vst.msk [vmem:[#allocation2 + $0x28] sm:$0xff] %vm626_vm6, %v4555_v17  ;;  %v5063_v11 = vadd.f32 %v4922_v5, %v4623_v16 }
 0x1ee   : > { %5101 = vst.msk [vmem:[#allocation2 + $0x18] sm:$0xff] %vm626_vm6, %v5065_v49 }
 0x1ef   : > { %v6126_v19 = vpop.f32.mrb[132].mxu0  ;;  %5099 = vst.msk [vmem:[#allocation2 + $0x8] sm:$0xff] %vm626_vm6, %v5063_v11  ;;  %v6092_v22 = vpop.f32.mrb[132].mxu1 }
 0x1f0   : > { %v4935_v13 = vpop.f32.mrb[133].mxu0  ;;  %v4560_v25 = vadd.f32 %v6092_v22, %v3987_v21  ;;  %v4439_v27 = vpop.f32.mrb[133].mxu1  ;;  %v3994_v21 = vld [vmem:[#allocation2 + $0x88] sm:$0xff] }
 0x1f1   : > { %v6127_v28 = vpop.f32.mrb[134].mxu0  ;;  %v4628_v52 = vld [vmem:[#allocation2 + $0x30] sm:$0xff]  ;;  %v4558_v18 = vadd.f32 %v4439_v27, %v3985_v26  ;;  %v6093_v30 = vpop.f32.mrb[134].mxu1 }
 0x1f2   : > { %v4938_v32 = vpop.f32.mrb[135].mxu0  ;;  %4596 = vst.msk [vmem:[#allocation2 + $0x50] sm:$0xff] %vm626_vm6, %v4560_v25  ;;  %v5068_v33 = vadd.f32 %v6126_v19, %v4628_v52  ;;  %v4626_v34 = vld [vmem:[#allocation2 + $0x20] sm:$0xff]  ;;  %v4561_v24 = vadd.f32 %v6093_v30, %v3988_v29  ;;  %v4442_v55 = vpop.f32.mrb[135].mxu1  ;;  %v3999_v29 = vld [vmem:[#allocation2 + $0xb0] sm:$0xff] }
 0x1f3   : > { %4594 = vst.msk [vmem:[#allocation2 + $0x40] sm:$0xff] %vm626_vm6, %v4558_v18  ;;  %v5066_v38 = vadd.f32 %v4935_v13, %v4626_v34  ;;  %v4629_v39 = vld [vmem:[#allocation2 + $0x38] sm:$0xff]  ;;  %v4559_v31 = vadd.f32 %v4442_v55, %v3986_v35  ;;  %v3997_v34 = vld [vmem:[#allocation2 + $0xa0] sm:$0xff] }
 0x1f4   : > { %5104 = vst.msk [vmem:[#allocation2 + $0x30] sm:$0xff] %vm626_vm6, %v5068_v33  ;;  %4597 = vst.msk [vmem:[#allocation2 + $0x58] sm:$0xff] %vm626_vm6, %v4561_v24  ;;  %v5069_v4 = vadd.f32 %v6127_v28, %v4629_v39  ;;  %v4627_v41 = vld [vmem:[#allocation2 + $0x28] sm:$0xff]  ;;  %v4000_v39 = vld [vmem:[#allocation2 + $0xb8] sm:$0xff] }
 0x1f5   : > { %5102 = vst.msk [vmem:[#allocation2 + $0x20] sm:$0xff] %vm626_vm6, %v5066_v38  ;;  %4595 = vst.msk [vmem:[#allocation2 + $0x48] sm:$0xff] %vm626_vm6, %v4559_v31  ;;  %v5067_v36 = vadd.f32 %v4938_v32, %v4627_v41 }
 0x1f6   : > { %5105 = vst.msk [vmem:[#allocation2 + $0x38] sm:$0xff] %vm626_vm6, %v5069_v4 }
 0x1f7   : > { %v6130_v42 = vpop.f32.mrb[136].mxu0  ;;  %5103 = vst.msk [vmem:[#allocation2 + $0x28] sm:$0xff] %vm626_vm6, %v5067_v36  ;;  %v6096_v44 = vpop.f32.mrb[136].mxu1 }
 0x1f8   : > { %v4951_v45 = vpop.f32.mrb[137].mxu0  ;;  %v4564_v46 = vadd.f32 %v6096_v44, %v3991_v43  ;;  %v4455_v15 = vpop.f32.mrb[137].mxu1  ;;  %v3998_v43 = vld [vmem:[#allocation2 + $0xa8] sm:$0xff] }
 0x1f9   : > { %v6131_v48 = vpop.f32.mrb[138].mxu0  ;;  %v4632_v50 = vld [vmem:[#allocation2 + $0x50] sm:$0xff]  ;;  %v4562_v57 = vadd.f32 %v4455_v15, %v3989_v37  ;;  %v6097_v53 = vpop.f32.mrb[138].mxu1 }
 0x1fa   : > { %v4954_v54 = vpop.f32.mrb[139].mxu0  ;;  %4600 = vst.msk [vmem:[#allocation2 + $0x70] sm:$0xff] %vm626_vm6, %v4564_v46  ;;  %v5072_v56 = vadd.f32 %v6130_v42, %v4632_v50  ;;  %v4630_v12 = vld [vmem:[#allocation2 + $0x40] sm:$0xff]  ;;  %v4565_v59 = vadd.f32 %v6097_v53, %v3992_v51  ;;  %v4458_v60 = vpop.f32.mrb[139].mxu1  ;;  %v4003_v51 = vld [vmem:[#allocation2 + $0xd0] sm:$0xff] }
 0x1fb   : > { %4598 = vst.msk [vmem:[#allocation2 + $0x60] sm:$0xff] %vm626_vm6, %v4562_v57  ;;  %v5070_v63 = vadd.f32 %v4951_v45, %v4630_v12  ;;  %v4633_v0 = vld [vmem:[#allocation2 + $0x58] sm:$0xff]  ;;  %v4563_v23 = vadd.f32 %v4458_v60, %v3990_v58  ;;  %v4001_v12 = vld [vmem:[#allocation2 + $0xc0] sm:$0xff] }
 0x1fc   : > { %5108 = vst.msk [vmem:[#allocation2 + $0x50] sm:$0xff] %vm626_vm6, %v5072_v56  ;;  %4601 = vst.msk [vmem:[#allocation2 + $0x78] sm:$0xff] %vm626_vm6, %v4565_v59  ;;  %v5073_v2 = vadd.f32 %v6131_v48, %v4633_v0  ;;  %v4631_v3 = vld [vmem:[#allocation2 + $0x48] sm:$0xff]  ;;  %v4004_v0 = vld [vmem:[#allocation2 + $0xd8] sm:$0xff] }
 0x1fd   : > { %5106 = vst.msk [vmem:[#allocation2 + $0x40] sm:$0xff] %vm626_vm6, %v5070_v63  ;;  %4599 = vst.msk [vmem:[#allocation2 + $0x68] sm:$0xff] %vm626_vm6, %v4563_v23  ;;  %v5071_v14 = vadd.f32 %v4954_v54, %v4631_v3 }
 0x1fe   : > { %5109 = vst.msk [vmem:[#allocation2 + $0x58] sm:$0xff] %vm626_vm6, %v5073_v2 }
 0x1ff   : > { %v6134_v47 = vpop.f32.mrb[140].mxu0  ;;  %5107 = vst.msk [vmem:[#allocation2 + $0x48] sm:$0xff] %vm626_vm6, %v5071_v14  ;;  %v6100_v40 = vpop.f32.mrb[140].mxu1 }
 0x200   : > { %v4967_v5 = vpop.f32.mrb[141].mxu0  ;;  %v4568_v1 = vadd.f32 %v6100_v40, %v3995_v62  ;;  %v4471_v7 = vpop.f32.mrb[141].mxu1  ;;  %v4002_v62 = vld [vmem:[#allocation2 + $0xc8] sm:$0xff] }
 0x201   : > { %v6135_v8 = vpop.f32.mrb[142].mxu0  ;;  %v4636_v9 = vld [vmem:[#allocation2 + $0x70] sm:$0xff]  ;;  %v4566_v10 = vadd.f32 %v4471_v7, %v3993_v6  ;;  %v6101_v17 = vpop.f32.mrb[142].mxu1 }
 0x202   : > { %v4970_v49 = vpop.f32.mrb[143].mxu0  ;;  %4604 = vst.msk [vmem:[#allocation2 + $0x90] sm:$0xff] %vm626_vm6, %v4568_v1  ;;  %v5076_v16 = vadd.f32 %v6134_v47, %v4636_v9  ;;  %v4634_v11 = vld [vmem:[#allocation2 + $0x60] sm:$0xff]  ;;  %v4569_v19 = vadd.f32 %v6101_v17, %v3996_v61  ;;  %v4474_v22 = vpop.f32.mrb[143].mxu1  ;;  %v4007_v61 = vld [vmem:[#allocation2 + $0xf0] sm:$0xff] }
 0x203   : > { %4602 = vst.msk [vmem:[#allocation2 + $0x80] sm:$0xff] %vm626_vm6, %v4566_v10  ;;  %v5074_v13 = vadd.f32 %v4967_v5, %v4634_v11  ;;  %v4637_v25 = vld [vmem:[#allocation2 + $0x78] sm:$0xff]  ;;  %v4567_v26 = vadd.f32 %v4474_v22, %v3994_v21  ;;  %v4005_v11 = vld [vmem:[#allocation2 + $0xe0] sm:$0xff] }
 0x204   : > { %5112 = vst.msk [vmem:[#allocation2 + $0x70] sm:$0xff] %vm626_vm6, %v5076_v16  ;;  %4605 = vst.msk [vmem:[#allocation2 + $0x98] sm:$0xff] %vm626_vm6, %v4569_v19  ;;  %v5077_v27 = vadd.f32 %v6135_v8, %v4637_v25  ;;  %v4635_v28 = vld [vmem:[#allocation2 + $0x68] sm:$0xff]  ;;  %v4008_v25 = vld [vmem:[#allocation2 + $0xf8] sm:$0xff] }
 0x205   : > { %5110 = vst.msk [vmem:[#allocation2 + $0x60] sm:$0xff] %vm626_vm6, %v5074_v13  ;;  %4603 = vst.msk [vmem:[#allocation2 + $0x88] sm:$0xff] %vm626_vm6, %v4567_v26  ;;  %v5075_v52 = vadd.f32 %v4970_v49, %v4635_v28 }
 0x206   : > { %5113 = vst.msk [vmem:[#allocation2 + $0x78] sm:$0xff] %vm626_vm6, %v5077_v27 }
 0x207   : > { %v6138_v18 = vpop.f32.mrb[144].mxu0  ;;  %5111 = vst.msk [vmem:[#allocation2 + $0x68] sm:$0xff] %vm626_vm6, %v5075_v52  ;;  %v6104_v30 = vpop.f32.mrb[144].mxu1 }
 0x208   : > { %v4983_v32 = vpop.f32.mrb[145].mxu0  ;;  %v4572_v33 = vadd.f32 %v6104_v30, %v3999_v29  ;;  %v4487_v24 = vpop.f32.mrb[145].mxu1  ;;  %v4006_v29 = vld [vmem:[#allocation2 + $0xe8] sm:$0xff] }
 0x209   : > { %v6139_v35 = vpop.f32.mrb[146].mxu0  ;;  %v4640_v55 = vld [vmem:[#allocation2 + $0x90] sm:$0xff]  ;;  %v4570_v38 = vadd.f32 %v4487_v24, %v3997_v34  ;;  %v6105_v31 = vpop.f32.mrb[146].mxu1 }
 0x20a   : > { %v4986_v4 = vpop.f32.mrb[147].mxu0  ;;  %4608 = vst.msk [vmem:[#allocation2 + $0xb0] sm:$0xff] %vm626_vm6, %v4572_v33  ;;  %v5080_v41 = vadd.f32 %v6138_v18, %v4640_v55  ;;  %v4638_v36 = vld [vmem:[#allocation2 + $0x80] sm:$0xff]  ;;  %v4573_v42 = vadd.f32 %v6105_v31, %v4000_v39  ;;  %v4490_v44 = vpop.f32.mrb[147].mxu1  ;;  %v4011_v39 = vld [vmem:[#allocation2 + $0x110] sm:$0xff] }
 0x20b   : > { %4606 = vst.msk [vmem:[#allocation2 + $0xa0] sm:$0xff] %vm626_vm6, %v4570_v38  ;;  %v5078_v45 = vadd.f32 %v4983_v32, %v4638_v36  ;;  %v4641_v46 = vld [vmem:[#allocation2 + $0x98] sm:$0xff]  ;;  %v4571_v37 = vadd.f32 %v4490_v44, %v3998_v43  ;;  %v4009_v36 = vld [vmem:[#allocation2 + $0x100] sm:$0xff] }
 0x20c   : > { %5116 = vst.msk [vmem:[#allocation2 + $0x90] sm:$0xff] %vm626_vm6, %v5080_v41  ;;  %4609 = vst.msk [vmem:[#allocation2 + $0xb8] sm:$0xff] %vm626_vm6, %v4573_v42  ;;  %v5081_v15 = vadd.f32 %v6139_v35, %v4641_v46  ;;  %v4639_v48 = vld [vmem:[#allocation2 + $0x88] sm:$0xff]  ;;  %v4012_v46 = vld [vmem:[#allocation2 + $0x118] sm:$0xff] }
 0x20d   : > { %5114 = vst.msk [vmem:[#allocation2 + $0x80] sm:$0xff] %vm626_vm6, %v5078_v45  ;;  %4607 = vst.msk [vmem:[#allocation2 + $0xa8] sm:$0xff] %vm626_vm6, %v4571_v37  ;;  %v5079_v50 = vadd.f32 %v4986_v4, %v4639_v48 }
 0x20e   : > { %5117 = vst.msk [vmem:[#allocation2 + $0x98] sm:$0xff] %vm626_vm6, %v5081_v15 }
 0x20f   : > { %v6142_v57 = vpop.f32.mrb[148].mxu0  ;;  %5115 = vst.msk [vmem:[#allocation2 + $0x88] sm:$0xff] %vm626_vm6, %v5079_v50  ;;  %v6108_v53 = vpop.f32.mrb[148].mxu1 }
 0x210   : > { %v4999_v54 = vpop.f32.mrb[149].mxu0  ;;  %v4576_v56 = vadd.f32 %v6108_v53, %v4003_v51  ;;  %v4503_v59 = vpop.f32.mrb[149].mxu1  ;;  %v4010_v51 = vld [vmem:[#allocation2 + $0x108] sm:$0xff] }
 0x211   : > { %v6143_v58 = vpop.f32.mrb[150].mxu0  ;;  %v4644_v60 = vld [vmem:[#allocation2 + $0xb0] sm:$0xff]  ;;  %v4574_v63 = vadd.f32 %v4503_v59, %v4001_v12  ;;  %v6109_v23 = vpop.f32.mrb[150].mxu1 }
 0x212   : > { %v5002_v2 = vpop.f32.mrb[151].mxu0  ;;  %4612 = vst.msk [vmem:[#allocation2 + $0xd0] sm:$0xff] %vm626_vm6, %v4576_v56  ;;  %v5084_v3 = vadd.f32 %v6142_v57, %v4644_v60  ;;  %v4642_v14 = vld [vmem:[#allocation2 + $0xa0] sm:$0xff]  ;;  %v4577_v47 = vadd.f32 %v6109_v23, %v4004_v0  ;;  %v4506_v40 = vpop.f32.mrb[151].mxu1 }
 0x213   : > { %4610 = vst.msk [vmem:[#allocation2 + $0xc0] sm:$0xff] %vm626_vm6, %v4574_v63  ;;  %v5082_v5 = vadd.f32 %v4999_v54, %v4642_v14  ;;  %v4645_v1 = vld [vmem:[#allocation2 + $0xb8] sm:$0xff]  ;;  %v4575_v6 = vadd.f32 %v4506_v40, %v4002_v62 }
 0x214   : > { %5120 = vst.msk [vmem:[#allocation2 + $0xb0] sm:$0xff] %vm626_vm6, %v5084_v3  ;;  %4613 = vst.msk [vmem:[#allocation2 + $0xd8] sm:$0xff] %vm626_vm6, %v4577_v47  ;;  %v5085_v7 = vadd.f32 %v6143_v58, %v4645_v1  ;;  %v4643_v8 = vld [vmem:[#allocation2 + $0xa8] sm:$0xff] }
 0x215   : > { %5118 = vst.msk [vmem:[#allocation2 + $0xa0] sm:$0xff] %vm626_vm6, %v5082_v5  ;;  %4611 = vst.msk [vmem:[#allocation2 + $0xc8] sm:$0xff] %vm626_vm6, %v4575_v6  ;;  %v5083_v9 = vadd.f32 %v5002_v2, %v4643_v8 }
 0x216   : > { %5121 = vst.msk [vmem:[#allocation2 + $0xb8] sm:$0xff] %vm626_vm6, %v5085_v7 }
 0x217   : > { %v6146_v10 = vpop.f32.mrb[152].mxu0  ;;  %5119 = vst.msk [vmem:[#allocation2 + $0xa8] sm:$0xff] %vm626_vm6, %v5083_v9  ;;  %v6112_v17 = vpop.f32.mrb[152].mxu1 }
 0x218   : > { %v5015_v49 = vpop.f32.mrb[153].mxu0  ;;  %v4580_v16 = vadd.f32 %v6112_v17, %v4007_v61  ;;  %v4519_v19 = vpop.f32.mrb[153].mxu1 }
 0x219   : > { %v6147_v21 = vpop.f32.mrb[154].mxu0  ;;  %v4648_v22 = vld [vmem:[#allocation2 + $0xd0] sm:$0xff]  ;;  %v4578_v13 = vadd.f32 %v4519_v19, %v4005_v11  ;;  %v6113_v26 = vpop.f32.mrb[154].mxu1 }
 0x21a   : > { %v5018_v27 = vpop.f32.mrb[155].mxu0  ;;  %4616 = vst.msk [vmem:[#allocation2 + $0xf0] sm:$0xff] %vm626_vm6, %v4580_v16  ;;  %v5088_v28 = vadd.f32 %v6146_v10, %v4648_v22  ;;  %v4646_v52 = vld [vmem:[#allocation2 + $0xc0] sm:$0xff]  ;;  %v4581_v18 = vadd.f32 %v6113_v26, %v4008_v25  ;;  %v4522_v30 = vpop.f32.mrb[155].mxu1 }
 0x21b   : > { %4614 = vst.msk [vmem:[#allocation2 + $0xe0] sm:$0xff] %vm626_vm6, %v4578_v13  ;;  %v5086_v32 = vadd.f32 %v5015_v49, %v4646_v52  ;;  %v4649_v33 = vld [vmem:[#allocation2 + $0xd8] sm:$0xff]  ;;  %v4579_v34 = vadd.f32 %v4522_v30, %v4006_v29 }
 0x21c   : > { %5124 = vst.msk [vmem:[#allocation2 + $0xd0] sm:$0xff] %vm626_vm6, %v5088_v28  ;;  %4617 = vst.msk [vmem:[#allocation2 + $0xf8] sm:$0xff] %vm626_vm6, %v4581_v18  ;;  %v5089_v24 = vadd.f32 %v6147_v21, %v4649_v33  ;;  %v4647_v35 = vld [vmem:[#allocation2 + $0xc8] sm:$0xff] }
 0x21d   : > { %5122 = vst.msk [vmem:[#allocation2 + $0xc0] sm:$0xff] %vm626_vm6, %v5086_v32  ;;  %4615 = vst.msk [vmem:[#allocation2 + $0xe8] sm:$0xff] %vm626_vm6, %v4579_v34  ;;  %v5087_v55 = vadd.f32 %v5018_v27, %v4647_v35 }
 0x21e   : > { %5125 = vst.msk [vmem:[#allocation2 + $0xd8] sm:$0xff] %vm626_vm6, %v5089_v24 }
 0x21f   : > { %v6150_v38 = vpop.f32.mrb[156].mxu0  ;;  %5123 = vst.msk [vmem:[#allocation2 + $0xc8] sm:$0xff] %vm626_vm6, %v5087_v55  ;;  %v6116_v31 = vpop.f32.mrb[156].mxu1 }
 0x220   : > { %v5031_v4 = vpop.f32.mrb[157].mxu0  ;;  %v4584_v41 = vadd.f32 %v6116_v31, %v4011_v39  ;;  %v4535_v42 = vpop.f32.mrb[157].mxu1 }
 0x221   : > { %v6151_v43 = vpop.f32.mrb[158].mxu0  ;;  %v4652_v44 = vld [vmem:[#allocation2 + $0xf0] sm:$0xff]  ;;  %v4582_v45 = vadd.f32 %v4535_v42, %v4009_v36  ;;  %v6117_v37 = vpop.f32.mrb[158].mxu1 }
 0x222   : > { %v5034_v15 = vpop.f32.mrb[159].mxu0  ;;  %4620 = vst.msk [vmem:[#allocation2 + $0x110] sm:$0xff] %vm626_vm6, %v4584_v41  ;;  %v5092_v48 = vadd.f32 %v6150_v38, %v4652_v44  ;;  %v4650_v50 = vld [vmem:[#allocation2 + $0xe0] sm:$0xff]  ;;  %v4585_v57 = vadd.f32 %v6117_v37, %v4012_v46  ;;  %v4538_v53 = vpop.f32.mrb[159].mxu1 }
 0x223   : > { %4618 = vst.msk [vmem:[#allocation2 + $0x100] sm:$0xff] %vm626_vm6, %v4582_v45  ;;  %v5090_v54 = vadd.f32 %v5031_v4, %v4650_v50  ;;  %v4653_v56 = vld [vmem:[#allocation2 + $0xf8] sm:$0xff]  ;;  %v4583_v12 = vadd.f32 %v4538_v53, %v4010_v51 }
 0x224   : > { %5128 = vst.msk [vmem:[#allocation2 + $0xf0] sm:$0xff] %vm626_vm6, %v5092_v48  ;;  %4621 = vst.msk [vmem:[#allocation2 + $0x118] sm:$0xff] %vm626_vm6, %v4585_v57  ;;  %v5093_v59 = vadd.f32 %v6151_v43, %v4653_v56  ;;  %v4651_v58 = vld [vmem:[#allocation2 + $0xe8] sm:$0xff] }
 0x225   : > { %5126 = vst.msk [vmem:[#allocation2 + $0xe0] sm:$0xff] %vm626_vm6, %v5090_v54  ;;  %4619 = vst.msk [vmem:[#allocation2 + $0x108] sm:$0xff] %vm626_vm6, %v4583_v12  ;;  %v5091_v60 = vadd.f32 %v5034_v15, %v4651_v58 }
 0x226   : > { %5129 = vst.msk [vmem:[#allocation2 + $0xf8] sm:$0xff] %vm626_vm6, %v5093_v59 }
 0x227   : > { %v6154_v63 = vpop.f32.mrb[160].mxu0  ;;  %5127 = vst.msk [vmem:[#allocation2 + $0xe8] sm:$0xff] %vm626_vm6, %v5091_v60 }
 0x228   : > { %v5047_v0 = vpop.f32.mrb[161].mxu0 }
 0x229   : > { %v6155_v23 = vpop.f32.mrb[162].mxu0  ;;  %v4656_v2 = vld [vmem:[#allocation2 + $0x110] sm:$0xff] }
 0x22a   : > { %v5050_v3 = vpop.f32.mrb[163].mxu0  ;;  %v5096_v14 = vadd.f32 %v6154_v63, %v4656_v2  ;;  %v4654_v47 = vld [vmem:[#allocation2 + $0x100] sm:$0xff] }
 0x22b   : > { %v5094_v62 = vadd.f32 %v5047_v0, %v4654_v47  ;;  %v4657_v40 = vld [vmem:[#allocation2 + $0x118] sm:$0xff] }
 0x22c   : > { %5132 = vst.msk [vmem:[#allocation2 + $0x110] sm:$0xff] %vm626_vm6, %v5096_v14  ;;  %v5097_v5 = vadd.f32 %v6155_v23, %v4657_v40  ;;  %v4655_v1 = vld [vmem:[#allocation2 + $0x108] sm:$0xff] }
 0x22d   : > { %5130 = vst.msk [vmem:[#allocation2 + $0x100] sm:$0xff] %vm626_vm6, %v5094_v62  ;;  %v5095_v6 = vadd.f32 %v5050_v3, %v4655_v1 }
 0x22e   : > { %5133 = vst.msk [vmem:[#allocation2 + $0x118] sm:$0xff] %vm626_vm6, %v5097_v5 }
 0x22f   : > { %5131 = vst.msk [vmem:[#allocation2 + $0x108] sm:$0xff] %vm626_vm6, %v5095_v6 }
 0x230 LB: >> { %s5141_s28 = smul.u32 18, %s6401_s27  ;;  %s5638_s30 = sshll.u32 %s6401_s27, 4  ;;  %s6401_s27 = sphi %s6399_s27, %s5140_s27  }
 0x231   : >> { %s5160_s5 = scalar_lea.vmem %s6463_s29, %s5638_s30  ;;  %s5165_s8 = scalar_lea.vmem %s6468_s6, %s5638_s30 }
 0x232   : >> { %s5142_s7 = scalar_lea.vmem [#allocation2], %s5141_s28  ;;  %v5161_v61 = vld [vmem:[%s5160_s5] sm:$0xff]  ;;  %v5162_v17 = vld [vmem:[%s5160_s5 + $0x8] sm:$0xff]  ;;  %s5140_s27 = sadd.s32 1, %s6401_s27  }
 0x233   : >> { %p5137_p5 = scmp.ge.s32.totalorder %s5140_s27, 16  }
 0x236   : >> { %v5143_v7 = vld [vmem:[%s5142_s7] sm:$0xff]  ;;  %v5144_v8 = vld [vmem:[%s5142_s7 + $0x8] sm:$0xff] }
 0x237   : >> { %v5151_v9 = vadd.f32 %v7338_v20, %v5143_v7  ;;  %v5152_v10 = vadd.f32 %v7338_v20, %v5144_v8 }
 0x238   : > { %5139 = sbr.rel (!%p5137_p5) target bundleno = 560 (0x230), region = 87 }
 0x239   : >> { %vm5153_vm9 = vcmp.gt.f32.partialorder %v5151_v9, 0.0  ;;  %v5155_v49 = vmul.f32 0.1, %v5151_v9  ;;  %vm5154_vm10 = vcmp.gt.f32.partialorder %v5152_v10, 0.0  ;;  %v5156_v16 = vmul.f32 0.1, %v5152_v10 }
 0x23b   : >> { %v5157_v11 = vsel %vm5153_vm9, %v5151_v9, %v5155_v49  ;;  %v5158_v19 = vsel %vm5154_vm10, %v5152_v10, %v5156_v16 }
 0x23c   : >> { %v5163_v21 = vadd.f32 %v5161_v61, %v5157_v11  ;;  %v5164_v22 = vadd.f32 %v5162_v17, %v5158_v19 }
 0x23e   : >> { %5166 = vst.msk [vmem:[%s5165_s8] sm:$0xff] %vm626_vm6, %v5163_v21  ;;  %5167 = vst.msk [vmem:[%s5165_s8 + $0x8] sm:$0xff] %vm626_vm6, %v5164_v22 }
 0x23f PF: > { %s14_s17 = sadd.s32 1, %s6397_s17   ;;  %s7484_s15 = smov %s6393_s16 }
 0x240   : > { %p11_p6 = scmp.ge.s32.totalorder %s14_s17, 4   ;;  %s7485_s16 = smov %s7487_s18 }
 0x242   :  { %13 = sbr.rel (!%p11_p6) target bundleno = 2 (0x2), region = 98 }

</bundles_post_ra>
